<compile_context>
chip_gen: v6e
topology: v6e:2x2x1
jax: 0.10.0
libtpu: 0.0.40
codegen_flags: <defaults>
</compile_context>

<pallas_src>
import math

import numpy as np

import jax
import jax.numpy as jnp
from jax.experimental import pallas as pl
from jax.experimental.pallas import tpu as pltpu


B = 8  # images per grid step (multiple of 8 so the (B, 10) output block tiles)


# ---------------------------------------------------------------------------
# Fused LeNet kernel: one grid step == B images, everything stays in VMEM.
# ---------------------------------------------------------------------------
def lenet_kernel(xr_ref, w1_ref, b1_ref, s1_ref, p1_ref,
                 w2_ref, b2_ref, s2e_ref, s2o_ref, p2_ref,
                 wfc_ref, bfc_ref, o_ref):
    bf16 = jnp.bfloat16

    def dot32(a, b):
        return jnp.dot(a, b, preferred_element_type=jnp.float32)

    # ---- conv1 (+bias+relu): ONE (B*24, 140) @ (140, 240) matmul ----------
    # (the 5 kernel-row taps were concatenated along K by the host im2row)
    y1 = jnp.maximum(dot32(xr_ref[...], w1_ref[...]) + b1_ref[...], 0.0)
    y1 = y1.astype(bf16)                                    # cast once, used twice

    # ---- pool1 (2x2): batched block-diagonal row selectors, then columns ---
    r1 = jnp.maximum(dot32(s1_ref[0], y1), dot32(s1_ref[1], y1))      # (12B, 240) f32
    r1 = r1.astype(bf16)
    z = jnp.maximum(dot32(r1, p1_ref[0]), dot32(r1, p1_ref[1]))       # (12B, 120) f32

    # ---- conv2 (+bias+relu): 5 Toeplitz taps on overlapped row windows -----
    # Row 12*b + oh of acc2 (oh < 8) is the valid conv2 output row oh of image
    # b; rows with oh >= 8 mix adjacent images and are never read downstream.
    L = z.shape[0] - 4                                                # 12B - 4
    acc2 = dot32(z[0:L, :].astype(bf16), w2_ref[0])
    for kh in range(1, 5):
        acc2 = acc2 + dot32(z[kh:kh + L, :].astype(bf16), w2_ref[kh])
    a2 = jnp.maximum(acc2 + b2_ref[...], 0.0)                         # (12B-4, 160) f32
    a2 = a2.astype(bf16)                                              # cast once, used 8x

    # ---- pool2 (2x2) + fc1 (320 -> 10) + relu ------------------------------
    # For each of the 4 pooled output rows h: gather that row for every image
    # in the block (0/1 selectors -> M = B), finish the 2x2 pool, and
    # accumulate its contribution to the fully connected layer.
    accfc = None
    for h in range(4):
        rh = jnp.maximum(dot32(s2e_ref[h], a2), dot32(s2o_ref[h], a2))   # (B, 160)
        rh = rh.astype(bf16)
        ch = jnp.maximum(dot32(rh, p2_ref[0]), dot32(rh, p2_ref[1]))     # (B, 80)
        t = dot32(ch.astype(bf16), wfc_ref[h])                           # (B, 10)
        accfc = t if accfc is None else accfc + t
    o_ref[...] = jnp.maximum(accfc + bfc_ref[...], 0.0)                  # (B, 10) f32


# ---------------------------------------------------------------------------
# Host-side (init-time) weight / selector preparation
# ---------------------------------------------------------------------------
def _conv_toeplitz(w, w_in):
    """Lower a torch conv weight (Cout, Cin, K, K) into per-kernel-row Toeplitz
    matrices T of shape (K, w_in*Cin, (w_in-K+1)*Cout) acting on (H, W*C)
    activation rows: y[oh, ow*Cout+co] = sum_kh (x[oh+kh, :] @ T[kh])[ow*Cout+co]."""
    cout, cin, kk, _ = w.shape
    ow = w_in - kk + 1
    t = np.zeros((kk, w_in * cin, ow * cout), np.float32)
    for kh in range(kk):
        for kw in range(kk):
            blk = w[:, :, kh, kw].T                          # (cin, cout)
            for o in range(ow):
                wi = o + kw
                t[kh, wi * cin:(wi + 1) * cin, o * cout:(o + 1) * cout] = blk
    return t


def _col_pool_selectors(w, c):
    """0/1 matrices implementing the column half of a 2x2 max-pool on a
    (rows, w*c) tile:  out = max(y @ P[0], y @ P[1]),  P: (2, w*c, (w//2)*c)."""
    wo = w // 2
    p = np.zeros((2, w * c, wo * c), np.float32)
    for o in range(wo):
        for ci in range(c):
            p[0, (2 * o) * c + ci, o * c + ci] = 1.0
            p[1, (2 * o + 1) * c + ci, o * c + ci] = 1.0
    return p


def _row_pool_selectors(b, rows_in):
    """Batched block-diagonal 0/1 selectors for the row half of a 2x2 max-pool
    on a (b*rows_in, lanes) tile (rows_in rows per image):
        pooled = max(S[0] @ y, S[1] @ y),   S: (2, b*rows_in//2, b*rows_in)."""
    ro = rows_in // 2
    s = np.zeros((2, b * ro, b * rows_in), np.float32)
    for img in range(b):
        for r in range(ro):
            s[0, img * ro + r, img * rows_in + 2 * r] = 1.0
            s[1, img * ro + r, img * rows_in + 2 * r + 1] = 1.0
    return s


def _pool2_row_selectors(b):
    """Row selectors for the fused pool2+fc stage.  The conv2 output tile has
    12 rows per image (8 valid + 4 overlap rows) and 12*b-4 rows total;
    selector h picks conv2 rows 2h / 2h+1 of every image -> shape (b, 12b-4)."""
    L = 12 * b - 4
    se = np.zeros((4, b, L), np.float32)
    so = np.zeros((4, b, L), np.float32)
    for h in range(4):
        for img in range(b):
            se[h, img, 12 * img + 2 * h] = 1.0
            so[h, img, 12 * img + 2 * h + 1] = 1.0
    return se, so


def _fc_weight(fc_w, h, w, c):
    """Permute fc weight (out, c*h*w) [torch NCHW flatten] into (h, w*c, out)
    so the kernel can contract the pooled rows without any transpose."""
    out_dim = fc_w.shape[0]
    t = np.zeros((h, w * c, out_dim), np.float32)
    for hh in range(h):
        for ww in range(w):
            for cc in range(c):
                t[hh, ww * c + cc, :] = fc_w[:, cc * h * w + hh * w + ww]
    return t


def init_params(seed=0):
    """Deterministic PyTorch-style uniform init of the raw module parameters."""
    key = jax.random.PRNGKey(seed)
    ks = jax.random.split(key, 6)

    def uinit(k, shape, fan_in):
        bound = 1.0 / math.sqrt(fan_in)
        return jax.random.uniform(k, shape, jnp.float32, -bound, bound)

    return {
        "conv1_w": uinit(ks[0], (10, 1, 5, 5), 1 * 5 * 5),
        "conv1_b": uinit(ks[1], (10,), 1 * 5 * 5),
        "conv2_w": uinit(ks[2], (20, 10, 5, 5), 10 * 5 * 5),
        "conv2_b": uinit(ks[3], (20,), 10 * 5 * 5),
        "fc1_w": uinit(ks[4], (10, 320), 320),
        "fc1_b": uinit(ks[5], (10,), 320),
    }


def prepare_params(raw, b=B):
    """One-time host prep: Toeplitz conv weights (conv1 K-concatenated), pool
    selectors (batched for B images/step), permuted FC weight, tiled biases.
    Matmul operands are stored in bf16, biases in f32."""
    w1 = np.asarray(raw["conv1_w"], np.float32)
    b1 = np.asarray(raw["conv1_b"], np.float32)
    w2 = np.asarray(raw["conv2_w"], np.float32)
    b2 = np.asarray(raw["conv2_b"], np.float32)
    fw = np.asarray(raw["fc1_w"], np.float32)
    fb = np.asarray(raw["fc1_b"], np.float32)

    w1cat = _conv_toeplitz(w1, 28).reshape(5 * 28, 24 * 10)   # (140, 240)
    s1 = _row_pool_selectors(b, 24)                           # (2, 12b, 24b)
    p1 = _col_pool_selectors(24, 10)                          # (2, 240, 120)
    w2t = _conv_toeplitz(w2, 12)                              # (5, 120, 160)
    s2e, s2o = _pool2_row_selectors(b)                        # (4, b, 12b-4) x2
    p2 = _col_pool_selectors(8, 20)                           # (2, 160, 80)
    wfc = _fc_weight(fw, 4, 4, 20)                            # (4, 80, 10)

    bf = jnp.bfloat16
    return {
        "w1": jnp.asarray(w1cat, bf),
        "b1": jnp.asarray(np.tile(b1, 24)[None, :], jnp.float32),   # (1, 240)
        "s1": jnp.asarray(s1, bf),
        "p1": jnp.asarray(p1, bf),
        "w2": jnp.asarray(w2t, bf),
        "b2": jnp.asarray(np.tile(b2, 8)[None, :], jnp.float32),    # (1, 160)
        "s2e": jnp.asarray(s2e, bf),
        "s2o": jnp.asarray(s2o, bf),
        "p2": jnp.asarray(p2, bf),
        "wfc": jnp.asarray(wfc, bf),
        "bfc": jnp.asarray(fb[None, :], jnp.float32),               # (1, 10)
    }


# ---------------------------------------------------------------------------
# Forward pass (single fused pallas_call, grid over batch blocks of B images)
# ---------------------------------------------------------------------------
def _cost_estimate(steps, b, params):
    L = 12 * b - 4
    dots = ([(24 * b, 140, 240)]                               # conv1
            + [(12 * b, 24 * b, 240)] * 2 + [(12 * b, 240, 120)] * 2   # pool1
            + [(L, 120, 160)] * 5                              # conv2 taps
            + ([(b, L, 160)] * 2 + [(b, 160, 80)] * 2 + [(b, 80, 10)]) * 4)  # pool2+fc
    flops = steps * sum(2 * m * k * n for (m, k, n) in dots)
    w_bytes = sum(int(np.prod(v.shape)) * v.dtype.itemsize for v in params.values())
    bytes_accessed = steps * (24 * b * 140 * 2 + b * 10 * 4) + w_bytes
    return pl.CostEstimate(flops=int(flops), transcendentals=0,
                           bytes_accessed=int(bytes_accessed))


@jax.jit
def net_forward(x_nchw, params):
    b = params["s2e"].shape[1]                 # images per grid step (static)
    n = x_nchw.shape[0]
    npad = -(-n // b) * b
    steps = npad // b
    L = 12 * b - 4

    # Host/XLA-side prep: squeeze channel, zero-pad the batch to a multiple of
    # b, im2row over the 5 conv1 kernel rows (K-concat) and cast once to bf16.
    x = x_nchw.reshape(n, 28, 28).astype(jnp.float32)
    if npad != n:
        x = jnp.pad(x, ((0, npad - n), (0, 0), (0, 0)))
    xr = jnp.concatenate([x[:, kh:kh + 24, :] for kh in range(5)], axis=-1)
    xr = xr.reshape(npad * 24, 140).astype(jnp.bfloat16)

    out = pl.pallas_call(
        lenet_kernel,
        out_shape=jax.ShapeDtypeStruct((npad, 10), jnp.float32),
        grid=(steps,),
        in_specs=[
            pl.BlockSpec((b * 24, 140), lambda i: (i, 0)),           # im2row input (bf16)
            pl.BlockSpec((140, 240), lambda i: (0, 0)),              # conv1 weight (K-concat)
            pl.BlockSpec((1, 240), lambda i: (0, 0)),                # conv1 bias (tiled)
            pl.BlockSpec((2, 12 * b, 24 * b), lambda i: (0, 0, 0)),  # pool1 row selectors
            pl.BlockSpec((2, 240, 120), lambda i: (0, 0, 0)),        # pool1 col selectors
            pl.BlockSpec((5, 120, 160), lambda i: (0, 0, 0)),        # conv2 Toeplitz
            pl.BlockSpec((1, 160), lambda i: (0, 0)),                # conv2 bias (tiled)
            pl.BlockSpec((4, b, L), lambda i: (0, 0, 0)),            # pool2 row sel (even)
            pl.BlockSpec((4, b, L), lambda i: (0, 0, 0)),            # pool2 row sel (odd)
            pl.BlockSpec((2, 160, 80), lambda i: (0, 0, 0)),         # pool2 col selectors
            pl.BlockSpec((4, 80, 10), lambda i: (0, 0, 0)),          # fc1 weight (permuted)
            pl.BlockSpec((1, 10), lambda i: (0, 0)),                 # fc1 bias
        ],
        out_specs=pl.BlockSpec((b, 10), lambda i: (i, 0)),           # lane-packed (B,10) slab
        compiler_params=pltpu.CompilerParams(
            dimension_semantics=("parallel",)),
        cost_estimate=_cost_estimate(steps, b, params),
    )(xr, params["w1"], params["b1"], params["s1"], params["p1"],
      params["w2"], params["b2"], params["s2e"], params["s2o"],
      params["p2"], params["wfc"], params["bfc"])
    return out[:n]


# ---------------------------------------------------------------------------
# Pure-XLA reference (runtime sanity check of the fused kernel)
# ---------------------------------------------------------------------------
def net_reference(x_nchw, raw):
    n = x_nchw.shape[0]
    x = jnp.transpose(x_nchw, (0, 2, 3, 1))              # NCHW -> NHWC

    def conv_relu(xx, w, b):
        cout, cin, k, _ = w.shape
        oh, owd = xx.shape[1] - k + 1, xx.shape[2] - k + 1
        cols = [xx[:, i:i + oh, j:j + owd, c]
                for c in range(cin) for i in range(k) for j in range(k)]
        p = jnp.stack(cols, axis=-1).reshape(n * oh * owd, cin * k * k)
        y = p @ w.reshape(cout, cin * k * k).T + b
        return jnp.maximum(y, 0.0).reshape(n, oh, owd, cout)

    def pool(xx):
        return jnp.maximum(
            jnp.maximum(xx[:, 0::2, 0::2, :], xx[:, 0::2, 1::2, :]),
            jnp.maximum(xx[:, 1::2, 0::2, :], xx[:, 1::2, 1::2, :]))

    y = pool(conv_relu(x, raw["conv1_w"], raw["conv1_b"]))
    y = pool(conv_relu(y, raw["conv2_w"], raw["conv2_b"]))
    y = jnp.transpose(y, (0, 3, 1, 2)).reshape(n, 320)    # torch .view order
    return jnp.maximum(y @ raw["fc1_w"].T + raw["fc1_b"], 0.0)


if __name__ == "__main__":
    raw = init_params(seed=0)
    params = prepare_params(raw)

    # batch=2: single grid step + batch padding path.
    # batch=20: multiple grid steps (tests the batched block index maps).
    for batch in (2, 20):
        x = jax.random.normal(jax.random.PRNGKey(0), (batch, 1, 28, 28),
                              jnp.float32)
        out = jax.block_until_ready(net_forward(x, params))
        ref = jax.block_until_ready(net_reference(x, raw))

        assert out.shape == (batch, 10), out.shape
        assert bool(jnp.all(jnp.isfinite(out)))
        assert bool(jnp.all(out >= 0.0))                  # ReLU output
        # bf16 MXU operands vs f32 reference -> small numeric tolerance.
        assert bool(jnp.allclose(out, ref, atol=5e-2, rtol=5e-2)), \
            float(jnp.max(jnp.abs(out - ref)))

    print("KERNEL_OK")
</pallas_src>

<mosaic_0001>
module attributes {stable_mosaic.version = 11 : i64} {
  func.func @lenet_kernel(%arg0: i32, %arg1: memref<192x140xbf16, #tpu.memory_space<vmem>>, %arg2: memref<140x240xbf16, #tpu.memory_space<vmem>>, %arg3: memref<1x240xf32, #tpu.memory_space<vmem>>, %arg4: memref<2x96x192xbf16, #tpu.memory_space<vmem>>, %arg5: memref<2x240x120xbf16, #tpu.memory_space<vmem>>, %arg6: memref<5x120x160xbf16, #tpu.memory_space<vmem>>, %arg7: memref<1x160xf32, #tpu.memory_space<vmem>>, %arg8: memref<4x8x92xbf16, #tpu.memory_space<vmem>>, %arg9: memref<4x8x92xbf16, #tpu.memory_space<vmem>>, %arg10: memref<2x160x80xbf16, #tpu.memory_space<vmem>>, %arg11: memref<4x80x10xbf16, #tpu.memory_space<vmem>>, %arg12: memref<1x10xf32, #tpu.memory_space<vmem>>, %arg13: memref<8x10xf32, #tpu.memory_space<vmem>>) attributes {dimension_semantics = [#tpu.dimension_semantics<parallel>], iteration_bounds = array<i64: 1>, scalar_prefetch = 0 : i64, scratch_operands = 0 : i64, tpu.core_type = #tpu.core_type<tc>, window_params = [{transform_indices = @transform_0, window_bounds = array<i64: 192, 140>}, {pipeline_mode = #tpu.pipeline_mode<synchronous>, transform_indices = @transform_1, window_bounds = array<i64: 140, 240>}, {pipeline_mode = #tpu.pipeline_mode<synchronous>, transform_indices = @transform_2, window_bounds = array<i64: 1, 240>}, {pipeline_mode = #tpu.pipeline_mode<synchronous>, transform_indices = @transform_3, window_bounds = array<i64: 2, 96, 192>}, {pipeline_mode = #tpu.pipeline_mode<synchronous>, transform_indices = @transform_4, window_bounds = array<i64: 2, 240, 120>}, {pipeline_mode = #tpu.pipeline_mode<synchronous>, transform_indices = @transform_5, window_bounds = array<i64: 5, 120, 160>}, {pipeline_mode = #tpu.pipeline_mode<synchronous>, transform_indices = @transform_6, window_bounds = array<i64: 1, 160>}, {pipeline_mode = #tpu.pipeline_mode<synchronous>, transform_indices = @transform_7, window_bounds = array<i64: 4, 8, 92>}, {pipeline_mode = #tpu.pipeline_mode<synchronous>, transform_indices = @transform_8, window_bounds = array<i64: 4, 8, 92>}, {pipeline_mode = #tpu.pipeline_mode<synchronous>, transform_indices = @transform_9, window_bounds = array<i64: 2, 160, 80>}, {pipeline_mode = #tpu.pipeline_mode<synchronous>, transform_indices = @transform_10, window_bounds = array<i64: 4, 80, 10>}, {pipeline_mode = #tpu.pipeline_mode<synchronous>, transform_indices = @transform_11, window_bounds = array<i64: 1, 10>}, {transform_indices = @transform_12, window_bounds = array<i64: 8, 10>}]} {
    %c0 = arith.constant 0 : index
    %c0_0 = arith.constant 0 : index
    %0 = vector.load %arg1[%c0, %c0_0] : memref<192x140xbf16, #tpu.memory_space<vmem>>, vector<192x140xbf16>
    %c0_1 = arith.constant 0 : index
    %c0_2 = arith.constant 0 : index
    %1 = vector.load %arg2[%c0_1, %c0_2] : memref<140x240xbf16, #tpu.memory_space<vmem>>, vector<140x240xbf16>
    %cst = arith.constant dense<0.000000e+00> : vector<192x240xf32>
    %2 = tpu.matmul %0, %1, %cst {dimension_numbers = #tpu.dot_dimension_numbers<[1], [0], [0], [1], [0, 0, 1, 1], [], []>} : vector<192x140xbf16>, vector<140x240xbf16>, vector<192x240xf32> -> vector<192x240xf32>
    %c0_3 = arith.constant 0 : index
    %c0_4 = arith.constant 0 : index
    %3 = vector.load %arg3[%c0_3, %c0_4] : memref<1x240xf32, #tpu.memory_space<vmem>>, vector<1x240xf32>
    %4 = vector.broadcast %3 : vector<1x240xf32> to vector<192x240xf32>
    %5 = arith.addf %2, %4 : vector<192x240xf32>
    %cst_5 = arith.constant 0.000000e+00 : f32
    %6 = vector.broadcast %cst_5 : f32 to vector<192x240xf32>
    %7 = arith.maximumf %5, %6 : vector<192x240xf32>
    %8 = arith.truncf %7 : vector<192x240xf32> to vector<192x240xbf16>
    %c0_6 = arith.constant 0 : index
    %c0_7 = arith.constant 0 : index
    %c0_8 = arith.constant 0 : index
    %9 = vector.load %arg4[%c0_6, %c0_7, %c0_8] : memref<2x96x192xbf16, #tpu.memory_space<vmem>>, vector<1x96x192xbf16>
    %10 = vector.shape_cast %9 : vector<1x96x192xbf16> to vector<96x192xbf16>
    %cst_9 = arith.constant dense<0.000000e+00> : vector<96x240xf32>
    %11 = tpu.matmul %10, %8, %cst_9 {dimension_numbers = #tpu.dot_dimension_numbers<[1], [0], [0], [1], [0, 0, 1, 1], [], []>} : vector<96x192xbf16>, vector<192x240xbf16>, vector<96x240xf32> -> vector<96x240xf32>
    %c1 = arith.constant 1 : index
    %c0_10 = arith.constant 0 : index
    %c0_11 = arith.constant 0 : index
    %12 = vector.load %arg4[%c1, %c0_10, %c0_11] : memref<2x96x192xbf16, #tpu.memory_space<vmem>>, vector<1x96x192xbf16>
    %13 = vector.shape_cast %12 : vector<1x96x192xbf16> to vector<96x192xbf16>
    %cst_12 = arith.constant dense<0.000000e+00> : vector<96x240xf32>
    %14 = tpu.matmul %13, %8, %cst_12 {dimension_numbers = #tpu.dot_dimension_numbers<[1], [0], [0], [1], [0, 0, 1, 1], [], []>} : vector<96x192xbf16>, vector<192x240xbf16>, vector<96x240xf32> -> vector<96x240xf32>
    %15 = arith.maximumf %11, %14 : vector<96x240xf32>
    %16 = arith.truncf %15 : vector<96x240xf32> to vector<96x240xbf16>
    %c0_13 = arith.constant 0 : index
    %c0_14 = arith.constant 0 : index
    %c0_15 = arith.constant 0 : index
    %17 = vector.load %arg5[%c0_13, %c0_14, %c0_15] : memref<2x240x120xbf16, #tpu.memory_space<vmem>>, vector<1x240x120xbf16>
    %18 = vector.shape_cast %17 : vector<1x240x120xbf16> to vector<240x120xbf16>
    %cst_16 = arith.constant dense<0.000000e+00> : vector<96x120xf32>
    %19 = tpu.matmul %16, %18, %cst_16 {dimension_numbers = #tpu.dot_dimension_numbers<[1], [0], [0], [1], [0, 0, 1, 1], [], []>} : vector<96x240xbf16>, vector<240x120xbf16>, vector<96x120xf32> -> vector<96x120xf32>
    %c1_17 = arith.constant 1 : index
    %c0_18 = arith.constant 0 : index
    %c0_19 = arith.constant 0 : index
    %20 = vector.load %arg5[%c1_17, %c0_18, %c0_19] : memref<2x240x120xbf16, #tpu.memory_space<vmem>>, vector<1x240x120xbf16>
    %21 = vector.shape_cast %20 : vector<1x240x120xbf16> to vector<240x120xbf16>
    %cst_20 = arith.constant dense<0.000000e+00> : vector<96x120xf32>
    %22 = tpu.matmul %16, %21, %cst_20 {dimension_numbers = #tpu.dot_dimension_numbers<[1], [0], [0], [1], [0, 0, 1, 1], [], []>} : vector<96x240xbf16>, vector<240x120xbf16>, vector<96x120xf32> -> vector<96x120xf32>
    %23 = arith.maximumf %19, %22 : vector<96x120xf32>
    %24 = vector.extract_strided_slice %23 {offsets = [0, 0], sizes = [92, 120], strides = [1, 1]} : vector<96x120xf32> to vector<92x120xf32>
    %25 = arith.truncf %24 : vector<92x120xf32> to vector<92x120xbf16>
    %c0_21 = arith.constant 0 : index
    %c0_22 = arith.constant 0 : index
    %c0_23 = arith.constant 0 : index
    %26 = vector.load %arg6[%c0_21, %c0_22, %c0_23] : memref<5x120x160xbf16, #tpu.memory_space<vmem>>, vector<1x120x160xbf16>
    %27 = vector.shape_cast %26 : vector<1x120x160xbf16> to vector<120x160xbf16>
    %cst_24 = arith.constant dense<0.000000e+00> : vector<92x160xf32>
    %28 = tpu.matmul %25, %27, %cst_24 {dimension_numbers = #tpu.dot_dimension_numbers<[1], [0], [0], [1], [0, 0, 1, 1], [], []>} : vector<92x120xbf16>, vector<120x160xbf16>, vector<92x160xf32> -> vector<92x160xf32>
    %29 = vector.extract_strided_slice %23 {offsets = [1, 0], sizes = [92, 120], strides = [1, 1]} : vector<96x120xf32> to vector<92x120xf32>
    %30 = arith.truncf %29 : vector<92x120xf32> to vector<92x120xbf16>
    %c1_25 = arith.constant 1 : index
    %c0_26 = arith.constant 0 : index
    %c0_27 = arith.constant 0 : index
    %31 = vector.load %arg6[%c1_25, %c0_26, %c0_27] : memref<5x120x160xbf16, #tpu.memory_space<vmem>>, vector<1x120x160xbf16>
    %32 = vector.shape_cast %31 : vector<1x120x160xbf16> to vector<120x160xbf16>
    %cst_28 = arith.constant dense<0.000000e+00> : vector<92x160xf32>
    %33 = tpu.matmul %30, %32, %cst_28 {dimension_numbers = #tpu.dot_dimension_numbers<[1], [0], [0], [1], [0, 0, 1, 1], [], []>} : vector<92x120xbf16>, vector<120x160xbf16>, vector<92x160xf32> -> vector<92x160xf32>
    %34 = arith.addf %28, %33 : vector<92x160xf32>
    %35 = vector.extract_strided_slice %23 {offsets = [2, 0], sizes = [92, 120], strides = [1, 1]} : vector<96x120xf32> to vector<92x120xf32>
    %36 = arith.truncf %35 : vector<92x120xf32> to vector<92x120xbf16>
    %c2 = arith.constant 2 : index
    %c0_29 = arith.constant 0 : index
    %c0_30 = arith.constant 0 : index
    %37 = vector.load %arg6[%c2, %c0_29, %c0_30] : memref<5x120x160xbf16, #tpu.memory_space<vmem>>, vector<1x120x160xbf16>
    %38 = vector.shape_cast %37 : vector<1x120x160xbf16> to vector<120x160xbf16>
    %cst_31 = arith.constant dense<0.000000e+00> : vector<92x160xf32>
    %39 = tpu.matmul %36, %38, %cst_31 {dimension_numbers = #tpu.dot_dimension_numbers<[1], [0], [0], [1], [0, 0, 1, 1], [], []>} : vector<92x120xbf16>, vector<120x160xbf16>, vector<92x160xf32> -> vector<92x160xf32>
    %40 = arith.addf %34, %39 : vector<92x160xf32>
    %41 = vector.extract_strided_slice %23 {offsets = [3, 0], sizes = [92, 120], strides = [1, 1]} : vector<96x120xf32> to vector<92x120xf32>
    %42 = arith.truncf %41 : vector<92x120xf32> to vector<92x120xbf16>
    %c3 = arith.constant 3 : index
    %c0_32 = arith.constant 0 : index
    %c0_33 = arith.constant 0 : index
    %43 = vector.load %arg6[%c3, %c0_32, %c0_33] : memref<5x120x160xbf16, #tpu.memory_space<vmem>>, vector<1x120x160xbf16>
    %44 = vector.shape_cast %43 : vector<1x120x160xbf16> to vector<120x160xbf16>
    %cst_34 = arith.constant dense<0.000000e+00> : vector<92x160xf32>
    %45 = tpu.matmul %42, %44, %cst_34 {dimension_numbers = #tpu.dot_dimension_numbers<[1], [0], [0], [1], [0, 0, 1, 1], [], []>} : vector<92x120xbf16>, vector<120x160xbf16>, vector<92x160xf32> -> vector<92x160xf32>
    %46 = arith.addf %40, %45 : vector<92x160xf32>
    %47 = vector.extract_strided_slice %23 {offsets = [4, 0], sizes = [92, 120], strides = [1, 1]} : vector<96x120xf32> to vector<92x120xf32>
    %48 = arith.truncf %47 : vector<92x120xf32> to vector<92x120xbf16>
    %c4 = arith.constant 4 : index
    %c0_35 = arith.constant 0 : index
    %c0_36 = arith.constant 0 : index
    %49 = vector.load %arg6[%c4, %c0_35, %c0_36] : memref<5x120x160xbf16, #tpu.memory_space<vmem>>, vector<1x120x160xbf16>
    %50 = vector.shape_cast %49 : vector<1x120x160xbf16> to vector<120x160xbf16>
    %cst_37 = arith.constant dense<0.000000e+00> : vector<92x160xf32>
    %51 = tpu.matmul %48, %50, %cst_37 {dimension_numbers = #tpu.dot_dimension_numbers<[1], [0], [0], [1], [0, 0, 1, 1], [], []>} : vector<92x120xbf16>, vector<120x160xbf16>, vector<92x160xf32> -> vector<92x160xf32>
    %52 = arith.addf %46, %51 : vector<92x160xf32>
    %c0_38 = arith.constant 0 : index
    %c0_39 = arith.constant 0 : index
    %53 = vector.load %arg7[%c0_38, %c0_39] : memref<1x160xf32, #tpu.memory_space<vmem>>, vector<1x160xf32>
    %54 = vector.broadcast %53 : vector<1x160xf32> to vector<92x160xf32>
    %55 = arith.addf %52, %54 : vector<92x160xf32>
    %cst_40 = arith.constant 0.000000e+00 : f32
    %56 = vector.broadcast %cst_40 : f32 to vector<92x160xf32>
    %57 = arith.maximumf %55, %56 : vector<92x160xf32>
    %58 = arith.truncf %57 : vector<92x160xf32> to vector<92x160xbf16>
    %c0_41 = arith.constant 0 : index
    %c0_42 = arith.constant 0 : index
    %c0_43 = arith.constant 0 : index
    %59 = vector.load %arg8[%c0_41, %c0_42, %c0_43] : memref<4x8x92xbf16, #tpu.memory_space<vmem>>, vector<1x8x92xbf16>
    %60 = vector.shape_cast %59 : vector<1x8x92xbf16> to vector<8x92xbf16>
    %cst_44 = arith.constant dense<0.000000e+00> : vector<8x160xf32>
    %61 = tpu.matmul %60, %58, %cst_44 {dimension_numbers = #tpu.dot_dimension_numbers<[1], [0], [0], [1], [0, 0, 1, 1], [], []>} : vector<8x92xbf16>, vector<92x160xbf16>, vector<8x160xf32> -> vector<8x160xf32>
    %c0_45 = arith.constant 0 : index
    %c0_46 = arith.constant 0 : index
    %c0_47 = arith.constant 0 : index
    %62 = vector.load %arg9[%c0_45, %c0_46, %c0_47] : memref<4x8x92xbf16, #tpu.memory_space<vmem>>, vector<1x8x92xbf16>
    %63 = vector.shape_cast %62 : vector<1x8x92xbf16> to vector<8x92xbf16>
    %cst_48 = arith.constant dense<0.000000e+00> : vector<8x160xf32>
    %64 = tpu.matmul %63, %58, %cst_48 {dimension_numbers = #tpu.dot_dimension_numbers<[1], [0], [0], [1], [0, 0, 1, 1], [], []>} : vector<8x92xbf16>, vector<92x160xbf16>, vector<8x160xf32> -> vector<8x160xf32>
    %65 = arith.maximumf %61, %64 : vector<8x160xf32>
    %66 = arith.truncf %65 : vector<8x160xf32> to vector<8x160xbf16>
    %c0_49 = arith.constant 0 : index
    %c0_50 = arith.constant 0 : index
    %c0_51 = arith.constant 0 : index
    %67 = vector.load %arg10[%c0_49, %c0_50, %c0_51] : memref<2x160x80xbf16, #tpu.memory_space<vmem>>, vector<1x160x80xbf16>
    %68 = vector.shape_cast %67 : vector<1x160x80xbf16> to vector<160x80xbf16>
    %cst_52 = arith.constant dense<0.000000e+00> : vector<8x80xf32>
    %69 = tpu.matmul %66, %68, %cst_52 {dimension_numbers = #tpu.dot_dimension_numbers<[1], [0], [0], [1], [0, 0, 1, 1], [], []>} : vector<8x160xbf16>, vector<160x80xbf16>, vector<8x80xf32> -> vector<8x80xf32>
    %c1_53 = arith.constant 1 : index
    %c0_54 = arith.constant 0 : index
    %c0_55 = arith.constant 0 : index
    %70 = vector.load %arg10[%c1_53, %c0_54, %c0_55] : memref<2x160x80xbf16, #tpu.memory_space<vmem>>, vector<1x160x80xbf16>
    %71 = vector.shape_cast %70 : vector<1x160x80xbf16> to vector<160x80xbf16>
    %cst_56 = arith.constant dense<0.000000e+00> : vector<8x80xf32>
    %72 = tpu.matmul %66, %71, %cst_56 {dimension_numbers = #tpu.dot_dimension_numbers<[1], [0], [0], [1], [0, 0, 1, 1], [], []>} : vector<8x160xbf16>, vector<160x80xbf16>, vector<8x80xf32> -> vector<8x80xf32>
    %73 = arith.maximumf %69, %72 : vector<8x80xf32>
    %74 = arith.truncf %73 : vector<8x80xf32> to vector<8x80xbf16>
    %c0_57 = arith.constant 0 : index
    %c0_58 = arith.constant 0 : index
    %c0_59 = arith.constant 0 : index
    %75 = vector.load %arg11[%c0_57, %c0_58, %c0_59] : memref<4x80x10xbf16, #tpu.memory_space<vmem>>, vector<1x80x10xbf16>
    %76 = vector.shape_cast %75 : vector<1x80x10xbf16> to vector<80x10xbf16>
    %cst_60 = arith.constant dense<0.000000e+00> : vector<8x10xf32>
    %77 = tpu.matmul %74, %76, %cst_60 {dimension_numbers = #tpu.dot_dimension_numbers<[1], [0], [0], [1], [0, 0, 1, 1], [], []>} : vector<8x80xbf16>, vector<80x10xbf16>, vector<8x10xf32> -> vector<8x10xf32>
    %c1_61 = arith.constant 1 : index
    %c0_62 = arith.constant 0 : index
    %c0_63 = arith.constant 0 : index
    %78 = vector.load %arg8[%c1_61, %c0_62, %c0_63] : memref<4x8x92xbf16, #tpu.memory_space<vmem>>, vector<1x8x92xbf16>
    %79 = vector.shape_cast %78 : vector<1x8x92xbf16> to vector<8x92xbf16>
    %cst_64 = arith.constant dense<0.000000e+00> : vector<8x160xf32>
    %80 = tpu.matmul %79, %58, %cst_64 {dimension_numbers = #tpu.dot_dimension_numbers<[1], [0], [0], [1], [0, 0, 1, 1], [], []>} : vector<8x92xbf16>, vector<92x160xbf16>, vector<8x160xf32> -> vector<8x160xf32>
    %c1_65 = arith.constant 1 : index
    %c0_66 = arith.constant 0 : index
    %c0_67 = arith.constant 0 : index
    %81 = vector.load %arg9[%c1_65, %c0_66, %c0_67] : memref<4x8x92xbf16, #tpu.memory_space<vmem>>, vector<1x8x92xbf16>
    %82 = vector.shape_cast %81 : vector<1x8x92xbf16> to vector<8x92xbf16>
    %cst_68 = arith.constant dense<0.000000e+00> : vector<8x160xf32>
    %83 = tpu.matmul %82, %58, %cst_68 {dimension_numbers = #tpu.dot_dimension_numbers<[1], [0], [0], [1], [0, 0, 1, 1], [], []>} : vector<8x92xbf16>, vector<92x160xbf16>, vector<8x160xf32> -> vector<8x160xf32>
    %84 = arith.maximumf %80, %83 : vector<8x160xf32>
    %85 = arith.truncf %84 : vector<8x160xf32> to vector<8x160xbf16>
    %c0_69 = arith.constant 0 : index
    %c0_70 = arith.constant 0 : index
    %c0_71 = arith.constant 0 : index
    %86 = vector.load %arg10[%c0_69, %c0_70, %c0_71] : memref<2x160x80xbf16, #tpu.memory_space<vmem>>, vector<1x160x80xbf16>
    %87 = vector.shape_cast %86 : vector<1x160x80xbf16> to vector<160x80xbf16>
    %cst_72 = arith.constant dense<0.000000e+00> : vector<8x80xf32>
    %88 = tpu.matmul %85, %87, %cst_72 {dimension_numbers = #tpu.dot_dimension_numbers<[1], [0], [0], [1], [0, 0, 1, 1], [], []>} : vector<8x160xbf16>, vector<160x80xbf16>, vector<8x80xf32> -> vector<8x80xf32>
    %c1_73 = arith.constant 1 : index
    %c0_74 = arith.constant 0 : index
    %c0_75 = arith.constant 0 : index
    %89 = vector.load %arg10[%c1_73, %c0_74, %c0_75] : memref<2x160x80xbf16, #tpu.memory_space<vmem>>, vector<1x160x80xbf16>
    %90 = vector.shape_cast %89 : vector<1x160x80xbf16> to vector<160x80xbf16>
    %cst_76 = arith.constant dense<0.000000e+00> : vector<8x80xf32>
    %91 = tpu.matmul %85, %90, %cst_76 {dimension_numbers = #tpu.dot_dimension_numbers<[1], [0], [0], [1], [0, 0, 1, 1], [], []>} : vector<8x160xbf16>, vector<160x80xbf16>, vector<8x80xf32> -> vector<8x80xf32>
    %92 = arith.maximumf %88, %91 : vector<8x80xf32>
    %93 = arith.truncf %92 : vector<8x80xf32> to vector<8x80xbf16>
    %c1_77 = arith.constant 1 : index
    %c0_78 = arith.constant 0 : index
    %c0_79 = arith.constant 0 : index
    %94 = vector.load %arg11[%c1_77, %c0_78, %c0_79] : memref<4x80x10xbf16, #tpu.memory_space<vmem>>, vector<1x80x10xbf16>
    %95 = vector.shape_cast %94 : vector<1x80x10xbf16> to vector<80x10xbf16>
    %cst_80 = arith.constant dense<0.000000e+00> : vector<8x10xf32>
    %96 = tpu.matmul %93, %95, %cst_80 {dimension_numbers = #tpu.dot_dimension_numbers<[1], [0], [0], [1], [0, 0, 1, 1], [], []>} : vector<8x80xbf16>, vector<80x10xbf16>, vector<8x10xf32> -> vector<8x10xf32>
    %97 = arith.addf %77, %96 : vector<8x10xf32>
    %c2_81 = arith.constant 2 : index
    %c0_82 = arith.constant 0 : index
    %c0_83 = arith.constant 0 : index
    %98 = vector.load %arg8[%c2_81, %c0_82, %c0_83] : memref<4x8x92xbf16, #tpu.memory_space<vmem>>, vector<1x8x92xbf16>
    %99 = vector.shape_cast %98 : vector<1x8x92xbf16> to vector<8x92xbf16>
    %cst_84 = arith.constant dense<0.000000e+00> : vector<8x160xf32>
    %100 = tpu.matmul %99, %58, %cst_84 {dimension_numbers = #tpu.dot_dimension_numbers<[1], [0], [0], [1], [0, 0, 1, 1], [], []>} : vector<8x92xbf16>, vector<92x160xbf16>, vector<8x160xf32> -> vector<8x160xf32>
    %c2_85 = arith.constant 2 : index
    %c0_86 = arith.constant 0 : index
    %c0_87 = arith.constant 0 : index
    %101 = vector.load %arg9[%c2_85, %c0_86, %c0_87] : memref<4x8x92xbf16, #tpu.memory_space<vmem>>, vector<1x8x92xbf16>
    %102 = vector.shape_cast %101 : vector<1x8x92xbf16> to vector<8x92xbf16>
    %cst_88 = arith.constant dense<0.000000e+00> : vector<8x160xf32>
    %103 = tpu.matmul %102, %58, %cst_88 {dimension_numbers = #tpu.dot_dimension_numbers<[1], [0], [0], [1], [0, 0, 1, 1], [], []>} : vector<8x92xbf16>, vector<92x160xbf16>, vector<8x160xf32> -> vector<8x160xf32>
    %104 = arith.maximumf %100, %103 : vector<8x160xf32>
    %105 = arith.truncf %104 : vector<8x160xf32> to vector<8x160xbf16>
    %c0_89 = arith.constant 0 : index
    %c0_90 = arith.constant 0 : index
    %c0_91 = arith.constant 0 : index
    %106 = vector.load %arg10[%c0_89, %c0_90, %c0_91] : memref<2x160x80xbf16, #tpu.memory_space<vmem>>, vector<1x160x80xbf16>
    %107 = vector.shape_cast %106 : vector<1x160x80xbf16> to vector<160x80xbf16>
    %cst_92 = arith.constant dense<0.000000e+00> : vector<8x80xf32>
    %108 = tpu.matmul %105, %107, %cst_92 {dimension_numbers = #tpu.dot_dimension_numbers<[1], [0], [0], [1], [0, 0, 1, 1], [], []>} : vector<8x160xbf16>, vector<160x80xbf16>, vector<8x80xf32> -> vector<8x80xf32>
    %c1_93 = arith.constant 1 : index
    %c0_94 = arith.constant 0 : index
    %c0_95 = arith.constant 0 : index
    %109 = vector.load %arg10[%c1_93, %c0_94, %c0_95] : memref<2x160x80xbf16, #tpu.memory_space<vmem>>, vector<1x160x80xbf16>
    %110 = vector.shape_cast %109 : vector<1x160x80xbf16> to vector<160x80xbf16>
    %cst_96 = arith.constant dense<0.000000e+00> : vector<8x80xf32>
    %111 = tpu.matmul %105, %110, %cst_96 {dimension_numbers = #tpu.dot_dimension_numbers<[1], [0], [0], [1], [0, 0, 1, 1], [], []>} : vector<8x160xbf16>, vector<160x80xbf16>, vector<8x80xf32> -> vector<8x80xf32>
    %112 = arith.maximumf %108, %111 : vector<8x80xf32>
    %113 = arith.truncf %112 : vector<8x80xf32> to vector<8x80xbf16>
    %c2_97 = arith.constant 2 : index
    %c0_98 = arith.constant 0 : index
    %c0_99 = arith.constant 0 : index
    %114 = vector.load %arg11[%c2_97, %c0_98, %c0_99] : memref<4x80x10xbf16, #tpu.memory_space<vmem>>, vector<1x80x10xbf16>
    %115 = vector.shape_cast %114 : vector<1x80x10xbf16> to vector<80x10xbf16>
    %cst_100 = arith.constant dense<0.000000e+00> : vector<8x10xf32>
    %116 = tpu.matmul %113, %115, %cst_100 {dimension_numbers = #tpu.dot_dimension_numbers<[1], [0], [0], [1], [0, 0, 1, 1], [], []>} : vector<8x80xbf16>, vector<80x10xbf16>, vector<8x10xf32> -> vector<8x10xf32>
    %117 = arith.addf %97, %116 : vector<8x10xf32>
    %c3_101 = arith.constant 3 : index
    %c0_102 = arith.constant 0 : index
    %c0_103 = arith.constant 0 : index
    %118 = vector.load %arg8[%c3_101, %c0_102, %c0_103] : memref<4x8x92xbf16, #tpu.memory_space<vmem>>, vector<1x8x92xbf16>
    %119 = vector.shape_cast %118 : vector<1x8x92xbf16> to vector<8x92xbf16>
    %cst_104 = arith.constant dense<0.000000e+00> : vector<8x160xf32>
    %120 = tpu.matmul %119, %58, %cst_104 {dimension_numbers = #tpu.dot_dimension_numbers<[1], [0], [0], [1], [0, 0, 1, 1], [], []>} : vector<8x92xbf16>, vector<92x160xbf16>, vector<8x160xf32> -> vector<8x160xf32>
    %c3_105 = arith.constant 3 : index
    %c0_106 = arith.constant 0 : index
    %c0_107 = arith.constant 0 : index
    %121 = vector.load %arg9[%c3_105, %c0_106, %c0_107] : memref<4x8x92xbf16, #tpu.memory_space<vmem>>, vector<1x8x92xbf16>
    %122 = vector.shape_cast %121 : vector<1x8x92xbf16> to vector<8x92xbf16>
    %cst_108 = arith.constant dense<0.000000e+00> : vector<8x160xf32>
    %123 = tpu.matmul %122, %58, %cst_108 {dimension_numbers = #tpu.dot_dimension_numbers<[1], [0], [0], [1], [0, 0, 1, 1], [], []>} : vector<8x92xbf16>, vector<92x160xbf16>, vector<8x160xf32> -> vector<8x160xf32>
    %124 = arith.maximumf %120, %123 : vector<8x160xf32>
    %125 = arith.truncf %124 : vector<8x160xf32> to vector<8x160xbf16>
    %c0_109 = arith.constant 0 : index
    %c0_110 = arith.constant 0 : index
    %c0_111 = arith.constant 0 : index
    %126 = vector.load %arg10[%c0_109, %c0_110, %c0_111] : memref<2x160x80xbf16, #tpu.memory_space<vmem>>, vector<1x160x80xbf16>
    %127 = vector.shape_cast %126 : vector<1x160x80xbf16> to vector<160x80xbf16>
    %cst_112 = arith.constant dense<0.000000e+00> : vector<8x80xf32>
    %128 = tpu.matmul %125, %127, %cst_112 {dimension_numbers = #tpu.dot_dimension_numbers<[1], [0], [0], [1], [0, 0, 1, 1], [], []>} : vector<8x160xbf16>, vector<160x80xbf16>, vector<8x80xf32> -> vector<8x80xf32>
    %c1_113 = arith.constant 1 : index
    %c0_114 = arith.constant 0 : index
    %c0_115 = arith.constant 0 : index
    %129 = vector.load %arg10[%c1_113, %c0_114, %c0_115] : memref<2x160x80xbf16, #tpu.memory_space<vmem>>, vector<1x160x80xbf16>
    %130 = vector.shape_cast %129 : vector<1x160x80xbf16> to vector<160x80xbf16>
    %cst_116 = arith.constant dense<0.000000e+00> : vector<8x80xf32>
    %131 = tpu.matmul %125, %130, %cst_116 {dimension_numbers = #tpu.dot_dimension_numbers<[1], [0], [0], [1], [0, 0, 1, 1], [], []>} : vector<8x160xbf16>, vector<160x80xbf16>, vector<8x80xf32> -> vector<8x80xf32>
    %132 = arith.maximumf %128, %131 : vector<8x80xf32>
    %133 = arith.truncf %132 : vector<8x80xf32> to vector<8x80xbf16>
    %c3_117 = arith.constant 3 : index
    %c0_118 = arith.constant 0 : index
    %c0_119 = arith.constant 0 : index
    %134 = vector.load %arg11[%c3_117, %c0_118, %c0_119] : memref<4x80x10xbf16, #tpu.memory_space<vmem>>, vector<1x80x10xbf16>
    %135 = vector.shape_cast %134 : vector<1x80x10xbf16> to vector<80x10xbf16>
    %cst_120 = arith.constant dense<0.000000e+00> : vector<8x10xf32>
    %136 = tpu.matmul %133, %135, %cst_120 {dimension_numbers = #tpu.dot_dimension_numbers<[1], [0], [0], [1], [0, 0, 1, 1], [], []>} : vector<8x80xbf16>, vector<80x10xbf16>, vector<8x10xf32> -> vector<8x10xf32>
    %137 = arith.addf %117, %136 : vector<8x10xf32>
    %c0_121 = arith.constant 0 : index
    %c0_122 = arith.constant 0 : index
    %138 = vector.load %arg12[%c0_121, %c0_122] : memref<1x10xf32, #tpu.memory_space<vmem>>, vector<1x10xf32>
    %139 = vector.broadcast %138 : vector<1x10xf32> to vector<8x10xf32>
    %140 = arith.addf %137, %139 : vector<8x10xf32>
    %cst_123 = arith.constant 0.000000e+00 : f32
    %141 = vector.broadcast %cst_123 : f32 to vector<8x10xf32>
    %142 = arith.maximumf %140, %141 : vector<8x10xf32>
    %c0_124 = arith.constant 0 : index
    %c0_125 = arith.constant 0 : index
    %143 = vector.load %arg13[%c0_124, %c0_125] : memref<8x10xf32, #tpu.memory_space<vmem>>, vector<8x10xf32>
    tpu.vector_store %arg13[%c0_124, %c0_125], %142 {strides = array<i32>} : memref<8x10xf32, #tpu.memory_space<vmem>>, vector<8x10xf32>,
    return
  }
  func.func @transform_0(%arg0: i32) -> (i32, i32) {
    %c0_i32 = arith.constant 0 : i32
    %c0_i32_0 = arith.constant 0 : i32
    return %arg0, %c0_i32 : i32, i32
  }
  func.func @transform_1(%arg0: i32) -> (i32, i32) {
    %c0_i32 = arith.constant 0 : i32
    %c0_i32_0 = arith.constant 0 : i32
    %c0_i32_1 = arith.constant 0 : i32
    return %c0_i32, %c0_i32_0 : i32, i32
  }
  func.func @transform_2(%arg0: i32) -> (i32, i32) {
    %c0_i32 = arith.constant 0 : i32
    %c0_i32_0 = arith.constant 0 : i32
    %c0_i32_1 = arith.constant 0 : i32
    return %c0_i32, %c0_i32_0 : i32, i32
  }
  func.func @transform_3(%arg0: i32) -> (i32, i32, i32) {
    %c0_i32 = arith.constant 0 : i32
    %c0_i32_0 = arith.constant 0 : i32
    %c0_i32_1 = arith.constant 0 : i32
    %c0_i32_2 = arith.constant 0 : i32
    return %c0_i32, %c0_i32_0, %c0_i32_1 : i32, i32, i32
  }
  func.func @transform_4(%arg0: i32) -> (i32, i32, i32) {
    %c0_i32 = arith.constant 0 : i32
    %c0_i32_0 = arith.constant 0 : i32
    %c0_i32_1 = arith.constant 0 : i32
    %c0_i32_2 = arith.constant 0 : i32
    return %c0_i32, %c0_i32_0, %c0_i32_1 : i32, i32, i32
  }
  func.func @transform_5(%arg0: i32) -> (i32, i32, i32) {
    %c0_i32 = arith.constant 0 : i32
    %c0_i32_0 = arith.constant 0 : i32
    %c0_i32_1 = arith.constant 0 : i32
    %c0_i32_2 = arith.constant 0 : i32
    return %c0_i32, %c0_i32_0, %c0_i32_1 : i32, i32, i32
  }
  func.func @transform_6(%arg0: i32) -> (i32, i32) {
    %c0_i32 = arith.constant 0 : i32
    %c0_i32_0 = arith.constant 0 : i32
    %c0_i32_1 = arith.constant 0 : i32
    return %c0_i32, %c0_i32_0 : i32, i32
  }
  func.func @transform_7(%arg0: i32) -> (i32, i32, i32) {
    %c0_i32 = arith.constant 0 : i32
    %c0_i32_0 = arith.constant 0 : i32
    %c0_i32_1 = arith.constant 0 : i32
    %c0_i32_2 = arith.constant 0 : i32
    return %c0_i32, %c0_i32_0, %c0_i32_1 : i32, i32, i32
  }
  func.func @transform_8(%arg0: i32) -> (i32, i32, i32) {
    %c0_i32 = arith.constant 0 : i32
    %c0_i32_0 = arith.constant 0 : i32
    %c0_i32_1 = arith.constant 0 : i32
    %c0_i32_2 = arith.constant 0 : i32
    return %c0_i32, %c0_i32_0, %c0_i32_1 : i32, i32, i32
  }
  func.func @transform_9(%arg0: i32) -> (i32, i32, i32) {
    %c0_i32 = arith.constant 0 : i32
    %c0_i32_0 = arith.constant 0 : i32
    %c0_i32_1 = arith.constant 0 : i32
    %c0_i32_2 = arith.constant 0 : i32
    return %c0_i32, %c0_i32_0, %c0_i32_1 : i32, i32, i32
  }
  func.func @transform_10(%arg0: i32) -> (i32, i32, i32) {
    %c0_i32 = arith.constant 0 : i32
    %c0_i32_0 = arith.constant 0 : i32
    %c0_i32_1 = arith.constant 0 : i32
    %c0_i32_2 = arith.constant 0 : i32
    return %c0_i32, %c0_i32_0, %c0_i32_1 : i32, i32, i32
  }
  func.func @transform_11(%arg0: i32) -> (i32, i32) {
    %c0_i32 = arith.constant 0 : i32
    %c0_i32_0 = arith.constant 0 : i32
    %c0_i32_1 = arith.constant 0 : i32
    return %c0_i32, %c0_i32_0 : i32, i32
  }
  func.func @transform_12(%arg0: i32) -> (i32, i32) {
    %c0_i32 = arith.constant 0 : i32
    %c0_i32_0 = arith.constant 0 : i32
    return %arg0, %c0_i32 : i32, i32
  }
}

</mosaic_0001>

<bundles_post_ra>
// kernel: net_forward.1
= control target key start
LH: loop header
LB: loop body
LE: loop exit
PB: predicated region body
PF: predicated region fallthrough
CT: control target
= control target key end

     0   :  { %vm292_vm0 = vcmask 97280   ;;  %vm329_vm1 = vcmask 1045504   ;;  %v86_v44 = vlaneseq  ;;  %vm627_vm2 = vcmask 523264   ;;  %s6521_s1 = inlined_call_operand.vmem [shape: bf16[140,240], index: 1, kind: input, shape index: {}]   ;;  %s6522_s0 = inlined_call_operand.vmem [shape: bf16[192,140], index: 0, kind: input, shape index: {}]   ;;  %s6523_s3 = inlined_call_operand.vmem [shape: bf16[2,96,192], index: 3, kind: input, shape index: {}]   ;;  %s6524_s2 = inlined_call_operand.vmem [shape: f32[1,240], index: 2, kind: input, shape index: {}]   ;;  %s6525_s4 = inlined_call_operand.vmem [shape: bf16[2,240,120], index: 4, kind: input, shape index: {}]   ;;  %s6526_s5 = inlined_call_operand.vmem [shape: bf16[5,120,160], index: 5, kind: input, shape index: {}]   ;;  %s6527_s9 = inlined_call_operand.vmem [shape: bf16[2,160,80], index: 9, kind: input, shape index: {}]   ;;  %s6528_s6 = inlined_call_operand.vmem [shape: f32[1,160], index: 6, kind: input, shape index: {}]   ;;  %s6529_s7 = inlined_call_operand.vmem [shape: bf16[4,8,92], index: 7, kind: input, shape index: {}]   ;;  %s6530_s8 = inlined_call_operand.vmem [shape: bf16[4,8,92], index: 8, kind: input, shape index: {}]   ;;  %s6531_s10 = inlined_call_operand.vmem [shape: bf16[4,80,10], index: 10, kind: input, shape index: {}]   ;;  %s6532_s11 = inlined_call_operand.vmem [shape: f32[1,10], index: 11, kind: input, shape index: {}]   ;;  %s6533_s12 = inlined_call_operand.vmem [shape: f32[8,10], index: 12, kind: output, shape index: {}]  }
   0x1   :  { %v4476_v0 = vld [vmem:[%s6521_s1 + $0x74] ss:$8 sps:$4 sm:$0xff]   ;;  %v4478_v1 = vld [vmem:[%s6521_s1 + $0x70] ss:$8 sps:$4 sm:$0xff]   ;;  %v4479_v2 = vld [vmem:[%s6521_s1 + $0x64] ss:$8 sps:$4 sm:$0xff]  }
   0x2   :  { %336 = vmatprep.subr.bf16.mxu0 %v4476_v0  ;;  %v4481_v3 = vld [vmem:[%s6521_s1 + $0x60] ss:$8 sps:$4 sm:$0xff]   ;;  %v4482_v4 = vld [vmem:[%s6521_s1 + $0x54] ss:$8 sps:$4 sm:$0xff]   ;;  %v4484_v5 = vld [vmem:[%s6521_s1 + $0x50] ss:$8 sps:$4 sm:$0xff]  }
   0x3   :  { %337 = vmatpush1.bf16.msra.mxu0 %v4478_v1  ;;  %v4485_v6 = vld [vmem:[%s6521_s1 + $0x44] ss:$8 sps:$4 sm:$0xff]   ;;  %v4487_v7 = vld [vmem:[%s6521_s1 + $0x40] ss:$8 sps:$4 sm:$0xff]   ;;  %v4488_v8 = vld [vmem:[%s6521_s1 + $0x34] ss:$8 sps:$4 sm:$0xff]  }
   0x4   :  { %338 = vmatprep.subr.bf16.mxu0 %v4479_v2  ;;  %v4505_v9 = vld [vmem:[%s6522_s0 + $0x4] ss:$8 sps:$4 sm:$0xff]   ;;  %v4490_v10 = vld [vmem:[%s6521_s1 + $0x30] ss:$8 sps:$4 sm:$0xff]   ;;  %v4493_v12 = vld [vmem:[%s6521_s1 + $0x20] ss:$8 sps:$4 sm:$0xff]  }
   0x5   :  { %3961 = vmatprep.mubr.msk.bf16.mxu0 %vm292_vm0, %v4505_v9  ;;  %v4491_v11 = vld [vmem:[%s6521_s1 + $0x24] ss:$8 sps:$4 sm:$0xff]   ;;  %v4494_v13 = vld [vmem:[%s6521_s1 + $0x14] ss:$8 sps:$4 sm:$0xff]   ;;  %v4496_v14 = vld [vmem:[%s6521_s1 + $0x10] ss:$8 sps:$4 sm:$0xff]  }
   0x6   :  { %v4497_v15 = vld [vmem:[%s6521_s1 + $0x4] ss:$8 sps:$4 sm:$0xff]   ;;  %v4499_v16 = vld [vmem:[%s6521_s1] ss:$8 sps:$4 sm:$0xff]   ;;  %v4506_v21 = vld [vmem:[%s6522_s0 + $0x14] ss:$8 sps:$4 sm:$0xff]  }
   0x7   :  { %339 = vmatpush1.bf16.msra.mxu0 %v4481_v3  ;;  %v4500_v17 = vld [vmem:[%s6521_s1 + $0x84] ss:$8 sps:$4 sm:$0x3f]   ;;  %v4502_v18 = vld [vmem:[%s6521_s1 + $0x80] ss:$8 sps:$4 sm:$0x3f]  }
   0x8   :  { %340 = vmatprep.subr.bf16.mxu0 %v4482_v4  ;;  %v331_v19 = vsel %vm329_vm1, %v4502_v18, 0  ;;  %v4503_v20 = vld [vmem:[%s6522_s0] ss:$8 sps:$4 sm:$0xff]   ;;  %v4508_v22 = vld [vmem:[%s6522_s0 + $0x10] ss:$8 sps:$4 sm:$0xff]   ;;  %v4972_v45 = vshrl.u32 %v86_v44, 7 }
   0x9   :  { %v4509_v23 = vld [vmem:[%s6522_s0 + $0x24] ss:$8 sps:$4 sm:$0xff]   ;;  %v4511_v24 = vld [vmem:[%s6522_s0 + $0x20] ss:$8 sps:$4 sm:$0xff]   ;;  %v4512_v25 = vld [vmem:[%s6522_s0 + $0x34] ss:$8 sps:$4 sm:$0xff]  }
   0xa   :  { %v4514_v26 = vld [vmem:[%s6522_s0 + $0x30] ss:$8 sps:$4 sm:$0xff]   ;;  %v4515_v27 = vld [vmem:[%s6522_s0 + $0x44] ss:$8 sps:$4 sm:$0xff]   ;;  %v4517_v28 = vld [vmem:[%s6522_s0 + $0x40] ss:$8 sps:$4 sm:$0xff]  }
   0xb   :  { %341 = vmatpush1.bf16.msra.mxu0 %v4484_v5  ;;  %v4518_v29 = vld [vmem:[%s6522_s0 + $0x54] ss:$8 sps:$4 sm:$0xff]   ;;  %v4520_v30 = vld [vmem:[%s6522_s0 + $0x50] ss:$8 sps:$4 sm:$0xff]   ;;  %v4521_v31 = vld [vmem:[%s6522_s0 + $0x64] ss:$8 sps:$4 sm:$0xff]  }
   0xc   :  { %342 = vmatprep.subr.bf16.mxu0 %v4485_v6  ;;  %v4523_v32 = vld [vmem:[%s6522_s0 + $0x60] ss:$8 sps:$4 sm:$0xff]   ;;  %v4524_v33 = vld [vmem:[%s6522_s0 + $0x74] ss:$8 sps:$4 sm:$0xff]   ;;  %v4526_v34 = vld [vmem:[%s6522_s0 + $0x70] ss:$8 sps:$4 sm:$0xff]  }
   0xd   :  { %v4527_v35 = vld [vmem:[%s6522_s0 + $0x84] ss:$8 sps:$4 sm:$0xff]   ;;  %v4529_v36 = vld [vmem:[%s6522_s0 + $0x80] ss:$8 sps:$4 sm:$0xff]   ;;  %v4530_v37 = vld [vmem:[%s6522_s0 + $0x94] ss:$8 sps:$4 sm:$0xff]  }
   0xe   :  { %v4532_v38 = vld [vmem:[%s6522_s0 + $0x90] ss:$8 sps:$4 sm:$0xff]   ;;  %v4533_v39 = vld [vmem:[%s6522_s0 + $0xa4] ss:$8 sps:$4 sm:$0xff]   ;;  %v4535_v40 = vld [vmem:[%s6522_s0 + $0xa0] ss:$8 sps:$4 sm:$0xff]  }
   0xf   :  { %343 = vmatpush1.bf16.msra.mxu0 %v4487_v7  ;;  %v4536_v41 = vld [vmem:[%s6522_s0 + $0xb4] ss:$8 sps:$4 sm:$0xff]   ;;  %v4538_v42 = vld [vmem:[%s6522_s0 + $0xb0] ss:$8 sps:$4 sm:$0xff]   ;;  %v4541_v43 = vld [vmem:[%s6523_s3 + $0x4] ss:$8 sps:$4 sm:$0xff]  }
  0x10   :  { %344 = vmatprep.subr.bf16.mxu0 %v4488_v8  ;;  %3985 = vmatprep.mubr.msk.bf16.mxu1 %vm627_vm2, %v4541_v43  ;;  %v88_v46 = vsub.s32 0, %v4972_v45  ;;  %v84_v47 = vld [vmem:[%s6524_s2] sm:$0x3]  ;;  %vm1566_vm3 = vcmask 1043456   ;;  %vm1073_vm4 = vcmask 916480   ;;  %vm1547_vm5 = vcmask 982016  }
  0x11   :  { %vm1424_vm6 = vsmask.f32 7424  ;;  %vm2118_vm7 = vsmask.f32 6400  ;;  %vm1874_vm8 = vcmask 1046528   ;;  %vm2675_vm9 = vcmask 752640  }
  0x12   :  { %v4980_v48 = vrot.slane %v84_v47, %v88_v46  ;;  %vm2855_vm10 = vcmask 261120   ;;  %vm4762_vm11 = vmmov 0   ;;  %vm3254_vm12 = vcmask 654336  }
  0x13   :  { %345 = vmatpush1.bf16.msra.mxu0 %v4490_v10  ;;  %vm3912_vm13 = vcmask 80896  }
  0x14   :  { %346 = vmatprep.subr.bf16.mxu0 %v4491_v11 }
  0x17   :  { %347 = vmatpush1.bf16.msra.mxu0 %v4493_v12 }
  0x18   :  { %348 = vmatprep.subr.bf16.mxu0 %v4494_v13 }
  0x1b   :  { %349 = vmatpush1.bf16.msra.mxu0 %v4496_v14 }
  0x1c   :  { %350 = vmatprep.subr.bf16.mxu0 %v4497_v15 }
  0x1f   :  { %351 = vmatpush1.bf16.msra.mxu0 %v4499_v16 }
  0x20   :  { %3960 = vmatprep.subr.msk.bf16.mxu0 %vm329_vm1, %v4500_v17 }
  0x23   :  { %367 = vmatpush2.bf16.msra.mxu0 %v331_v19 }
  0x26   :  { %369 = vmatmul.mubr.bf16.vlgmr.msra.gmra.mxu0 %v4503_v20 }
  0x27   :  { %3962 = vmatprep.mubr.msk.bf16.mxu0 %vm292_vm0, %v4506_v21 }
  0x2e   :  { %379 = vmatmul.mubr.bf16.gmra.mxu0 %v4508_v22 }
  0x2f   :  { %3963 = vmatprep.mubr.msk.bf16.mxu0 %vm292_vm0, %v4509_v23  ;;  %v92_v23 = vsub.s32 1, %v4972_v45 }
  0x36   :  { %389 = vmatmul.mubr.bf16.gmra.mxu0 %v4511_v24 }
  0x37   :  { %3964 = vmatprep.mubr.msk.bf16.mxu0 %vm292_vm0, %v4512_v25 }
  0x3e   :  { %399 = vmatmul.mubr.bf16.gmra.mxu0 %v4514_v26  ;;  %v5013_v26 = vrot.slane %v84_v47, %v92_v23 }
  0x3f   :  { %3965 = vmatprep.mubr.msk.bf16.mxu0 %vm292_vm0, %v4515_v27 }
  0x46   :  { %409 = vmatmul.mubr.bf16.gmra.mxu0 %v4517_v28 }
  0x47   :  { %3966 = vmatprep.mubr.msk.bf16.mxu0 %vm292_vm0, %v4518_v29 }
  0x4e   :  { %419 = vmatmul.mubr.bf16.gmra.mxu0 %v4520_v30 }
  0x4f   :  { %3967 = vmatprep.mubr.msk.bf16.mxu0 %vm292_vm0, %v4521_v31 }
  0x56   :  { %429 = vmatmul.mubr.bf16.gmra.mxu0 %v4523_v32 }
  0x57   :  { %3968 = vmatprep.mubr.msk.bf16.mxu0 %vm292_vm0, %v4524_v33 }
  0x5e   :  { %439 = vmatmul.mubr.bf16.gmra.mxu0 %v4526_v34 }
  0x5f   :  { %3969 = vmatprep.mubr.msk.bf16.mxu0 %vm292_vm0, %v4527_v35 }
  0x66   :  { %449 = vmatmul.mubr.bf16.gmra.mxu0 %v4529_v36 }
  0x67   :  { %3970 = vmatprep.mubr.msk.bf16.mxu0 %vm292_vm0, %v4530_v37 }
  0x6e   :  { %459 = vmatmul.mubr.bf16.gmra.mxu0 %v4532_v38 }
  0x6f   :  { %3971 = vmatprep.mubr.msk.bf16.mxu0 %vm292_vm0, %v4533_v39 }
  0x76   :  { %469 = vmatmul.mubr.bf16.gmra.mxu0 %v4535_v40 }
  0x77   :  { %3972 = vmatprep.mubr.msk.bf16.mxu0 %vm292_vm0, %v4536_v41 }
  0x7e   :  { %479 = vmatmul.mubr.bf16.gmra.mxu0 %v4538_v42 }
  0xe6   :  { %v370_v49 = vpop.f32.mrf.mxu0 }
  0xe7   :  { %v371_v51 = vadd.f32 %v370_v49, %v4980_v48 }
  0xe8   :  { %v4982_v50 = vpop.f32.mrf.mxu0 }
  0xe9   :  { %v489_v55 = vmax.f32 %v371_v51, 0.0 }
  0xea   :  { %v374_v52 = vpop.f32.mrf.mxu0 }
  0xeb   :  { %v375_v53 = vadd.f32 %v374_v52, %v4980_v48 }
  0xec   :  { %v4986_v54 = vpop.f32.mrf.mxu0 }
  0xed   :  { %v491_v56 = vmax.f32 %v375_v53, 0.0 }
  0xee   :  { %v380_v57 = vpop.f32.mrf.mxu0 }
  0xef   :  { %v4988_v58 = vpack.c.bf16 %v491_v56, %v489_v55  ;;  %v381_v60 = vadd.f32 %v380_v57, %v4980_v48 }
  0xf0   :  { %v4990_v59 = vpop.f32.mrf.mxu0 }
  0xf1   :  { %v493_v0 = vmax.f32 %v381_v60, 0.0 }
  0xf2   :  { %v384_v61 = vpop.f32.mrf.mxu0 }
  0xf3   :  { %v385_v62 = vadd.f32 %v384_v61, %v4980_v48 }
  0xf4   :  { %v4994_v63 = vpop.f32.mrf.mxu0 }
  0xf5   :  { %v495_v1 = vmax.f32 %v385_v62, 0.0 }
  0xf6   :  { %v4996_v2 = vpop.f32.mrf.mxu0 }
  0xf7   :  { %v4998_v3 = vpack.c.bf16 %v495_v1, %v493_v0 }
  0xf8   :  { %v5000_v4 = vpop.f32.mrf.mxu0 }
  0xfa   :  { %v5002_v5 = vpop.f32.mrf.mxu0 }
  0xfc   :  { %v5004_v6 = vpop.f32.mrf.mxu0 }
  0xfe   :  { %v5006_v7 = vpop.f32.mrf.mxu0 }
 0x100   :  { %v402_v8 = vpop.f32.mrf.mxu0 }
 0x102   :  { %v5008_v9 = vpop.f32.mrf.mxu0 }
 0x104   :  { %v406_v10 = vpop.f32.mrf.mxu0 }
 0x106   :  { %v410_v11 = vpop.f32.mrf.mxu0 }
 0x108   :  { %v412_v12 = vpop.f32.mrf.mxu0 }
 0x10a   :  { %v414_v13 = vpop.f32.mrf.mxu0 }
 0x10c   :  { %v416_v14 = vpop.f32.mrf.mxu0 }
 0x10d   :  { %v417_v57 = vadd.f32 %v416_v14, %v5013_v26 }
 0x10e   :  { %v420_v15 = vpop.f32.mrf.mxu0 }
 0x10f   :  { %v421_v62 = vadd.f32 %v420_v15, %v4980_v48  ;;  %v407_v15 = vadd.f32 %v406_v10, %v5013_v26  ;;  %v401_v10 = vadd.f32 %v5006_v7, %v4980_v48  ;;  %v393_v7 = vadd.f32 %v5000_v4, %v5013_v26 }
 0x110   :  { %v422_v16 = vpop.f32.mrf.mxu0  ;;  %v391_v4 = vadd.f32 %v4996_v2, %v4980_v48 }
 0x111   :  { %v423_v47 = vadd.f32 %v422_v16, %v5013_v26  ;;  %v413_v16 = vadd.f32 %v412_v12, %v5013_v26  ;;  %v509_v12 = vmax.f32 %v421_v62, 0.0  ;;  %v373_v62 = vadd.f32 %v4982_v50, %v5013_v26 }
 0x112   :  { %v424_v17 = vpop.f32.mrf.mxu0 }
 0x113   :  { %v425_v52 = vadd.f32 %v424_v17, %v4980_v48  ;;  %v510_v17 = vmax.f32 %v423_v47, 0.0  ;;  %v501_v47 = vmax.f32 %v401_v10, 0.0 }
 0x114   :  { %v426_v18 = vpop.f32.mrf.mxu0 }
 0x115   :  { %v427_v38 = vadd.f32 %v426_v18, %v5013_v26  ;;  %v415_v18 = vadd.f32 %v414_v13, %v4980_v48  ;;  %v511_v14 = vmax.f32 %v425_v52, 0.0  ;;  %v405_v13 = vadd.f32 %v5008_v9, %v4980_v48 }
 0x116   :  { %v430_v19 = vpop.f32.mrf.mxu0  ;;  %v377_v52 = vadd.f32 %v4986_v54, %v5013_v26 }
 0x117   :  { %v431_v42 = vadd.f32 %v430_v19, %v4980_v48  ;;  %v512_v60 = vmax.f32 %v427_v38, 0.0  ;;  %v503_v38 = vmax.f32 %v405_v13, 0.0 }
 0x118   :  { %v432_v20 = vpop.f32.mrf.mxu0 }
 0x119   :  { %v433_v33 = vadd.f32 %v432_v20, %v5013_v26  ;;  %v513_v0 = vmax.f32 %v431_v42, 0.0  ;;  %v5102_v2 = vpack.c.bf16 %v503_v38, %v501_v47 }
 0x11a   :  { %v434_v21 = vpop.f32.mrf.mxu0 }
 0x11b   :  { %v435_v35 = vadd.f32 %v434_v21, %v4980_v48  ;;  %v514_v49 = vmax.f32 %v433_v33, 0.0  ;;  %v403_v21 = vadd.f32 %v402_v8, %v5013_v26  ;;  %v397_v8 = vadd.f32 %v5004_v6, %v5013_v26  ;;  %v4575_v6 = vld [vmem:[%s6525_s4 + $0x38] sm:$0xff]  }
 0x11c   :  { %v436_v22 = vpop.f32.mrf.mxu0 }
 0x11d   :  { %v437_v28 = vadd.f32 %v436_v22, %v5013_v26  ;;  %v515_v53 = vmax.f32 %v435_v35, 0.0  ;;  %v508_v22 = vmax.f32 %v417_v57, 0.0  ;;  %v6534_v35 = vmov 0  }
 0x11e   :  { %v440_v24 = vpop.f32.mrf.mxu0  ;;  %1092 = vmatprep.subr.bf16.mxu0 %v6534_v35 }
 0x11f   :  { %v441_v31 = vadd.f32 %v440_v24, %v4980_v48  ;;  %v516_v39 = vmax.f32 %v437_v28, 0.0  ;;  %v5047_v19 = vpack.c.bf16 %v515_v53, %v513_v0  ;;  %v5053_v24 = vpack.c.bf16 %v512_v60, %v510_v17  ;;  %1093 = vmatpush1.bf16.msra.mxu0 %v4575_v6 }
 0x120   :  { %v442_v25 = vpop.f32.mrf.mxu0  ;;  %v506_v28 = vmax.f32 %v413_v16, 0.0  ;;  %1094 = vmatprep.subr.bf16.mxu0 %v6534_v35  ;;  %v498_v53 = vmax.f32 %v393_v7, 0.0  ;;  %v497_v16 = vmax.f32 %v391_v4, 0.0 }
 0x121   :  { %v443_v29 = vadd.f32 %v442_v25, %v5013_v26  ;;  %v517_v43 = vmax.f32 %v441_v31, 0.0  ;;  %v5038_v61 = vpack.c.bf16 %v516_v39, %v514_v49  ;;  %v411_v25 = vadd.f32 %v410_v11, %v4980_v48  ;;  %v4576_v39 = vld [vmem:[%s6525_s4 + $0x30] sm:$0xff]  }
 0x122   :  { %v444_v27 = vpop.f32.mrf.mxu0  ;;  %v502_v31 = vmax.f32 %v403_v21, 0.0  ;;  %v5070_v33 = vpack.c.bf16 %v508_v22, %v506_v28  ;;  %v490_v22 = vmax.f32 %v373_v62, 0.0 }
 0x123   :  { %v445_v30 = vadd.f32 %v444_v27, %v4980_v48  ;;  %v518_v40 = vmax.f32 %v443_v29, 0.0  ;;  %v507_v29 = vmax.f32 %v415_v18, 0.0  ;;  %1095 = vmatpush1.bf16.msra.mxu0 %v4576_v39 }
 0x124   :  { %v446_v32 = vpop.f32.mrf.mxu0  ;;  %1096 = vmatprep.subr.bf16.mxu0 %v6534_v35 }
 0x125   :  { %v447_v34 = vadd.f32 %v446_v32, %v5013_v26  ;;  %v519_v36 = vmax.f32 %v445_v30, 0.0  ;;  %v5066_v30 = vpack.c.bf16 %v511_v14, %v509_v12  ;;  %v504_v32 = vmax.f32 %v407_v15, 0.0 }
 0x126   :  { %v5022_v37 = vpop.f32.mrf.mxu0 }
 0x127   :  { %v520_v41 = vmax.f32 %v447_v34, 0.0  ;;  %v5034_v56 = vpack.c.bf16 %v519_v36, %v517_v43  ;;  %v505_v34 = vmax.f32 %v411_v25, 0.0  ;;  %v395_v36 = vadd.f32 %v5002_v5, %v4980_v48 }
 0x128   :  { %v5026_v44 = vpop.f32.mrf.mxu0  ;;  %v500_v43 = vmax.f32 %v397_v8, 0.0  ;;  %v5093_v5 = vpack.c.bf16 %v504_v32, %v502_v31 }
 0x129   :  { %v5029_v51 = vpack.c.bf16 %v520_v41, %v518_v40  ;;  %v387_v40 = vadd.f32 %v4994_v63, %v5013_v26  ;;  %v5089_v41 = vpack.c.bf16 %v507_v29, %v505_v34  ;;  %v383_v63 = vadd.f32 %v4990_v59, %v5013_v26 }
 0x12a   :  { %v5032_v55 = vpop.f32.mrf.mxu0  ;;  %v499_v57 = vmax.f32 %v395_v36, 0.0  ;;  %v5106_v17 = vpack.c.bf16 %v500_v43, %v498_v53  ;;  %v492_v59 = vmax.f32 %v377_v52, 0.0 }
 0x12b   :  { %646 = vmatprep.subr.bf16.mxu1 %v5029_v51  ;;  %v496_v0 = vmax.f32 %v387_v40, 0.0  ;;  %v494_v18 = vmax.f32 %v383_v63, 0.0 }
 0x12c   :  { %v5041_v1 = vpop.f32.mrf.mxu0  ;;  %647 = vmatpush1.bf16.msra.mxu1 %v5034_v56  ;;  %v5112_v21 = vpack.c.bf16 %v499_v57, %v497_v16  ;;  %v5121_v29 = vpack.c.bf16 %v492_v59, %v490_v22 }
 0x12d   :  { %648 = vmatprep.subr.bf16.mxu1 %v5038_v61  ;;  %v5116_v12 = vpack.c.bf16 %v496_v0, %v494_v18  ;;  %v457_v57 = vadd.f32 %v5041_v1, %v5013_v26  ;;  %v455_v1 = vadd.f32 %v5032_v55, %v4980_v48  ;;  %v451_v18 = vadd.f32 %v5022_v37, %v4980_v48  ;;  %v4539_v55 = vld [vmem:[%s6523_s3] ss:$8 sps:$4 sm:$0xff]   ;;  %v4544_v37 = vld [vmem:[%s6523_s3 + $0x10] ss:$8 sps:$4 sm:$0xff]  }
 0x12e   :  { %v5049_v20 = vpop.f32.mrf.mxu0 }
 0x130   :  { %v5056_v27 = vpop.f32.mrf.mxu0  ;;  %649 = vmatpush1.bf16.msra.mxu1 %v5047_v19 }
 0x131   :  { %650 = vmatprep.subr.bf16.mxu1 %v5053_v24 }
 0x132   :  { %v5068_v11 = vpop.f32.mrf.mxu0 }
 0x133   :  { %v465_v63 = vadd.f32 %v5068_v11, %v4980_v48 }
 0x134   :  { %v5072_v9 = vpop.f32.mrf.mxu0  ;;  %651 = vmatpush1.bf16.msra.mxu1 %v5066_v30 }
 0x135   :  { %652 = vmatprep.subr.bf16.mxu1 %v5070_v33  ;;  %v467_v40 = vadd.f32 %v5072_v9, %v5013_v26  ;;  %v527_v0 = vmax.f32 %v465_v63, 0.0  ;;  %v4592_v63 = vld [vmem:[%s6525_s4 + $0xe8] sm:$0xff]  }
 0x136   :  { %v470_v42 = vpop.f32.mrf.mxu0 }
 0x137   :  { %v471_v47 = vadd.f32 %v470_v42, %v4980_v48  ;;  %v528_v9 = vmax.f32 %v467_v40, 0.0  ;;  %v461_v42 = vadd.f32 %v5049_v20, %v4980_v48  ;;  %v4574_v40 = vld [vmem:[%s6523_s3 + $0xb0] ss:$8 sps:$4 sm:$0xff]  }
 0x138   :  { %v472_v49 = vpop.f32.mrf.mxu0  ;;  %653 = vmatpush1.bf16.msra.mxu1 %v5089_v41 }
 0x139   :  { %654 = vmatprep.subr.bf16.mxu1 %v5093_v5  ;;  %v473_v14 = vadd.f32 %v472_v49, %v5013_v26  ;;  %v463_v49 = vadd.f32 %v5056_v27, %v5013_v26  ;;  %v529_v62 = vmax.f32 %v471_v47, 0.0  ;;  %v453_v27 = vadd.f32 %v5026_v44, %v5013_v26  ;;  %v4589_v47 = vld [vmem:[%s6525_s4] sm:$0xff]  }
 0x13a   :  { %v474_v60 = vpop.f32.mrf.mxu0  ;;  %v525_v20 = vmax.f32 %v461_v42, 0.0  ;;  %v521_v44 = vmax.f32 %v451_v18, 0.0  ;;  %v4597_v42 = vld [vmem:[%s6525_s4 + $0x58] sm:$0xff]  }
 0x13b   :  { %v475_v50 = vadd.f32 %v474_v60, %v4980_v48  ;;  %v530_v28 = vmax.f32 %v473_v14, 0.0  ;;  %v526_v11 = vmax.f32 %v463_v49, 0.0  ;;  %v522_v14 = vmax.f32 %v453_v27, 0.0  ;;  %v4590_v49 = vld [vmem:[%s6525_s4 + $0x78] sm:$0xff]   ;;  %v4599_v27 = vld [vmem:[%s6525_s4 + $0x50] sm:$0xff]  }
 0x13c   :  { %v476_v54 = vpop.f32.mrf.mxu0  ;;  %655 = vmatpush1.bf16.msra.mxu1 %v5102_v2  ;;  %v555_v22 = vpack.c.bf16 %v527_v0, %v525_v20  ;;  %v4602_v0 = vld [vmem:[%s6525_s4 + $0xc0] sm:$0xff]   ;;  %v4107_v20 = vld [vmem:[%s6526_s5 + $0xe8] sm:$0xff] }
 0x13d   :  { %656 = vmatprep.subr.bf16.mxu1 %v5106_v17  ;;  %v477_v25 = vadd.f32 %v476_v54, %v5013_v26  ;;  %v531_v31 = vmax.f32 %v475_v50, 0.0  ;;  %v524_v54 = vmax.f32 %v457_v57, 0.0  ;;  %v556_v59 = vpack.c.bf16 %v528_v9, %v526_v11  ;;  %v4594_v57 = vld [vmem:[%s6525_s4 + $0xe0] sm:$0xff]   ;;  %v4600_v11 = vld [vmem:[%s6525_s4 + $0xc8] sm:$0xff]  }
 0x13e   :  { %v480_v15 = vpop.f32.mrf.mxu0  ;;  %v4595_v9 = vld [vmem:[%s6525_s4 + $0x60] sm:$0xff]  }
 0x13f   :  { %v481_v8 = vadd.f32 %v480_v15, %v4980_v48  ;;  %v532_v32 = vmax.f32 %v477_v25, 0.0  ;;  %v557_v16 = vpack.c.bf16 %v531_v31, %v529_v62  ;;  %v523_v15 = vmax.f32 %v455_v1, 0.0  ;;  %v4545_v25 = vld [vmem:[%s6523_s3 + $0x24] ss:$8 sps:$4 sm:$0xff]   ;;  %v4598_v62 = vld [vmem:[%s6525_s4 + $0xd0] sm:$0xff]  }
 0x140   :  { %v482_v13 = vpop.f32.mrf.mxu0  ;;  %657 = vmatpush1.bf16.msra.mxu1 %v5112_v21  ;;  %v4580_v31 = vld [vmem:[%s6525_s4 + $0x20] sm:$0xff]   ;;  %v4601_v1 = vld [vmem:[%s6525_s4 + $0x48] sm:$0xff]  }
 0x141   :  { %658 = vmatprep.subr.bf16.mxu1 %v5116_v12  ;;  %v483_v34 = vadd.f32 %v482_v13, %v5013_v26  ;;  %v533_v36 = vmax.f32 %v481_v8, 0.0  ;;  %v5143_v60 = vpack.c.bf16 %v532_v32, %v530_v28  ;;  %v553_v50 = vpack.c.bf16 %v523_v15, %v521_v44  ;;  %v4578_v13 = vld [vmem:[%s6525_s4 + $0x28] sm:$0xff]   ;;  %v4568_v8 = vld [vmem:[%s6523_s3 + $0x90] ss:$8 sps:$4 sm:$0xff]  }
 0x142   :  { %v484_v10 = vpop.f32.mrf.mxu0  ;;  %v4579_v28 = vld [vmem:[%s6525_s4 + $0xa8] sm:$0xff]   ;;  %1097 = vmatpush1.bf16.msra.mxu0 %v4578_v13  ;;  %v4582_v32 = vld [vmem:[%s6525_s4 + $0x98] sm:$0xff]  }
 0x143   :  { %v485_v6 = vadd.f32 %v484_v10, %v4980_v48  ;;  %v534_v4 = vmax.f32 %v483_v34, 0.0  ;;  %v4542_v48 = vld [vmem:[%s6523_s3 + $0x14] ss:$8 sps:$4 sm:$0xff]   ;;  %v4569_v10 = vld [vmem:[%s6523_s3 + $0xa4] ss:$8 sps:$4 sm:$0xff]   ;;  %1098 = vmatprep.subr.bf16.mxu0 %v6534_v35 }
 0x144   :  { %v486_v7 = vpop.f32.mrf.mxu0  ;;  %659 = vmatpush1.bf16.msra.mxu1 %v4998_v3  ;;  %v4571_v34 = vld [vmem:[%s6523_s3 + $0xa0] ss:$8 sps:$4 sm:$0xff]  }
 0x145   :  { %v535_v38 = vmax.f32 %v485_v6, 0.0  ;;  %v487_v39 = vadd.f32 %v486_v7, %v5013_v26  ;;  %660 = vmatprep.subr.bf16.mxu1 %v5121_v29  ;;  %v554_v26 = vpack.c.bf16 %v524_v54, %v522_v14  ;;  %v4572_v6 = vld [vmem:[%s6523_s3 + $0xb4] ss:$8 sps:$4 sm:$0xff]   ;;  %v4123_v14 = vcombine.high %v4107_v20, %v4107_v20 }
 0x146   :  { %1099 = vmatpush1.bf16.msra.mxu0 %v4580_v31  ;;  %v4583_v7 = vld [vmem:[%s6525_s4 + $0x18] sm:$0xff]  }
 0x147   :  { %v536_v43 = vmax.f32 %v487_v39, 0.0  ;;  %v5138_v53 = vpack.c.bf16 %v535_v38, %v533_v36  ;;  %1100 = vmatprep.subr.bf16.mxu0 %v6534_v35  ;;  %v4584_v36 = vld [vmem:[%s6525_s4 + $0x90] sm:$0xff]   ;;  %v4586_v39 = vld [vmem:[%s6525_s4 + $0x88] sm:$0xff]   ;;  %v4604_v54 = vld [vmem:[%s6525_s4 + $0xb8] sm:$0xff]  }
 0x148   :  { %661 = vmatpush1.bf16.msra.mxu1 %v4988_v58  ;;  %v4585_v38 = vld [vmem:[%s6525_s4 + $0x10] sm:$0xff]  }
 0x149   :  { %v5134_v52 = vpack.c.bf16 %v536_v43, %v534_v4  ;;  %v4587_v4 = vld [vmem:[%s6525_s4 + $0x8] sm:$0xff]   ;;  %v4588_v43 = vld [vmem:[%s6525_s4 + $0x80] sm:$0xff]  }
 0x14a   :  { %1101 = vmatpush1.bf16.msra.mxu0 %v4583_v7 }
 0x14b   :  { %670 = vmatprep.subr.bf16.mxu1 %v5134_v52  ;;  %1102 = vmatprep.subr.bf16.mxu0 %v6534_v35 }
 0x14c   :  { %671 = vmatpush2.bf16.msra.mxu1 %v5138_v53 }
 0x14d   :  { %672 = vmatprep.subr.bf16.mxu1 %v5143_v60 }
 0x14e   :  { %1103 = vmatpush1.bf16.msra.mxu0 %v4585_v38 }
 0x14f   :  { %1104 = vmatprep.subr.bf16.mxu0 %v6534_v35 }
 0x150   :  { %673 = vmatpush2.bf16.msra.mxu1 %v557_v16 }
 0x151   :  { %674 = vmatprep.subr.bf16.mxu1 %v556_v59 }
 0x152   :  { %1105 = vmatpush1.bf16.msra.mxu0 %v4587_v4 }
 0x153   :  { %1106 = vmatprep.subr.bf16.mxu0 %v6534_v35 }
 0x154   :  { %675 = vmatpush2.bf16.msra.mxu1 %v555_v22 }
 0x155   :  { %676 = vmatprep.subr.bf16.mxu1 %v554_v26 }
 0x156   :  { %1107 = vmatpush1.bf16.msra.mxu0 %v4589_v47 }
 0x157   :  { %1110 = vmatprep.subr.bf16.mxu0 %v6534_v35 }
 0x158   :  { %677 = vmatpush2.bf16.msra.mxu1 %v553_v50 }
 0x159   :  { %824 = vmatprep.subr.bf16.mxu1 %v5029_v51  ;;  %v4547_v51 = vld [vmem:[%s6523_s3 + $0x20] ss:$8 sps:$4 sm:$0xff]  }
 0x15b   :  { %679 = vmatmul.mubr.bf16.vlgmr.msra.gmra.mxu1 %v4539_v55 }
 0x15c   :  { %825 = vmatpush1.bf16.msra.mxu1 %v5034_v56  ;;  %3986 = vmatprep.mubr.msk.bf16.mxu1 %vm627_vm2, %v4542_v48  ;;  %v4548_v56 = vld [vmem:[%s6523_s3 + $0x34] ss:$8 sps:$4 sm:$0xff]  }
 0x15d   :  { %826 = vmatprep.subr.bf16.mxu1 %v5038_v61  ;;  %v4550_v61 = vld [vmem:[%s6523_s3 + $0x30] ss:$8 sps:$4 sm:$0xff]  }
 0x160   :  { %827 = vmatpush1.bf16.msra.mxu1 %v5047_v19  ;;  %v4551_v19 = vld [vmem:[%s6523_s3 + $0x44] ss:$8 sps:$4 sm:$0xff]  }
 0x161   :  { %828 = vmatprep.subr.bf16.mxu1 %v5053_v24  ;;  %v4553_v24 = vld [vmem:[%s6523_s3 + $0x40] ss:$8 sps:$4 sm:$0xff]  }
 0x163   :  { %689 = vmatmul.mubr.bf16.gmra.mxu1 %v4544_v37 }
 0x164   :  { %829 = vmatpush1.bf16.msra.mxu1 %v5066_v30  ;;  %3987 = vmatprep.mubr.msk.bf16.mxu1 %vm627_vm2, %v4545_v25  ;;  %v4554_v30 = vld [vmem:[%s6523_s3 + $0x54] ss:$8 sps:$4 sm:$0xff]  }
 0x165   :  { %830 = vmatprep.subr.bf16.mxu1 %v5070_v33  ;;  %v4557_v33 = vld [vmem:[%s6523_s3 + $0x60] ss:$8 sps:$4 sm:$0xff]  }
 0x168   :  { %831 = vmatpush1.bf16.msra.mxu1 %v5089_v41  ;;  %v4560_v41 = vld [vmem:[%s6523_s3 + $0x74] ss:$8 sps:$4 sm:$0xff]  }
 0x169   :  { %832 = vmatprep.subr.bf16.mxu1 %v5093_v5  ;;  %v4562_v5 = vld [vmem:[%s6523_s3 + $0x70] ss:$8 sps:$4 sm:$0xff]  }
 0x16b   :  { %699 = vmatmul.mubr.bf16.gmra.mxu1 %v4547_v51 }
 0x16c   :  { %833 = vmatpush1.bf16.msra.mxu1 %v5102_v2  ;;  %3988 = vmatprep.mubr.msk.bf16.mxu1 %vm627_vm2, %v4548_v56  ;;  %v4563_v2 = vld [vmem:[%s6523_s3 + $0x84] ss:$8 sps:$4 sm:$0xff]  }
 0x16d   :  { %834 = vmatprep.subr.bf16.mxu1 %v5106_v17  ;;  %v4565_v17 = vld [vmem:[%s6523_s3 + $0x80] ss:$8 sps:$4 sm:$0xff]  }
 0x170   :  { %835 = vmatpush1.bf16.msra.mxu1 %v5112_v21  ;;  %v4566_v21 = vld [vmem:[%s6523_s3 + $0x94] ss:$8 sps:$4 sm:$0xff]  }
 0x171   :  { %836 = vmatprep.subr.bf16.mxu1 %v5116_v12  ;;  %v4577_v12 = vld [vmem:[%s6525_s4 + $0xb0] sm:$0xff]  }
 0x173   :  { %709 = vmatmul.mubr.bf16.gmra.mxu1 %v4550_v61 }
 0x174   :  { %837 = vmatpush1.bf16.msra.mxu1 %v4998_v3  ;;  %3989 = vmatprep.mubr.msk.bf16.mxu1 %vm627_vm2, %v4551_v19  ;;  %v4556_v3 = vld [vmem:[%s6523_s3 + $0x50] ss:$8 sps:$4 sm:$0xff]  }
 0x175   :  { %838 = vmatprep.subr.bf16.mxu1 %v5121_v29  ;;  %v4581_v29 = vld [vmem:[%s6525_s4 + $0xa0] sm:$0xff]  }
 0x178   :  { %839 = vmatpush1.bf16.msra.mxu1 %v4988_v58  ;;  %v4559_v58 = vld [vmem:[%s6523_s3 + $0x64] ss:$8 sps:$4 sm:$0xff]  }
 0x179   :  { %848 = vmatprep.subr.bf16.mxu1 %v5134_v52  ;;  %v4591_v52 = vld [vmem:[%s6525_s4 + $0x70] sm:$0xff]  }
 0x17a   :  { %1111 = vmatpush2.bf16.msra.mxu0 %v4591_v52 }
 0x17b   :  { %719 = vmatmul.mubr.bf16.gmra.mxu1 %v4553_v24  ;;  %1112 = vmatprep.subr.bf16.mxu0 %v6534_v35 }
 0x17c   :  { %849 = vmatpush2.bf16.msra.mxu1 %v5138_v53  ;;  %3990 = vmatprep.mubr.msk.bf16.mxu1 %vm627_vm2, %v4554_v30  ;;  %v4593_v53 = vld [vmem:[%s6525_s4 + $0x68] sm:$0xff]  }
 0x17d   :  { %850 = vmatprep.subr.bf16.mxu1 %v5143_v60  ;;  %v4596_v60 = vld [vmem:[%s6525_s4 + $0xd8] sm:$0xff]  }
 0x17e   :  { %1113 = vmatpush2.bf16.msra.mxu0 %v4593_v53  ;;  %v4621_v53 = vld [vmem:[%s6526_s5 + $0xd8] ss:$8 sps:$4 sm:$0xff]  }
 0x17f   :  { %1114 = vmatprep.subr.bf16.mxu0 %v6534_v35 }
 0x180   :  { %851 = vmatpush2.bf16.msra.mxu1 %v557_v16  ;;  %v4603_v16 = vld [vmem:[%s6525_s4 + $0x40] sm:$0xff]  }
 0x181   :  { %852 = vmatprep.subr.bf16.mxu1 %v556_v59  ;;  %v1407_v59 = vld [vmem:[%s6526_s5 + $0x70] sm:$0xff] }
 0x182   :  { %1115 = vmatpush2.bf16.msra.mxu0 %v4595_v9  ;;  %v4146_v18 = vcombine.high %v1407_v59, %v1407_v59  ;;  %v4145_v31 = vcombine.low %v1407_v59, %v1407_v59 }
 0x183   :  { %729 = vmatmul.mubr.bf16.gmra.mxu1 %v4556_v3  ;;  %1116 = vmatprep.subr.bf16.mxu0 %v6534_v35 }
 0x184   :  { %853 = vmatpush2.bf16.msra.mxu1 %v555_v22  ;;  %4015 = vmatprep.mubr.msk.bf16.mxu1 %vm627_vm2, %v4559_v58  ;;  %v1754_v4 = vsel %vm1566_vm3, %v4145_v31, 0 }
 0x185   :  { %854 = vmatprep.subr.bf16.mxu1 %v554_v26 }
 0x186   :  { %1117 = vmatpush2.bf16.msra.mxu0 %v4597_v42  ;;  %v4629_v42 = vld [vmem:[%s6526_s5 + $0xcc] ss:$8 sps:$4 sm:$0xff]  }
 0x187   :  { %1118 = vmatprep.subr.bf16.mxu0 %v6534_v35 }
 0x188   :  { %855 = vmatpush2.bf16.msra.mxu1 %v553_v50 }
 0x189   :  { %1294 = vmatprep.subr.bf16.mxu1 %v6534_v35 }
 0x18a   :  { %1119 = vmatpush2.bf16.msra.mxu0 %v4599_v27 }
 0x18b   :  { %857 = vmatmul.mubr.bf16.vlgmr.msra.gmra.mxu1 %v4557_v33  ;;  %1120 = vmatprep.subr.bf16.mxu0 %v6534_v35 }
 0x18c   :  { %4016 = vmatprep.mubr.msk.bf16.mxu1 %vm627_vm2, %v4560_v41  ;;  %1295 = vmatpush1.bf16.msra.mxu1 %v4577_v12 }
 0x18d   :  { %1296 = vmatprep.subr.bf16.mxu1 %v6534_v35 }
 0x18e   :  { %1121 = vmatpush2.bf16.msra.mxu0 %v4601_v1 }
 0x18f   :  { %1122 = vmatprep.subr.bf16.mxu0 %v6534_v35 }
 0x190   :  { %1297 = vmatpush1.bf16.msra.mxu1 %v4579_v28 }
 0x191   :  { %1298 = vmatprep.subr.bf16.mxu1 %v6534_v35 }
 0x192   :  { %1123 = vmatpush2.bf16.msra.mxu0 %v4603_v16  ;;  %v4610_v16 = vld [vmem:[%s6526_s5 + $0x50] ss:$8 sps:$4 sm:$0xff]  }
 0x193   :  { %867 = vmatmul.mubr.bf16.gmra.mxu1 %v4562_v5  ;;  %4124 = vmatprep.subr.msk.bf16.mxu0 %vm1566_vm3, %v4123_v14 }
 0x194   :  { %4017 = vmatprep.mubr.msk.bf16.mxu1 %vm627_vm2, %v4563_v2  ;;  %1299 = vmatpush1.bf16.msra.mxu1 %v4581_v29 }
 0x195   :  { %1300 = vmatprep.subr.bf16.mxu1 %v6534_v35 }
 0x198   :  { %1301 = vmatpush1.bf16.msra.mxu1 %v4582_v32  ;;  %v4122_v32 = vcombine.low %v4107_v20, %v4107_v20  ;;  %v4615_v20 = vld [vmem:[%s6526_s5 + $0x44] ss:$8 sps:$4 sm:$0xff]  }
 0x199   :  { %1302 = vmatprep.subr.bf16.mxu1 %v6534_v35 }
 0x19a   :  { %v1568_v47 = vsel %vm1566_vm3, %v4122_v32, 0 }
 0x19b   :  { %877 = vmatmul.mubr.bf16.gmra.mxu1 %v4565_v17 }
 0x19c   :  { %4018 = vmatprep.mubr.msk.bf16.mxu1 %vm627_vm2, %v4566_v21  ;;  %1303 = vmatpush1.bf16.msra.mxu1 %v4584_v36 }
 0x19d   :  { %1304 = vmatprep.subr.bf16.mxu1 %v6534_v35 }
 0x1a0   :  { %1305 = vmatpush1.bf16.msra.mxu1 %v4586_v39 }
 0x1a1   :  { %1306 = vmatprep.subr.bf16.mxu1 %v6534_v35 }
 0x1a3   :  { %887 = vmatmul.mubr.bf16.gmra.mxu1 %v4568_v8 }
 0x1a4   :  { %4019 = vmatprep.mubr.msk.bf16.mxu1 %vm627_vm2, %v4569_v10  ;;  %1307 = vmatpush1.bf16.msra.mxu1 %v4588_v43  ;;  %v4609_v43 = vld [vmem:[%s6526_s5 + $0x64] ss:$8 sps:$4 sm:$0xff]  }
 0x1a5   :  { %1308 = vmatprep.subr.bf16.mxu1 %v6534_v35 }
 0x1a8   :  { %1309 = vmatpush1.bf16.msra.mxu1 %v4590_v49  ;;  %v4623_v49 = vld [vmem:[%s6526_s5 + $0xdc] ss:$8 sps:$4 sm:$0xff]  }
 0x1a9   :  { %1312 = vmatprep.subr.bf16.mxu1 %v6534_v35 }
 0x1ab   :  { %897 = vmatmul.mubr.bf16.gmra.mxu1 %v4571_v34 }
 0x1ac   :  { %4020 = vmatprep.mubr.msk.bf16.mxu1 %vm627_vm2, %v4572_v6  ;;  %1313 = vmatpush2.bf16.msra.mxu1 %v4592_v63  ;;  %v4607_v63 = vld [vmem:[%s6526_s5 + $0x60] ss:$8 sps:$4 sm:$0xff]  }
 0x1ad   :  { %1314 = vmatprep.subr.bf16.mxu1 %v6534_v35 }
 0x1b0   :  { %1315 = vmatpush2.bf16.msra.mxu1 %v4594_v57 }
 0x1b1   :  { %1316 = vmatprep.subr.bf16.mxu1 %v6534_v35 }
 0x1b3   :  { %907 = vmatmul.mubr.bf16.gmra.mxu1 %v4574_v40 }
 0x1b4   :  { %1317 = vmatpush2.bf16.msra.mxu1 %v4596_v60  ;;  %v4612_v60 = vld [vmem:[%s6526_s5 + $0x54] ss:$8 sps:$4 sm:$0xff]  }
 0x1b5   :  { %1318 = vmatprep.subr.bf16.mxu1 %v6534_v35 }
 0x1b8   :  { %1319 = vmatpush2.bf16.msra.mxu1 %v4598_v62 }
 0x1b9   :  { %1320 = vmatprep.subr.bf16.mxu1 %v6534_v35 }
 0x1bc   :  { %1321 = vmatpush2.bf16.msra.mxu1 %v4600_v11 }
 0x1bd   :  { %1322 = vmatprep.subr.bf16.mxu1 %v6534_v35 }
 0x1c0   :  { %1323 = vmatpush2.bf16.msra.mxu1 %v4602_v0 }
 0x1c1   :  { %1324 = vmatprep.subr.bf16.mxu1 %v6534_v35 }
 0x1c4   :  { %1325 = vmatpush2.bf16.msra.mxu1 %v4604_v54  ;;  %v4627_v54 = vld [vmem:[%s6526_s5 + $0xc8] ss:$8 sps:$4 sm:$0xff]  }
 0x1c5   :  { %4147 = vmatprep.subr.msk.bf16.mxu1 %vm1566_vm3, %v4146_v18 }
 0x21b   :  { %v680_v15 = vpop.f32.mrf.mxu1 }
 0x21d   :  { %v682_v22 = vpop.f32.mrf.mxu1 }
 0x21f   :  { %v684_v26 = vpop.f32.mrf.mxu1 }
 0x221   :  { %v686_v44 = vpop.f32.mrf.mxu1 }
 0x223   :  { %v5373_v50 = vpop.f32.mrf.mxu1 }
 0x225   :  { %v692_v55 = vpop.f32.mrf.mxu1 }
 0x227   :  { %v694_v48 = vpop.f32.mrf.mxu1 }
 0x229   :  { %v696_v37 = vpop.f32.mrf.mxu1 }
 0x22b   :  { %v5375_v25 = vpop.f32.mrf.mxu1 }
 0x22d   :  { %v5377_v51 = vpop.f32.mrf.mxu1 }
 0x22f   :  { %v5379_v56 = vpop.f32.mrf.mxu1 }
 0x231   :  { %v5381_v61 = vpop.f32.mrf.mxu1 }
 0x233   :  { %v5383_v19 = vpop.f32.mrf.mxu1 }
 0x235   :  { %v5385_v24 = vpop.f32.mrf.mxu1 }
 0x237   :  { %v5387_v30 = vpop.f32.mrf.mxu1 }
 0x239   :  { %v5389_v3 = vpop.f32.mrf.mxu1 }
 0x23b   :  { %v5391_v58 = vpop.f32.mrf.mxu1 }
 0x23d   :  { %v5393_v33 = vpop.f32.mrf.mxu1 }
 0x23f   :  { %v5395_v41 = vpop.f32.mrf.mxu1 }
 0x241   :  { %v5397_v5 = vpop.f32.mrf.mxu1 }
 0x243   :  { %v5399_v2 = vpop.f32.mrf.mxu1 }
 0x245   :  { %v5401_v17 = vpop.f32.mrf.mxu1 }
 0x247   :  { %v5403_v21 = vpop.f32.mrf.mxu1 }
 0x249   :  { %v5405_v12 = vpop.f32.mrf.mxu1 }
 0x24b   :  { %v858_v13 = vpop.f32.mrf.mxu1 }
 0x24c   :  { %v917_v7 = vmax.f32 %v680_v15, %v858_v13  ;;  %v4613_v15 = vld [vmem:[%s6526_s5 + $0x40] ss:$8 sps:$4 sm:$0xff]  }
 0x24d   :  { %v860_v28 = vpop.f32.mrf.mxu1 }
 0x24e   :  { %v918_v34 = vmax.f32 %v682_v22, %v860_v28  ;;  %v4618_v28 = vld [vmem:[%s6526_s5 + $0x30] ss:$8 sps:$4 sm:$0xff]  }
 0x24f   :  { %v862_v8 = vpop.f32.mrf.mxu1 }
 0x250   :  { %v919_v10 = vmax.f32 %v684_v26, %v862_v8 }
 0x251   :  { %v864_v29 = vpop.f32.mrf.mxu1 }
 0x252   :  { %v920_v6 = vmax.f32 %v686_v44, %v864_v29  ;;  %v941_v39 = vpack.c.bf16 %v919_v10, %v917_v7  ;;  %v4620_v44 = vld [vmem:[%s6526_s5 + $0x34] ss:$8 sps:$4 sm:$0xff]   ;;  %v4626_v10 = vld [vmem:[%s6526_s5 + $0x24] ss:$8 sps:$4 sm:$0xff]  }
 0x253   :  { %v868_v36 = vpop.f32.mrf.mxu1 }
 0x254   :  { %v942_v38 = vpack.c.bf16 %v920_v6, %v918_v34  ;;  %v921_v11 = vmax.f32 %v5373_v50, %v868_v36 }
 0x255   :  { %v870_v40 = vpop.f32.mrf.mxu1 }
 0x256   :  { %4036 = vmatprep.mubr.msk.bf16.mxu0 %vm1073_vm4, %v942_v38  ;;  %4087 = vmatprep.mubr.msk.bf16.mxu1 %vm1073_vm4, %v942_v38  ;;  %v922_v62 = vmax.f32 %v692_v55, %v870_v40 }
 0x257   :  { %v872_v52 = vpop.f32.mrf.mxu1  ;;  %1125 = vmatmul.mubr.bf16.vlgmr.msra.gmra.mxu0 %v941_v39  ;;  %1327 = vmatmul.mubr.bf16.vlgmr.msra.gmra.mxu1 %v941_v39 }
 0x258   :  { %1760 = vmatpush1.bf16.msra.mxu1 %v1754_v4  ;;  %1574 = vmatpush1.bf16.msra.mxu0 %v1568_v47  ;;  %v923_v57 = vmax.f32 %v694_v48, %v872_v52 }
 0x259   :  { %v874_v9 = vpop.f32.mrf.mxu1  ;;  %1761 = vmatprep.subr.bf16.mxu1 %v4609_v43  ;;  %1575 = vmatprep.subr.bf16.mxu0 %v4623_v49 }
 0x25a   :  { %v924_v27 = vmax.f32 %v696_v37, %v874_v9  ;;  %v943_v59 = vpack.c.bf16 %v923_v57, %v921_v11  ;;  %v4638_v9 = vld [vmem:[%s6526_s5 + $0x4] ss:$8 sps:$4 sm:$0xff]   ;;  %v4642_v11 = vld [vmem:[%s6526_s5 + $0x98] ss:$8 sps:$4 sm:$0xff]  }
 0x25b   :  { %v878_v1 = vpop.f32.mrf.mxu1 }
 0x25c   :  { %v944_v0 = vpack.c.bf16 %v924_v27, %v922_v62  ;;  %1762 = vmatpush1.bf16.msra.mxu1 %v4607_v63  ;;  %1576 = vmatpush1.bf16.msra.mxu0 %v4621_v53  ;;  %v925_v48 = vmax.f32 %v5375_v25, %v878_v1  ;;  %v4624_v25 = vld [vmem:[%s6526_s5 + $0x20] ss:$8 sps:$4 sm:$0xff]   ;;  %v4644_v27 = vld [vmem:[%s6526_s5 + $0x9c] ss:$8 sps:$4 sm:$0xff]   ;;  %v4647_v1 = vld [vmem:[%s6526_s5 + $0x8c] ss:$8 sps:$4 sm:$0xff]  }
 0x25d   :  { %v880_v18 = vpop.f32.mrf.mxu1  ;;  %1763 = vmatprep.subr.bf16.mxu1 %v4612_v60  ;;  %1577 = vmatprep.subr.bf16.mxu0 %v4629_v42  ;;  %v4636_v60 = vld [vmem:[%s6526_s5] ss:$8 sps:$4 sm:$0xff]   ;;  %v4641_v42 = vld [vmem:[%s6526_s5 + $0xac] ss:$8 sps:$4 sm:$0xff]  }
 0x25e   :  { %4037 = vmatprep.mubr.msk.bf16.mxu0 %vm1073_vm4, %v944_v0  ;;  %4088 = vmatprep.mubr.msk.bf16.mxu1 %vm1073_vm4, %v944_v0  ;;  %v926_v50 = vmax.f32 %v5377_v51, %v880_v18  ;;  %v4639_v62 = vld [vmem:[%s6526_s5 + $0xa8] ss:$8 sps:$4 sm:$0xff]  }
 0x25f   :  { %v882_v14 = vpop.f32.mrf.mxu1  ;;  %1133 = vmatmul.mubr.bf16.gmra.mxu0 %v943_v59  ;;  %1335 = vmatmul.mubr.bf16.gmra.mxu1 %v943_v59  ;;  %v4645_v0 = vld [vmem:[%s6526_s5 + $0x88] ss:$8 sps:$4 sm:$0xff]   ;;  %v4206_v59 = vld [vmem:[%s6526_s5 + $0x1d8] sm:$0xff] }
 0x260   :  { %1764 = vmatpush1.bf16.msra.mxu1 %v4610_v16  ;;  %1578 = vmatpush1.bf16.msra.mxu0 %v4627_v54  ;;  %v927_v22 = vmax.f32 %v5379_v56, %v882_v14  ;;  %v4650_v16 = vld [vmem:[%s6526_s5 + $0x7c] ss:$8 sps:$4 sm:$0xff]   ;;  %v4648_v54 = vld [vmem:[%s6526_s5 + $0x78] ss:$8 sps:$4 sm:$0xff]   ;;  %v4222_v18 = vcombine.high %v4206_v59, %v4206_v59 }
 0x261   :  { %v884_v26 = vpop.f32.mrf.mxu1  ;;  %1765 = vmatprep.subr.bf16.mxu1 %v4615_v20  ;;  %v4168_v20 = vld [vmem:[%s6526_s5 + $0x160] sm:$0xff] }
 0x262   :  { %v928_v55 = vmax.f32 %v5381_v61, %v884_v26  ;;  %v945_v56 = vpack.c.bf16 %v927_v22, %v925_v48  ;;  %v4184_v14 = vcombine.high %v4168_v20, %v4168_v20 }
 0x263   :  { %v888_v37 = vpop.f32.mrf.mxu1 }
 0x264   :  { %v946_v13 = vpack.c.bf16 %v928_v55, %v926_v50  ;;  %1766 = vmatpush1.bf16.msra.mxu1 %v4613_v15  ;;  %v929_v34 = vmax.f32 %v5383_v19, %v888_v37  ;;  %v4221_v50 = vcombine.low %v4206_v59, %v4206_v59  ;;  %v4667_v59 = vld [vmem:[%s6526_s5 + $0x150] ss:$8 sps:$4 sm:$0xff]  }
 0x265   :  { %v890_v8 = vpop.f32.mrf.mxu1  ;;  %1767 = vmatprep.subr.bf16.mxu1 %v4620_v44 }
 0x266   :  { %4038 = vmatprep.mubr.msk.bf16.mxu0 %vm1073_vm4, %v946_v13  ;;  %4089 = vmatprep.mubr.msk.bf16.mxu1 %vm1073_vm4, %v946_v13  ;;  %v930_v31 = vmax.f32 %v5385_v24, %v890_v8 }
 0x267   :  { %v892_v51 = vpop.f32.mrf.mxu1  ;;  %1141 = vmatmul.mubr.bf16.gmra.mxu0 %v945_v56  ;;  %1343 = vmatmul.mubr.bf16.gmra.mxu1 %v945_v56 }
 0x268   :  { %1768 = vmatpush1.bf16.msra.mxu1 %v4618_v28  ;;  %v931_v61 = vmax.f32 %v5387_v30, %v892_v51  ;;  %v4655_v51 = vld [vmem:[%s6526_s5 + $0x1cc] ss:$8 sps:$4 sm:$0xff]  }
 0x269   :  { %v894_v29 = vpop.f32.mrf.mxu1  ;;  %1769 = vmatprep.subr.bf16.mxu1 %v4626_v10  ;;  %v2236_v10 = vsel %vm1566_vm3, %v4221_v50, 0 }
 0x26a   :  { %v932_v32 = vmax.f32 %v5389_v3, %v894_v29  ;;  %v947_v36 = vpack.c.bf16 %v931_v61, %v929_v34 }
 0x26b   :  { %v898_v6 = vpop.f32.mrf.mxu1 }
 0x26c   :  { %v948_v7 = vpack.c.bf16 %v932_v32, %v930_v31  ;;  %1770 = vmatpush1.bf16.msra.mxu1 %v4624_v25  ;;  %v933_v19 = vmax.f32 %v5391_v58, %v898_v6  ;;  %v4653_v32 = vld [vmem:[%s6526_s5 + $0x1c8] ss:$8 sps:$4 sm:$0xff]   ;;  %v4658_v6 = vld [vmem:[%s6526_s5 + $0x1bc] ss:$8 sps:$4 sm:$0xff]  }
 0x26d   :  { %v900_v38 = vpop.f32.mrf.mxu1 }
 0x26e   :  { %4039 = vmatprep.mubr.msk.bf16.mxu0 %vm1073_vm4, %v948_v7  ;;  %4090 = vmatprep.mubr.msk.bf16.mxu1 %vm1073_vm4, %v948_v7  ;;  %v934_v24 = vmax.f32 %v5393_v33, %v900_v38 }
 0x26f   :  { %v902_v39 = vpop.f32.mrf.mxu1  ;;  %1149 = vmatmul.mubr.bf16.gmra.mxu0 %v947_v36  ;;  %1351 = vmatmul.mubr.bf16.gmra.mxu1 %v947_v36 }
 0x270   :  { %v935_v30 = vmax.f32 %v5395_v41, %v902_v39 }
 0x271   :  { %v904_v40 = vpop.f32.mrf.mxu1 }
 0x272   :  { %v936_v3 = vmax.f32 %v5397_v5, %v904_v40  ;;  %v949_v47 = vpack.c.bf16 %v935_v30, %v933_v19 }
 0x273   :  { %v908_v4 = vpop.f32.mrf.mxu1 }
 0x274   :  { %v950_v43 = vpack.c.bf16 %v936_v3, %v934_v24  ;;  %v937_v58 = vmax.f32 %v5399_v2, %v908_v4  ;;  %v4630_v2 = vld [vmem:[%s6526_s5 + $0x10] ss:$8 sps:$4 sm:$0xff]   ;;  %v4661_v4 = vld [vmem:[%s6526_s5 + $0x1ac] ss:$8 sps:$4 sm:$0xff]  }
 0x275   :  { %v910_v49 = vpop.f32.mrf.mxu1  ;;  %v4656_v24 = vld [vmem:[%s6526_s5 + $0x1b8] ss:$8 sps:$4 sm:$0xff]  }
 0x276   :  { %4040 = vmatprep.mubr.msk.bf16.mxu0 %vm1073_vm4, %v950_v43  ;;  %4091 = vmatprep.mubr.msk.bf16.mxu1 %vm1073_vm4, %v950_v43  ;;  %v938_v33 = vmax.f32 %v5401_v17, %v910_v49  ;;  %v4632_v17 = vld [vmem:[%s6526_s5 + $0x14] ss:$8 sps:$4 sm:$0xff]   ;;  %v4183_v49 = vcombine.low %v4168_v20, %v4168_v20 }
 0x277   :  { %v912_v52 = vpop.f32.mrf.mxu1  ;;  %1157 = vmatmul.mubr.bf16.gmra.mxu0 %v949_v47  ;;  %1359 = vmatmul.mubr.bf16.gmra.mxu1 %v949_v47 }
 0x278   :  { %v939_v41 = vmax.f32 %v5403_v21, %v912_v52  ;;  %v4635_v21 = vld [vmem:[%s6526_s5 + $0xbc] ss:$8 sps:$4 sm:$0xff]   ;;  %1771 = vmatprep.subr.bf16.mxu1 %v4632_v17 }
 0x279   :  { %v914_v63 = vpop.f32.mrf.mxu1  ;;  %1579 = vmatprep.subr.bf16.mxu0 %v4635_v21  ;;  %1772 = vmatpush1.bf16.msra.mxu1 %v4630_v2 }
 0x27a   :  { %v940_v5 = vmax.f32 %v5405_v12, %v914_v63  ;;  %v951_v57 = vpack.c.bf16 %v939_v41, %v937_v58  ;;  %v4633_v12 = vld [vmem:[%s6526_s5 + $0xb8] ss:$8 sps:$4 sm:$0xff]   ;;  %1773 = vmatprep.subr.bf16.mxu1 %v4638_v9  ;;  %v1980_v9 = vsel %vm1566_vm3, %v4183_v49, 0 }
 0x27b   :  { %1580 = vmatpush1.bf16.msra.mxu0 %v4633_v12 }
 0x27c   :  { %v952_v53 = vpack.c.bf16 %v940_v5, %v938_v33  ;;  %1581 = vmatprep.subr.bf16.mxu0 %v4641_v42  ;;  %v4669_v42 = vld [vmem:[%s6526_s5 + $0x154] ss:$8 sps:$4 sm:$0xff]  }
 0x27d   :  { %1774 = vmatpush1.bf16.msra.mxu1 %v4636_v60  ;;  %v4666_v60 = vld [vmem:[%s6526_s5 + $0x19c] ss:$8 sps:$4 sm:$0xff]  }
 0x27e   :  { %4041 = vmatprep.mubr.msk.bf16.mxu0 %vm1073_vm4, %v952_v53  ;;  %4092 = vmatprep.mubr.msk.bf16.mxu1 %vm1073_vm4, %v952_v53  ;;  %v4659_v53 = vld [vmem:[%s6526_s5 + $0x1a8] ss:$8 sps:$4 sm:$0xff]  }
 0x27f   :  { %1165 = vmatmul.mubr.bf16.gmra.mxu0 %v951_v57  ;;  %1367 = vmatmul.mubr.bf16.gmra.mxu1 %v951_v57 }
 0x280   :  { %1791 = vmatprep.mubr.bf16.mxu1 %v6534_v35  ;;  %1605 = vmatprep.mubr.bf16.mxu0 %v6534_v35 }
 0x281   :  { %1582 = vmatpush1.bf16.msra.mxu0 %v4639_v62  ;;  %4223 = vmatprep.subr.msk.bf16.mxu1 %vm1566_vm3, %v4222_v18  ;;  %v4672_v18 = vld [vmem:[%s6526_s5 + $0x18c] ss:$8 sps:$4 sm:$0xff]  }
 0x282   :  { %1583 = vmatprep.subr.bf16.mxu0 %v4644_v27 }
 0x285   :  { %1584 = vmatpush1.bf16.msra.mxu0 %v4642_v11 }
 0x286   :  { %1585 = vmatprep.subr.bf16.mxu0 %v4647_v1 }
 0x289   :  { %1586 = vmatpush1.bf16.msra.mxu0 %v4645_v0 }
 0x28a   :  { %1587 = vmatprep.subr.bf16.mxu0 %v4650_v16  ;;  %v4664_v16 = vld [vmem:[%s6526_s5 + $0x198] ss:$8 sps:$4 sm:$0xff]  }
 0x28d   :  { %1588 = vmatpush1.bf16.msra.mxu0 %v4648_v54 }
 0x28e   :  { %4185 = vmatprep.subr.msk.bf16.mxu0 %vm1566_vm3, %v4184_v14 }
 0x317   :  { %v1126_v15 = vpop.f32.mrf.mxu0  ;;  %v1328_v22 = vpop.f32.mrf.mxu1 }
 0x318   :  { %v1375_v37 = vmax.f32 %v1126_v15, %v1328_v22  ;;  %v4675_v15 = vld [vmem:[%s6526_s5 + $0x144] ss:$8 sps:$4 sm:$0xff]  }
 0x319   :  { %v1128_v26 = vpop.f32.mrf.mxu0  ;;  %v1330_v44 = vpop.f32.mrf.mxu1 }
 0x31b   :  { %v1129_v55 = vpop.f32.mrf.mxu0  ;;  %v1331_v48 = vpop.f32.mrf.mxu1 }
 0x31c   :  { %v1376_v13 = vmax.f32 %v1129_v55, %v1331_v48  ;;  %v4670_v55 = vld [vmem:[%s6526_s5 + $0x188] ss:$8 sps:$4 sm:$0xff]  }
 0x31d   :  { %v1131_v28 = vpop.f32.mrf.mxu0  ;;  %v1333_v56 = vpop.f32.mrf.mxu1 }
 0x31e   :  { %v5532_v8 = vpack.c.bf16 %v1376_v13, %v1375_v37  ;;  %v4673_v28 = vld [vmem:[%s6526_s5 + $0x140] ss:$8 sps:$4 sm:$0xff]  }
 0x31f   :  { %v1134_v25 = vpop.f32.mrf.mxu0  ;;  %v1336_v61 = vpop.f32.mrf.mxu1 }
 0x320   :  { %4148 = vmatmul.mubr.msk.bf16.vlgmr.msra.gmra.mxu1 %vm1547_vm5, %v5532_v8  ;;  %v1428_v34 = vshll.u32 %v5532_v8, 16  ;;  %v1377_v38 = vmax.f32 %v1134_v25, %v1336_v61  ;;  %v2375_v52 = vrot.slane %v5532_v8, 2  ;;  %v1426_v63 = vshrl.u32 %v5532_v8, 16  ;;  %v4681_v25 = vld [vmem:[%s6526_s5 + $0x134] ss:$8 sps:$4 sm:$0xff]  }
 0x321   :  { %v1136_v29 = vpop.f32.mrf.mxu0  ;;  %v1338_v31 = vpop.f32.mrf.mxu1  ;;  %1801 = vmatprep.mubr.bf16.mxu1 %v6534_v35  ;;  %2242 = vmatpush1.bf16.msra.mxu1 %v2236_v10 }
 0x322   :  { %2243 = vmatprep.subr.bf16.mxu1 %v4655_v51  ;;  %v1430_v19 = vrot.slane %v1428_v34, 1  ;;  %v4678_v51 = vld [vmem:[%s6526_s5 + $0x17c] ss:$8 sps:$4 sm:$0xff]  }
 0x323   :  { %v1137_v7 = vpop.f32.mrf.mxu0  ;;  %v1339_v36 = vpop.f32.mrf.mxu1 }
 0x324   :  { %v1378_v39 = vmax.f32 %v1137_v7, %v1339_v36  ;;  %v1431_v57 = vor.u32 %v1430_v19, %v1426_v63  ;;  %v4676_v36 = vld [vmem:[%s6526_s5 + $0x178] ss:$8 sps:$4 sm:$0xff]   ;;  %v4687_v19 = vld [vmem:[%s6526_s5 + $0x124] ss:$8 sps:$4 sm:$0xff]  }
 0x325   :  { %v1139_v30 = vpop.f32.mrf.mxu0  ;;  %v1341_v40 = vpop.f32.mrf.mxu1  ;;  %2244 = vmatpush1.bf16.msra.mxu1 %v4653_v32 }
 0x326   :  { %v5551_v3 = vpack.c.bf16 %v1378_v39, %v1377_v38  ;;  %2245 = vmatprep.subr.bf16.mxu1 %v4658_v6  ;;  %v4679_v39 = vld [vmem:[%s6526_s5 + $0x130] ss:$8 sps:$4 sm:$0xff]   ;;  %v4684_v30 = vld [vmem:[%s6526_s5 + $0x16c] ss:$8 sps:$4 sm:$0xff]  }
 0x327   :  { %v1142_v43 = vpop.f32.mrf.mxu0  ;;  %v1344_v47 = vpop.f32.mrf.mxu1 }
 0x328   :  { %v2376_v41 = vrot.slane %v5551_v3, 2  ;;  %4149 = vmatmul.mubr.msk.bf16.gmra.mxu1 %vm1547_vm5, %v5551_v3  ;;  %v1433_v33 = vshll.u32 %v5551_v3, 16  ;;  %v1379_v62 = vmax.f32 %v1142_v43, %v1344_v47  ;;  %v1437_v22 = vshrl.u32 %v5551_v3, 16 }
 0x329   :  { %v1144_v5 = vpop.f32.mrf.mxu0  ;;  %v1346_v58 = vpop.f32.mrf.mxu1  ;;  %1811 = vmatprep.mubr.bf16.mxu1 %v6534_v35  ;;  %2246 = vmatpush1.bf16.msra.mxu1 %v4656_v24 }
 0x32a   :  { %v1435_v17 = vrot.slane %v1433_v33, 1  ;;  %2247 = vmatprep.subr.bf16.mxu1 %v4661_v4  ;;  %v5573_v2 = vsel %vm329_vm1, %v2375_v52, %v2376_v41  ;;  %v4682_v52 = vld [vmem:[%s6526_s5 + $0x168] ss:$8 sps:$4 sm:$0xff]  }
 0x32b   :  { %v1145_v21 = vpop.f32.mrf.mxu0  ;;  %v1347_v12 = vpop.f32.mrf.mxu1 }
 0x32c   :  { %v1380_v27 = vmax.f32 %v1145_v21, %v1347_v12  ;;  %v1436_v11 = vsel %vm1424_vm6, %v1431_v57, %v1435_v17  ;;  %v1439_v37 = vor.u32 %v1437_v22, %v1435_v17  ;;  %v4690_v21 = vld [vmem:[%s6526_s5 + $0x114] ss:$8 sps:$4 sm:$0xff]  }
 0x32d   :  { %v1147_v1 = vpop.f32.mrf.mxu0  ;;  %v1349_v0 = vpop.f32.mrf.mxu1  ;;  %4125 = vmatmul.mubr.msk.bf16.vlgmr.msra.gmra.mxu0 %vm1547_vm5, %v1436_v11  ;;  %2248 = vmatpush1.bf16.msra.mxu1 %v4659_v53  ;;  %v4685_v53 = vld [vmem:[%s6526_s5 + $0x120] ss:$8 sps:$4 sm:$0xff]  }
 0x32e   :  { %v5587_v54 = vpack.c.bf16 %v1380_v27, %v1379_v62  ;;  %1615 = vmatprep.mubr.bf16.mxu0 %v6534_v35  ;;  %1986 = vmatpush1.bf16.msra.mxu0 %v1980_v9  ;;  %v4688_v1 = vld [vmem:[%s6526_s5 + $0x110] ss:$8 sps:$4 sm:$0xff]  }
 0x32f   :  { %v1150_v20 = vpop.f32.mrf.mxu0  ;;  %v1352_v14 = vpop.f32.mrf.mxu1  ;;  %2249 = vmatprep.subr.bf16.mxu1 %v4666_v60  ;;  %1987 = vmatprep.subr.bf16.mxu0 %v4669_v42 }
 0x330   :  { %4150 = vmatmul.mubr.msk.bf16.gmra.mxu1 %vm1547_vm5, %v5587_v54  ;;  %v1441_v26 = vshll.u32 %v5587_v54, 16  ;;  %v2378_v48 = vrot.slane %v5587_v54, 2  ;;  %v1381_v29 = vmax.f32 %v1150_v20, %v1352_v14  ;;  %v1445_v4 = vshrl.u32 %v5587_v54, 16 }
 0x331   :  { %v1152_v44 = vpop.f32.mrf.mxu0  ;;  %v1354_v50 = vpop.f32.mrf.mxu1  ;;  %1821 = vmatprep.mubr.bf16.mxu1 %v6534_v35  ;;  %2250 = vmatpush1.bf16.msra.mxu1 %v4664_v16 }
 0x332   :  { %v1443_v13 = vrot.slane %v1441_v26, 1  ;;  %1988 = vmatpush1.bf16.msra.mxu0 %v4667_v59  ;;  %2251 = vmatprep.subr.bf16.mxu1 %v4672_v18  ;;  %v5622_v61 = vsel %vm329_vm1, %v2376_v41, %v2378_v48  ;;  %v4693_v59 = vld [vmem:[%s6526_s5 + $0x104] ss:$8 sps:$4 sm:$0xff]  }
 0x333   :  { %v1153_v56 = vpop.f32.mrf.mxu0  ;;  %v1355_v10 = vpop.f32.mrf.mxu1  ;;  %1989 = vmatprep.subr.bf16.mxu0 %v4675_v15 }
 0x334   :  { %v1382_v31 = vmax.f32 %v1153_v56, %v1355_v10  ;;  %v1444_v32 = vsel %vm1424_vm6, %v1439_v37, %v1443_v13  ;;  %v1447_v5 = vor.u32 %v1445_v4, %v1443_v13 }
 0x335   :  { %v1155_v6 = vpop.f32.mrf.mxu0  ;;  %v1357_v7 = vpop.f32.mrf.mxu1  ;;  %4126 = vmatmul.mubr.msk.bf16.gmra.mxu0 %vm1547_vm5, %v1444_v32  ;;  %2252 = vmatpush1.bf16.msra.mxu1 %v4670_v55 }
 0x336   :  { %v5629_v38 = vpack.c.bf16 %v1382_v31, %v1381_v29  ;;  %1625 = vmatprep.mubr.bf16.mxu0 %v6534_v35  ;;  %1990 = vmatpush1.bf16.msra.mxu0 %v4673_v28  ;;  %v4696_v28 = vld [vmem:[%s6526_s5 + $0xf4] ss:$8 sps:$4 sm:$0xff]   ;;  %v4694_v7 = vld [vmem:[%s6526_s5 + $0xf0] ss:$8 sps:$4 sm:$0xff]  }
 0x337   :  { %v1158_v40 = vpop.f32.mrf.mxu0  ;;  %v1360_v24 = vpop.f32.mrf.mxu1  ;;  %2253 = vmatprep.subr.bf16.mxu1 %v4678_v51  ;;  %1991 = vmatprep.subr.bf16.mxu0 %v4681_v25  ;;  %v4244_v29 = vld [vmem:[%s6526_s5 + $0x250] sm:$0xff] }
 0x338   :  { %4151 = vmatmul.mubr.msk.bf16.gmra.mxu1 %vm1547_vm5, %v5629_v38  ;;  %v1449_v43 = vshll.u32 %v5629_v38, 16  ;;  %v2380_v41 = vrot.slane %v5629_v38, 2  ;;  %v1383_v9 = vmax.f32 %v1158_v40, %v1360_v24  ;;  %v1453_v18 = vshrl.u32 %v5629_v38, 16 }
 0x339   :  { %v1160_v47 = vpop.f32.mrf.mxu0  ;;  %v1362_v49 = vpop.f32.mrf.mxu1  ;;  %1831 = vmatprep.mubr.bf16.mxu1 %v6534_v35  ;;  %2254 = vmatpush1.bf16.msra.mxu1 %v4676_v36  ;;  %v2122_v36 = vrot.slane %v1437_v22, 1  ;;  %v2120_v22 = vrot.slane %v1428_v34, 2 }
 0x33a   :  { %v1451_v58 = vrot.slane %v1449_v43, 1  ;;  %1992 = vmatpush1.bf16.msra.mxu0 %v4679_v39  ;;  %2255 = vmatprep.subr.bf16.mxu1 %v4684_v30  ;;  %v5661_v12 = vsel %vm329_vm1, %v2378_v48, %v2380_v41  ;;  %v4691_v48 = vld [vmem:[%s6526_s5 + $0x100] ss:$8 sps:$4 sm:$0xff]   ;;  %v2123_v39 = vrot.slane %v1433_v33, 2  ;;  %v4260_v30 = vcombine.high %v4244_v29, %v4244_v29 }
 0x33b   :  { %v1161_v57 = vpop.f32.mrf.mxu0  ;;  %v1363_v17 = vpop.f32.mrf.mxu1  ;;  %1993 = vmatprep.subr.bf16.mxu0 %v4687_v19  ;;  %v2119_v47 = vrot.slane %v1426_v63, 1 }
 0x33c   :  { %v1384_v60 = vmax.f32 %v1161_v57, %v1363_v17  ;;  %v1452_v42 = vsel %vm1424_vm6, %v1447_v5, %v1451_v58  ;;  %v1455_v50 = vor.u32 %v1453_v18, %v1451_v58  ;;  %v2126_v58 = vrot.slane %v1445_v4, 1 }
 0x33d   :  { %v1163_v62 = vpop.f32.mrf.mxu0  ;;  %v1365_v27 = vpop.f32.mrf.mxu1  ;;  %4127 = vmatmul.mubr.msk.bf16.gmra.mxu0 %vm1547_vm5, %v1452_v42  ;;  %2256 = vmatpush1.bf16.msra.mxu1 %v4682_v52  ;;  %v2124_v52 = vor.u32 %v2123_v39, %v2122_v36  ;;  %v2121_v63 = vor.u32 %v2120_v22, %v2119_v47  ;;  %v2131_v4 = vrot.slane %v1449_v43, 2  ;;  %v4259_v42 = vcombine.low %v4244_v29, %v4244_v29  ;;  %v4714_v36 = vld [vmem:[%s6526_s5 + $0x1f0] ss:$8 sps:$4 sm:$0xff]   ;;  %v4719_v39 = vld [vmem:[%s6526_s5 + $0x1e4] ss:$8 sps:$4 sm:$0xff]  }
 0x33e   :  { %v5665_v11 = vpack.c.bf16 %v1384_v60, %v1383_v9  ;;  %1635 = vmatprep.mubr.bf16.mxu0 %v6534_v35  ;;  %1994 = vmatpush1.bf16.msra.mxu0 %v4685_v53  ;;  %v2127_v53 = vrot.slane %v1441_v26, 2  ;;  %v2130_v60 = vrot.slane %v1453_v18, 1  ;;  %v1876_v26 = vrot.slane %v5551_v3, 1  ;;  %v4699_v3 = vld [vmem:[%s6526_s5 + $0x240] ss:$8 sps:$4 sm:$0xff]  }
 0x33f   :  { %v1166_v0 = vpop.f32.mrf.mxu0  ;;  %v1368_v16 = vpop.f32.mrf.mxu1  ;;  %1995 = vmatprep.subr.bf16.mxu0 %v4690_v21  ;;  %v2125_v34 = vsel %vm2118_vm7, %v2121_v63, %v2124_v52  ;;  %v1875_v62 = vrot.slane %v5532_v8, 1  ;;  %v4704_v18 = vld [vmem:[%s6526_s5 + $0x234] ss:$8 sps:$4 sm:$0xff]  }
 0x340   :  { %4152 = vmatmul.mubr.msk.bf16.gmra.mxu1 %vm1547_vm5, %v5665_v11  ;;  %v1457_v20 = vshll.u32 %v5665_v11, 16  ;;  %v2382_v44 = vrot.slane %v5665_v11, 2  ;;  %v1385_v10 = vmax.f32 %v1166_v0, %v1368_v16  ;;  %v1461_v40 = vshrl.u32 %v5665_v11, 16  ;;  %v4701_v0 = vld [vmem:[%s6526_s5 + $0x244] ss:$8 sps:$4 sm:$0xff]  }
 0x341   :  { %v1168_v14 = vpop.f32.mrf.mxu0  ;;  %v1370_v15 = vpop.f32.mrf.mxu1  ;;  %1841 = vmatprep.mubr.bf16.mxu1 %v6534_v35  ;;  %v2128_v21 = vor.u32 %v2127_v53, %v2126_v58  ;;  %v2132_v27 = vor.u32 %v2131_v4, %v2130_v60  ;;  %v1877_v16 = vsel %vm1874_vm8, %v1875_v62, %v1876_v26 }
 0x342   :  { %v1459_v55 = vrot.slane %v1457_v20, 1  ;;  %1996 = vmatpush1.bf16.msra.mxu0 %v4688_v1  ;;  %v5689_v56 = vsel %vm329_vm1, %v2380_v41, %v2382_v44  ;;  %v2480_v1 = vsel %vm1566_vm3, %v4259_v42, 0  ;;  %v2134_v43 = vrot.slane %v1461_v40, 1  ;;  %v4702_v15 = vld [vmem:[%s6526_s5 + $0x230] ss:$8 sps:$4 sm:$0xff]  }
 0x343   :  { %v1169_v37 = vpop.f32.mrf.mxu0  ;;  %v1371_v13 = vpop.f32.mrf.mxu1  ;;  %1997 = vmatprep.subr.bf16.mxu0 %v4693_v59  ;;  %v2129_v9 = vsel %vm2118_vm7, %v2124_v52, %v2128_v21  ;;  %v2133_v8 = vsel %vm2118_vm7, %v2128_v21, %v2132_v27  ;;  %v2135_v59 = vrot.slane %v1457_v20, 2  ;;  %v1878_v14 = vrot.slane %v5587_v54, 1  ;;  %v4707_v20 = vld [vmem:[%s6526_s5 + $0x224] ss:$8 sps:$4 sm:$0xff]   ;;  %v4705_v54 = vld [vmem:[%s6526_s5 + $0x220] ss:$8 sps:$4 sm:$0xff]  }
 0x344   :  { %v1386_v51 = vmax.f32 %v1169_v37, %v1371_v13  ;;  %v1460_v25 = vsel %vm1424_vm6, %v1455_v50, %v1459_v55  ;;  %v1463_v33 = vor.u32 %v1461_v40, %v1459_v55  ;;  %v4710_v13 = vld [vmem:[%s6526_s5 + $0x214] ss:$8 sps:$4 sm:$0xff]  }
 0x345   :  { %v1171_v31 = vpop.f32.mrf.mxu0  ;;  %v1373_v32 = vpop.f32.mrf.mxu1  ;;  %4128 = vmatmul.mubr.msk.bf16.gmra.mxu0 %vm1547_vm5, %v1460_v25  ;;  %v1879_v50 = vsel %vm1874_vm8, %v1876_v26, %v1878_v14  ;;  %v4713_v25 = vld [vmem:[%s6526_s5 + $0x204] ss:$8 sps:$4 sm:$0xff]  }
 0x346   :  { %v5696_v6 = vpack.c.bf16 %v1386_v51, %v1385_v10  ;;  %1645 = vmatprep.mubr.bf16.mxu0 %v6534_v35  ;;  %1998 = vmatpush1.bf16.msra.mxu0 %v4691_v48  ;;  %v4708_v10 = vld [vmem:[%s6526_s5 + $0x210] ss:$8 sps:$4 sm:$0xff]   ;;  %v4716_v32 = vld [vmem:[%s6526_s5 + $0x1f4] ss:$8 sps:$4 sm:$0xff]  }
 0x347   :  { %1999 = vmatprep.subr.bf16.mxu0 %v4696_v28  ;;  %v1880_v28 = vrot.slane %v5629_v38, 1  ;;  %v4711_v38 = vld [vmem:[%s6526_s5 + $0x200] ss:$8 sps:$4 sm:$0xff]  }
 0x348   :  { %4153 = vmatmul.mubr.msk.bf16.gmra.mxu1 %vm1547_vm5, %v5696_v6  ;;  %v1465_v24 = vshll.u32 %v5696_v6, 16  ;;  %v2384_v19 = vrot.slane %v5696_v6, 2  ;;  %v1469_v57 = vshrl.u32 %v5696_v6, 16  ;;  %v1884_v40 = vrot.slane %v5696_v6, 1 }
 0x349   :  { %2273 = vmatprep.mubr.bf16.mxu1 %v6534_v35  ;;  %v1881_v29 = vsel %vm1874_vm8, %v1878_v14, %v1880_v28 }
 0x34a   :  { %v1467_v49 = vrot.slane %v1465_v24, 1  ;;  %2000 = vmatpush1.bf16.msra.mxu0 %v4694_v7  ;;  %v5720_v41 = vsel %vm329_vm1, %v2382_v44, %v2384_v19  ;;  %v2136_v44 = vor.u32 %v2135_v59, %v2134_v43  ;;  %v2139_v55 = vrot.slane %v1465_v24, 2 }
 0x34b   :  { %4261 = vmatprep.subr.msk.bf16.mxu0 %vm1566_vm3, %v4260_v30  ;;  %v2138_v48 = vrot.slane %v1469_v57, 1  ;;  %v1882_v7 = vrot.slane %v5665_v11, 1  ;;  %v4717_v11 = vld [vmem:[%s6526_s5 + $0x1e0] ss:$8 sps:$4 sm:$0xff]  }
 0x34c   :  { %v1468_v5 = vsel %vm1424_vm6, %v1463_v33, %v1467_v49  ;;  %v1471_v17 = vor.u32 %v1469_v57, %v1467_v49  ;;  %v2137_v37 = vsel %vm2118_vm7, %v2132_v27, %v2136_v44 }
 0x34d   :  { %4129 = vmatmul.mubr.msk.bf16.gmra.mxu0 %vm1547_vm5, %v1468_v5  ;;  %v2140_v51 = vor.u32 %v2139_v55, %v2138_v48  ;;  %v1883_v30 = vsel %vm1874_vm8, %v1880_v28, %v1882_v7  ;;  %v1885_v24 = vsel %vm1874_vm8, %v1882_v7, %v1884_v40 }
 0x34e   :  { %1655 = vmatprep.mubr.bf16.mxu0 %v6534_v35 }
 0x34f   :  { %v2141_v31 = vsel %vm2118_vm7, %v2136_v44, %v2140_v51 }
 0x350   :  { %4224 = vmatmul.mubr.msk.bf16.vlgmr.msra.gmra.mxu1 %vm1547_vm5, %v2125_v34 }
 0x351   :  { %2283 = vmatprep.mubr.bf16.mxu1 %v6534_v35 }
 0x355   :  { %4130 = vmatmul.mubr.msk.bf16.gmra.mxu0 %vm1547_vm5, %v1471_v17 }
 0x356   :  { %2017 = vmatprep.mubr.bf16.mxu0 %v6534_v35 }
 0x358   :  { %4225 = vmatmul.mubr.msk.bf16.gmra.mxu1 %vm1547_vm5, %v2129_v9 }
 0x359   :  { %2293 = vmatprep.mubr.bf16.mxu1 %v6534_v35 }
 0x35d   :  { %4186 = vmatmul.mubr.msk.bf16.vlgmr.msra.gmra.mxu0 %vm1547_vm5, %v1877_v16 }
 0x35e   :  { %2027 = vmatprep.mubr.bf16.mxu0 %v6534_v35  ;;  %2486 = vmatpush1.bf16.msra.mxu0 %v2480_v1 }
 0x35f   :  { %2487 = vmatprep.subr.bf16.mxu0 %v4701_v0 }
 0x360   :  { %4226 = vmatmul.mubr.msk.bf16.gmra.mxu1 %vm1547_vm5, %v2133_v8 }
 0x361   :  { %2303 = vmatprep.mubr.bf16.mxu1 %v6534_v35 }
 0x362   :  { %2488 = vmatpush1.bf16.msra.mxu0 %v4699_v3 }
 0x363   :  { %2489 = vmatprep.subr.bf16.mxu0 %v4704_v18 }
 0x365   :  { %4187 = vmatmul.mubr.msk.bf16.gmra.mxu0 %vm1547_vm5, %v1879_v50 }
 0x366   :  { %2037 = vmatprep.mubr.bf16.mxu0 %v6534_v35  ;;  %2490 = vmatpush1.bf16.msra.mxu0 %v4702_v15 }
 0x367   :  { %2491 = vmatprep.subr.bf16.mxu0 %v4707_v20 }
 0x368   :  { %4227 = vmatmul.mubr.msk.bf16.gmra.mxu1 %vm1547_vm5, %v2137_v37 }
 0x369   :  { %2313 = vmatprep.mubr.bf16.mxu1 %v6534_v35 }
 0x36a   :  { %2492 = vmatpush1.bf16.msra.mxu0 %v4705_v54 }
 0x36b   :  { %2493 = vmatprep.subr.bf16.mxu0 %v4710_v13 }
 0x36d   :  { %4188 = vmatmul.mubr.msk.bf16.gmra.mxu0 %vm1547_vm5, %v1881_v29 }
 0x36e   :  { %2047 = vmatprep.mubr.bf16.mxu0 %v6534_v35  ;;  %2494 = vmatpush1.bf16.msra.mxu0 %v4708_v10 }
 0x36f   :  { %2495 = vmatprep.subr.bf16.mxu0 %v4713_v25 }
 0x370   :  { %4228 = vmatmul.mubr.msk.bf16.gmra.mxu1 %vm1547_vm5, %v2141_v31 }
 0x371   :  { %2323 = vmatprep.mubr.bf16.mxu1 %v6534_v35 }
 0x372   :  { %2496 = vmatpush1.bf16.msra.mxu0 %v4711_v38 }
 0x373   :  { %2497 = vmatprep.subr.bf16.mxu0 %v4716_v32 }
 0x375   :  { %4189 = vmatmul.mubr.msk.bf16.gmra.mxu0 %vm1547_vm5, %v1883_v30 }
 0x376   :  { %2057 = vmatprep.mubr.bf16.mxu0 %v6534_v35  ;;  %2498 = vmatpush1.bf16.msra.mxu0 %v4714_v36 }
 0x377   :  { %2499 = vmatprep.subr.bf16.mxu0 %v4719_v39 }
 0x378   :  { %4229 = vmatmul.mubr.msk.bf16.gmra.mxu1 %vm1547_vm5, %v2140_v51 }
 0x379   :  { %2717 = vmatprep.mubr.bf16.mxu1 %v6534_v35 }
 0x37a   :  { %2500 = vmatpush1.bf16.msra.mxu0 %v4717_v11 }
 0x37d   :  { %4190 = vmatmul.mubr.msk.bf16.gmra.mxu0 %vm1547_vm5, %v1885_v24 }
 0x37e   :  { %2067 = vmatprep.mubr.bf16.mxu0 %v6534_v35 }
 0x385   :  { %4191 = vmatmul.mubr.msk.bf16.gmra.mxu0 %vm1547_vm5, %v1884_v40 }
 0x386   :  { %2517 = vmatprep.mubr.bf16.mxu0 %v6534_v35 }
 0x38d   :  { %4262 = vmatmul.mubr.msk.bf16.vlgmr.msra.gmra.mxu0 %vm1547_vm5, %v5573_v2 }
 0x38e   :  { %2527 = vmatprep.mubr.bf16.mxu0 %v6534_v35 }
 0x395   :  { %4263 = vmatmul.mubr.msk.bf16.gmra.mxu0 %vm1547_vm5, %v5622_v61 }
 0x396   :  { %2537 = vmatprep.mubr.bf16.mxu0 %v6534_v35 }
 0x39d   :  { %4264 = vmatmul.mubr.msk.bf16.gmra.mxu0 %vm1547_vm5, %v5661_v12 }
 0x39e   :  { %2547 = vmatprep.mubr.bf16.mxu0 %v6534_v35 }
 0x3a5   :  { %4265 = vmatmul.mubr.msk.bf16.gmra.mxu0 %vm1547_vm5, %v5689_v56 }
 0x3a6   :  { %2557 = vmatprep.mubr.bf16.mxu0 %v6534_v35 }
 0x3ad   :  { %4266 = vmatmul.mubr.msk.bf16.gmra.mxu0 %vm1547_vm5, %v5720_v41 }
 0x3ae   :  { %2567 = vmatprep.mubr.bf16.mxu0 %v6534_v35 }
 0x3b5   :  { %4267 = vmatmul.mubr.msk.bf16.gmra.mxu0 %vm1547_vm5, %v2384_v19 }
 0x3b6   :  { %2762 = vmatprep.mubr.bf16.mxu0 %v6534_v35 }
 0x3e0   :  { %v1793_v2 = vpop.f32.mrf.mxu1 }
 0x3e2   :  { %v1795_v61 = vpop.f32.mrf.mxu1 }
 0x3e4   :  { %v1797_v12 = vpop.f32.mrf.mxu1 }
 0x3e6   :  { %v1799_v47 = vpop.f32.mrf.mxu1 }
 0x3e8   :  { %v1803_v22 = vpop.f32.mrf.mxu1 }
 0x3ea   :  { %v1805_v33 = vpop.f32.mrf.mxu1 }
 0x3ec   :  { %v1807_v56 = vpop.f32.mrf.mxu1 }
 0x3ed   :  { %v1607_v49 = vpop.f32.mrf.mxu0 }
 0x3ee   :  { %v1794_v52 = vadd.f32 %v1793_v2, %v1607_v49  ;;  %v1809_v5 = vpop.f32.mrf.mxu1 }
 0x3ef   :  { %v1609_v63 = vpop.f32.mrf.mxu0 }
 0x3f0   :  { %v1796_v41 = vadd.f32 %v1795_v61, %v1609_v63  ;;  %v1813_v34 = vpop.f32.mrf.mxu1 }
 0x3f1   :  { %v1611_v58 = vpop.f32.mrf.mxu0 }
 0x3f2   :  { %v1798_v53 = vadd.f32 %v1797_v12, %v1611_v58  ;;  %v1815_v6 = vpop.f32.mrf.mxu1 }
 0x3f3   :  { %v1613_v57 = vpop.f32.mrf.mxu0 }
 0x3f4   :  { %v1800_v19 = vadd.f32 %v1799_v47, %v1613_v57  ;;  %v1817_v17 = vpop.f32.mrf.mxu1 }
 0x3f5   :  { %v1617_v21 = vpop.f32.mrf.mxu0 }
 0x3f6   :  { %v1804_v9 = vadd.f32 %v1803_v22, %v1617_v21  ;;  %v1819_v60 = vpop.f32.mrf.mxu1 }
 0x3f7   :  { %v1619_v4 = vpop.f32.mrf.mxu0 }
 0x3f8   :  { %v1806_v42 = vadd.f32 %v1805_v33, %v1619_v4  ;;  %v1823_v26 = vpop.f32.mrf.mxu1 }
 0x3f9   :  { %v1621_v62 = vpop.f32.mrf.mxu0 }
 0x3fa   :  { %v1808_v27 = vadd.f32 %v1807_v56, %v1621_v62  ;;  %v1825_v1 = vpop.f32.mrf.mxu1 }
 0x3fb   :  { %v1623_v0 = vpop.f32.mrf.mxu0 }
 0x3fc   :  { %v1810_v16 = vadd.f32 %v1809_v5, %v1623_v0  ;;  %v1827_v3 = vpop.f32.mrf.mxu1 }
 0x3fd   :  { %v1627_v8 = vpop.f32.mrf.mxu0 }
 0x3fe   :  { %v1814_v43 = vadd.f32 %v1813_v34, %v1627_v8  ;;  %v1829_v59 = vpop.f32.mrf.mxu1 }
 0x3ff   :  { %v1629_v18 = vpop.f32.mrf.mxu0 }
 0x400   :  { %v1816_v14 = vadd.f32 %v1815_v6, %v1629_v18  ;;  %v5838_v15 = vpop.f32.mrf.mxu1 }
 0x401   :  { %v1631_v44 = vpop.f32.mrf.mxu0 }
 0x402   :  { %v1818_v20 = vadd.f32 %v1817_v17, %v1631_v44  ;;  %v5840_v50 = vpop.f32.mrf.mxu1 }
 0x403   :  { %v1633_v54 = vpop.f32.mrf.mxu0 }
 0x404   :  { %v1820_v55 = vadd.f32 %v1819_v60, %v1633_v54  ;;  %v5842_v48 = vpop.f32.mrf.mxu1 }
 0x405   :  { %v1637_v37 = vpop.f32.mrf.mxu0 }
 0x406   :  { %v1824_v13 = vadd.f32 %v1823_v26, %v1637_v37  ;;  %v5844_v51 = vpop.f32.mrf.mxu1 }
 0x407   :  { %v1639_v28 = vpop.f32.mrf.mxu0 }
 0x408   :  { %v1826_v10 = vadd.f32 %v1825_v1, %v1639_v28  ;;  %v5846_v32 = vpop.f32.mrf.mxu1 }
 0x409   :  { %v1641_v25 = vpop.f32.mrf.mxu0 }
 0x40a   :  { %v1828_v29 = vadd.f32 %v1827_v3, %v1641_v25  ;;  %v5852_v39 = vpop.f32.mrf.mxu1 }
 0x40b   :  { %v1643_v38 = vpop.f32.mrf.mxu0 }
 0x40c   :  { %v1830_v31 = vadd.f32 %v1829_v59, %v1643_v38  ;;  %v5858_v40 = vpop.f32.mrf.mxu1 }
 0x40d   :  { %v5848_v7 = vpop.f32.mrf.mxu0  ;;  %6536 = vst [vmem:[#allocation2_spill] sm:$0xff] %v5858_v40 }
 0x40e   :  { %v5864_v61 = vpop.f32.mrf.mxu1 }
 0x40f   :  { %v5850_v36 = vpop.f32.mrf.mxu0  ;;  %6537 = vst [vmem:[#allocation3_spill] sm:$0xff] %v5864_v61 }
 0x410   :  { %v2275_v22 = vpop.f32.mrf.mxu1 }
 0x411   :  { %v5854_v30 = vpop.f32.mrf.mxu0 }
 0x412   :  { %v2277_v34 = vpop.f32.mrf.mxu1 }
 0x413   :  { %v5856_v11 = vpop.f32.mrf.mxu0 }
 0x414   :  { %v2279_v21 = vpop.f32.mrf.mxu1 }
 0x415   :  { %v5860_v24 = vpop.f32.mrf.mxu0 }
 0x416   :  { %v2281_v1 = vpop.f32.mrf.mxu1 }
 0x417   :  { %v5862_v2 = vpop.f32.mrf.mxu0 }
 0x419   :  { %v5866_v12 = vpop.f32.mrf.mxu0 }
 0x41b   :  { %v5868_v47 = vpop.f32.mrf.mxu0 }
 0x41c   :  { %6538 = vst [vmem:[#allocation4_spill] sm:$0xff] %v5868_v47 }
 0x41d   :  { %v2019_v33 = vpop.f32.mrf.mxu0 }
 0x41e   :  { %v2078_v56 = vadd.f32 %v2019_v33, %v1794_v52  ;;  %v2285_v52 = vpop.f32.mrf.mxu1 }
 0x41f   :  { %v2021_v49 = vpop.f32.mrf.mxu0 }
 0x420   :  { %v2079_v5 = vadd.f32 %v2021_v49, %v1796_v41  ;;  %v2334_v63 = vadd.f32 %v2275_v22, %v2078_v56 }
 0x421   :  { %v2023_v58 = vpop.f32.mrf.mxu0 }
 0x422   :  { %v2080_v6 = vadd.f32 %v2023_v58, %v1798_v53 }
 0x423   :  { %v2025_v57 = vpop.f32.mrf.mxu0 }
 0x424   :  { %v2081_v17 = vadd.f32 %v2025_v57, %v1800_v19  ;;  %v2287_v19 = vpop.f32.mrf.mxu1  ;;  %v2336_v35 = vadd.f32 %v2279_v21, %v2080_v6 }
 0x425   :  { %v2029_v60 = vpop.f32.mrf.mxu0 }
 0x426   :  { %v2082_v4 = vadd.f32 %v2029_v60, %v1804_v9  ;;  %v2289_v28 = vpop.f32.mrf.mxu1 }
 0x427   :  { %v2031_v26 = vpop.f32.mrf.mxu0 }
 0x428   :  { %v2083_v62 = vadd.f32 %v2031_v26, %v1806_v42  ;;  %v2291_v22 = vpop.f32.mrf.mxu1 }
 0x429   :  { %v2033_v0 = vpop.f32.mrf.mxu0 }
 0x42a   :  { %v5870_v3 = vadd.f32 %v2033_v0, %v1808_v27  ;;  %v2295_v49 = vpop.f32.mrf.mxu1 }
 0x42b   :  { %v2035_v8 = vpop.f32.mrf.mxu0 }
 0x42c   :  { %v5872_v59 = vadd.f32 %v2035_v8, %v1810_v16  ;;  %v2602_v8 = vld [vmem:[%s6528_s6] sm:$0x3] }
 0x42d   :  { %v2039_v41 = vpop.f32.mrf.mxu0 }
 0x42e   :  { %v5874_v18 = vadd.f32 %v2039_v41, %v1814_v43 }
 0x42f   :  { %v2041_v44 = vpop.f32.mrf.mxu0 }
 0x430   :  { %v5876_v53 = vadd.f32 %v2041_v44, %v1816_v14 }
 0x431   :  { %v2043_v54 = vpop.f32.mrf.mxu0 }
 0x432   :  { %v5878_v37 = vadd.f32 %v2043_v54, %v1818_v20 }
 0x433   :  { %v2045_v9 = vpop.f32.mrf.mxu0 }
 0x434   :  { %v5880_v42 = vadd.f32 %v2045_v9, %v1820_v55  ;;  %v2297_v55 = vpop.f32.mrf.mxu1  ;;  %v5915_v9 = vrot.slane %v2602_v8, %v88_v46 }
 0x435   :  { %v2049_v27 = vpop.f32.mrf.mxu0 }
 0x436   :  { %v5882_v25 = vadd.f32 %v2049_v27, %v1824_v13  ;;  %v2299_v60 = vpop.f32.mrf.mxu1  ;;  %v2335_v27 = vadd.f32 %v2277_v34, %v2079_v5  ;;  %v2338_v5 = vadd.f32 %v2285_v52, %v2082_v4 }
 0x437   :  { %v2051_v16 = vpop.f32.mrf.mxu0 }
 0x438   :  { %v5884_v38 = vadd.f32 %v2051_v16, %v1826_v10 }
 0x439   :  { %v2053_v43 = vpop.f32.mrf.mxu0 }
 0x43a   :  { %v5886_v33 = vadd.f32 %v2053_v43, %v1828_v29  ;;  %v5902_v29 = vpop.f32.mrf.mxu1 }
 0x43b   :  { %v2055_v14 = vpop.f32.mrf.mxu0 }
 0x43c   :  { %v5888_v56 = vadd.f32 %v2055_v14, %v1830_v31  ;;  %v5911_v41 = vpop.f32.mrf.mxu1  ;;  %v5919_v14 = vrot.slane %v2602_v8, %v92_v23 }
 0x43d   :  { %v5890_v20 = vpop.f32.mrf.mxu0 }
 0x43f   :  { %v5892_v58 = vpop.f32.mrf.mxu0 }
 0x441   :  { %v5894_v57 = vpop.f32.mrf.mxu0 }
 0x443   :  { %v5896_v13 = vpop.f32.mrf.mxu0 }
 0x445   :  { %v5898_v10 = vpop.f32.mrf.mxu0 }
 0x447   :  { %v5900_v26 = vpop.f32.mrf.mxu0 }
 0x448   :  { %6539 = vst [vmem:[#allocation5_spill] sm:$0xff] %v5900_v26  ;;  %v2337_v26 = vadd.f32 %v2281_v1, %v2081_v17 }
 0x449   :  { %v5904_v0 = vpop.f32.mrf.mxu0 }
 0x44a   :  { %6540 = vst [vmem:[#allocation6_spill] sm:$0xff] %v5904_v0 }
 0x44b   :  { %v5906_v31 = vpop.f32.mrf.mxu0 }
 0x44c   :  { %6541 = vst [vmem:[#allocation7_spill] sm:$0xff] %v5906_v31  ;;  %v2307_v31 = vpop.f32.mrf.mxu1 }
 0x44d   :  { %v2519_v44 = vpop.f32.mrf.mxu0 }
 0x44e   :  { %v2578_v54 = vadd.f32 %v2519_v44, %v2334_v63  ;;  %v2309_v34 = vpop.f32.mrf.mxu1 }
 0x44f   :  { %v2521_v16 = vpop.f32.mrf.mxu0 }
 0x450   :  { %v2579_v43 = vadd.f32 %v2521_v16, %v2335_v27  ;;  %v2614_v61 = vadd.f32 %v5915_v9, %v2578_v54  ;;  %v2339_v16 = vadd.f32 %v2287_v19, %v2083_v62  ;;  %v2340_v54 = vadd.f32 %v2289_v28, %v5870_v3 }
 0x451   :  { %v2523_v0 = vpop.f32.mrf.mxu0  ;;  %v2342_v28 = vadd.f32 %v2295_v49, %v5874_v18 }
 0x452   :  { %v2580_v47 = vadd.f32 %v2523_v0, %v2336_v35  ;;  %v2615_v63 = vadd.f32 %v5919_v14, %v2579_v43  ;;  %v2638_v45 = vmax.f32 %v2614_v61, 0.0  ;;  %v2311_v43 = vpop.f32.mrf.mxu1  ;;  %v2341_v61 = vadd.f32 %v2291_v22, %v5872_v59 }
 0x453   :  { %v2525_v40 = vpop.f32.mrf.mxu0  ;;  %v2344_v59 = vadd.f32 %v2299_v60, %v5878_v37 }
 0x454   :  { %v2616_v46 = vadd.f32 %v5915_v9, %v2580_v47  ;;  %v2581_v44 = vadd.f32 %v2525_v40, %v2337_v26  ;;  %v2639_v35 = vmax.f32 %v2615_v63, 0.0  ;;  %v2315_v63 = vpop.f32.mrf.mxu1 }
 0x455   :  { %v2529_v27 = vpop.f32.mrf.mxu0 }
 0x456   :  { %v2640_v23 = vmax.f32 %v2616_v46, 0.0  ;;  %v2617_v6 = vadd.f32 %v5919_v14, %v2581_v44  ;;  %v2582_v21 = vadd.f32 %v2529_v27, %v2338_v5  ;;  %v2343_v44 = vadd.f32 %v2297_v55, %v5876_v53 }
 0x457   :  { %v2531_v8 = vpop.f32.mrf.mxu0  ;;  %v2345_v55 = vadd.f32 %v5902_v29, %v5880_v42 }
 0x458   :  { %v5926_v17 = vpack.c.bf16 %v2640_v23, %v2638_v45  ;;  %v2641_v1 = vmax.f32 %v2617_v6, 0.0  ;;  %v2583_v0 = vadd.f32 %v2531_v8, %v2339_v16  ;;  %v2618_v4 = vadd.f32 %v5915_v9, %v2582_v21 }
 0x459   :  { %v2533_v47 = vpop.f32.mrf.mxu0 }
 0x45a   :  { %v5928_v40 = vpack.c.bf16 %v2641_v1, %v2639_v35  ;;  %v2584_v62 = vadd.f32 %v2533_v47, %v2340_v54  ;;  %v2619_v19 = vadd.f32 %v5919_v14, %v2583_v0  ;;  %v2642_v5 = vmax.f32 %v2618_v4, 0.0  ;;  %v2317_v54 = vpop.f32.mrf.mxu1 }
 0x45b   :  { %v2535_v52 = vpop.f32.mrf.mxu0  ;;  %v2346_v47 = vadd.f32 %v5911_v41, %v5882_v25  ;;  %v1834_v4 = vadd.f32 %v5838_v15, %v5848_v7  ;;  %v2348_v25 = vadd.f32 %v2309_v34, %v5886_v33  ;;  %v1840_v33 = vadd.f32 %v5844_v51, %v5856_v11 }
 0x45c   :  { %v2620_v26 = vadd.f32 %v5915_v9, %v2584_v62  ;;  %v2585_v3 = vadd.f32 %v2535_v52, %v2341_v61  ;;  %v2643_v22 = vmax.f32 %v2619_v19, 0.0  ;;  %v2319_v62 = vpop.f32.mrf.mxu1  ;;  %v2347_v52 = vadd.f32 %v2307_v31, %v5884_v38 }
 0x45d   :  { %v2539_v46 = vpop.f32.mrf.mxu0  ;;  %v1838_v38 = vadd.f32 %v5842_v48, %v5854_v30 }
 0x45e   :  { %v2644_v27 = vmax.f32 %v2620_v26, 0.0  ;;  %v2621_v16 = vadd.f32 %v5919_v14, %v2585_v3  ;;  %v2586_v45 = vadd.f32 %v2539_v46, %v2342_v28  ;;  %v1836_v3 = vadd.f32 %v5840_v50, %v5850_v36  ;;  %v2321_v31 = vpop.f32.mrf.mxu1 }
 0x45f   :  { %v2541_v23 = vpop.f32.mrf.mxu0  ;;  %v2094_v28 = vadd.f32 %v5890_v20, %v1834_v4  ;;  %v2349_v20 = vadd.f32 %v2311_v43, %v5888_v56  ;;  %v2096_v34 = vadd.f32 %v5894_v57, %v1838_v38  ;;  %v1846_v57 = vadd.f32 %v5852_v39, %v5862_v2 }
 0x460   :  { %v5938_v6 = vpack.c.bf16 %v2644_v27, %v2642_v5  ;;  %v2645_v21 = vmax.f32 %v2621_v16, 0.0  ;;  %v2587_v8 = vadd.f32 %v2541_v23, %v2343_v44  ;;  %v2622_v49 = vadd.f32 %v5915_v9, %v2586_v45 }
 0x461   :  { %v2543_v35 = vpop.f32.mrf.mxu0  ;;  %v2095_v5 = vadd.f32 %v5892_v58, %v1836_v3  ;;  %v2350_v58 = vadd.f32 %v2315_v63, %v2094_v28  ;;  %v2352_v63 = vadd.f32 %v2319_v62, %v2096_v34  ;;  %v6545_v62 = vld [vmem:[#allocation3_spill] sm:$0xff] }
 0x462   :  { %v5940_v18 = vpack.c.bf16 %v2645_v21, %v2643_v22  ;;  %v2588_v53 = vadd.f32 %v2543_v35, %v2344_v59  ;;  %v2623_v0 = vadd.f32 %v5919_v14, %v2587_v8  ;;  %v2646_v19 = vmax.f32 %v2622_v49, 0.0  ;;  %v2325_v22 = vpop.f32.mrf.mxu1 }
 0x463   :  { %v2545_v1 = vpop.f32.mrf.mxu0  ;;  %v1844_v59 = vadd.f32 %v5846_v32, %v5860_v24  ;;  %v2097_v21 = vadd.f32 %v5896_v13, %v1840_v33  ;;  %v2351_v56 = vadd.f32 %v2317_v54, %v2095_v5  ;;  %v6542_v13 = vld [vmem:[#allocation2_spill] sm:$0xff] }
 0x464   :  { %v2624_v37 = vadd.f32 %v5915_v9, %v2588_v53  ;;  %v2589_v60 = vadd.f32 %v2545_v1, %v2345_v55  ;;  %v2647_v41 = vmax.f32 %v2623_v0, 0.0  ;;  %v1848_v54 = vadd.f32 %v6542_v13, %v5866_v12  ;;  %v2327_v0 = vpop.f32.mrf.mxu1 }
 0x465   :  { %v2549_v61 = vpop.f32.mrf.mxu0  ;;  %v2098_v49 = vadd.f32 %v5898_v10, %v1844_v59  ;;  %v2353_v10 = vadd.f32 %v2321_v31, %v2097_v21  ;;  %v6548_v13 = vmov 0  }
 0x466   :  { %v2648_v26 = vmax.f32 %v2624_v37, 0.0  ;;  %v2625_v42 = vadd.f32 %v5919_v14, %v2589_v60  ;;  %v2590_v29 = vadd.f32 %v2549_v61, %v2346_v47  ;;  %v6543_v37 = vld [vmem:[#allocation5_spill] sm:$0xff]  ;;  %v6544_v61 = vld [vmem:[#allocation4_spill] sm:$0xff] }
 0x467   :  { %v2551_v46 = vpop.f32.mrf.mxu0  ;;  %v2099_v60 = vadd.f32 %v6543_v37, %v1846_v57  ;;  %v2354_v28 = vadd.f32 %v2325_v22, %v2098_v49  ;;  %v6071_v37 = vld [vmem:[%s6527_s9 + $0x28] sm:$0xff]  }
 0x468   :  { %v5957_v44 = vpack.c.bf16 %v2648_v26, %v2646_v19  ;;  %v2649_v15 = vmax.f32 %v2625_v42, 0.0  ;;  %v2591_v7 = vadd.f32 %v2551_v46, %v2347_v52  ;;  %v2626_v50 = vadd.f32 %v5915_v9, %v2590_v29  ;;  %v6546_v19 = vld [vmem:[#allocation6_spill] sm:$0xff]  ;;  %v2329_v46 = vpop.f32.mrf.mxu1 }
 0x469   :  { %v2553_v27 = vpop.f32.mrf.mxu0  ;;  %v1850_v52 = vadd.f32 %v6545_v62, %v6544_v61  ;;  %v2100_v26 = vadd.f32 %v6546_v19, %v1848_v54  ;;  %v6057_v54 = vld [vmem:[%s6527_s9 + $0x30] sm:$0xff]   ;;  %v6118_v62 = vld [vmem:[%s6527_s9 + $0x60] sm:$0xff]   ;;  %v6132_v19 = vld [vmem:[%s6527_s9 + $0x58] sm:$0xff]  }
 0x46a   :  { %v5962_v16 = vpack.c.bf16 %v2649_v15, %v2647_v41  ;;  %v2592_v36 = vadd.f32 %v2553_v27, %v2348_v25  ;;  %v2627_v23 = vadd.f32 %v5919_v14, %v2591_v7  ;;  %v2650_v43 = vmax.f32 %v2626_v50, 0.0  ;;  %v6547_v25 = vld [vmem:[#allocation7_spill] sm:$0xff]  ;;  %v6113_v61 = vld [vmem:[%s6527_s9 + $0x10] sm:$0xff]  }
 0x46b   :  { %v2555_v45 = vpop.f32.mrf.mxu0  ;;  %v2101_v41 = vadd.f32 %v6547_v25, %v1850_v52  ;;  %v2355_v7 = vadd.f32 %v2327_v0, %v2099_v60  ;;  %v6062_v0 = vld [vmem:[%s6527_s9 + $0x80] sm:$0xff]   ;;  %v6076_v60 = vld [vmem:[%s6527_s9 + $0x78] sm:$0xff]   ;;  %v6127_v52 = vld [vmem:[%s6527_s9 + $0x8] sm:$0xff]  }
 0x46c   :  { %v2628_v48 = vadd.f32 %v5915_v9, %v2592_v36  ;;  %v2593_v30 = vadd.f32 %v2555_v45, %v2349_v20  ;;  %v2651_v55 = vmax.f32 %v2627_v23, 0.0  ;;  %v2356_v36 = vadd.f32 %v2329_v46, %v2100_v26  ;;  %v2331_v23 = vpop.f32.mrf.mxu1  ;;  %v6141_v26 = vld [vmem:[%s6527_s9] sm:$0xff]  }
 0x46d   :  { %v2559_v8 = vpop.f32.mrf.mxu0  ;;  %v2357_v22 = vadd.f32 %v2331_v23, %v2101_v41  ;;  %v4761_v23 = vmov 0.0  }
 0x46e   :  { %v2652_v35 = vmax.f32 %v2628_v48, 0.0  ;;  %v2629_v51 = vadd.f32 %v5919_v14, %v2593_v30  ;;  %v2594_v11 = vadd.f32 %v2559_v8, %v2350_v58 }
 0x46f   :  { %v2561_v53 = vpop.f32.mrf.mxu0 }
 0x470   :  { %v5978_v1 = vpack.c.bf16 %v2652_v35, %v2650_v43  ;;  %v2653_v32 = vmax.f32 %v2629_v51, 0.0  ;;  %v2595_v24 = vadd.f32 %v2561_v53, %v2351_v56  ;;  %v2630_v39 = vadd.f32 %v5915_v9, %v2594_v11 }
 0x471   :  { %v2563_v47 = vpop.f32.mrf.mxu0 }
 0x472   :  { %v5983_v4 = vpack.c.bf16 %v2653_v32, %v2651_v55  ;;  %v2596_v2 = vadd.f32 %v2563_v47, %v2352_v63  ;;  %v2631_v29 = vadd.f32 %v5919_v14, %v2595_v24  ;;  %v2654_v38 = vmax.f32 %v2630_v39, 0.0  ;;  %v6041_v32 = vld [vmem:[%s6527_s9 + $0x38] sm:$0xff]   ;;  %v6046_v24 = vld [vmem:[%s6527_s9 + $0x88] sm:$0xff]   ;;  %v6085_v47 = vld [vmem:[%s6527_s9 + $0x20] sm:$0xff]  }
 0x473   :  { %v2565_v42 = vpop.f32.mrf.mxu0  ;;  %v6090_v39 = vld [vmem:[%s6527_s9 + $0x70] sm:$0xff]  }
 0x474   :  { %v2632_v12 = vadd.f32 %v5915_v9, %v2596_v2  ;;  %v2597_v3 = vadd.f32 %v2565_v42, %v2353_v10  ;;  %v2655_v20 = vmax.f32 %v2631_v29, 0.0  ;;  %v6099_v2 = vld [vmem:[%s6527_s9 + $0x18] sm:$0xff]   ;;  %v6104_v10 = vld [vmem:[%s6527_s9 + $0x68] sm:$0xff]   ;;  %v6146_v42 = vld [vmem:[%s6527_s9 + $0x50] sm:$0xff]  }
 0x475   :  { %v2569_v15 = vpop.f32.mrf.mxu0  ;;  %v6155_v29 = vld [vmem:[%s6527_s9 + $0x48] sm:$0xff]  }
 0x476   :  { %v2656_v5 = vmax.f32 %v2632_v12, 0.0  ;;  %v2633_v31 = vadd.f32 %v5919_v14, %v2597_v3  ;;  %v2598_v27 = vadd.f32 %v2569_v15, %v2354_v28  ;;  %v6160_v12 = vld [vmem:[%s6527_s9 + $0x98] sm:$0xff]   ;;  %v6169_v3 = vld [vmem:[%s6527_s9 + $0x40] sm:$0xff]   ;;  %v6174_v28 = vld [vmem:[%s6527_s9 + $0x90] sm:$0xff]  }
 0x477   :  { %v2571_v50 = vpop.f32.mrf.mxu0 }
 0x478   :  { %v5993_v33 = vpack.c.bf16 %v2656_v5, %v2654_v38  ;;  %v2657_v34 = vmax.f32 %v2633_v31, 0.0  ;;  %v2599_v45 = vadd.f32 %v2571_v50, %v2355_v7  ;;  %v2634_v58 = vadd.f32 %v5915_v9, %v2598_v27 }
 0x479   :  { %v2573_v48 = vpop.f32.mrf.mxu0 }
 0x47a   :  { %v5995_v30 = vpack.c.bf16 %v2657_v34, %v2655_v20  ;;  %v2600_v59 = vadd.f32 %v2573_v48, %v2356_v36  ;;  %v2635_v8 = vadd.f32 %v5919_v14, %v2599_v45  ;;  %v2658_v35 = vmax.f32 %v2634_v58, 0.0  ;;  %v4314_v34 = vld [vmem:[%s6529_s7 + $0x4] sm:$0xf] }
 0x47b   :  { %v2575_v21 = vpop.f32.mrf.mxu0  ;;  %v4317_v45 = vld [vmem:[%s6530_s8 + $0x4] sm:$0xf] }
 0x47c   :  { %v2636_v56 = vadd.f32 %v5915_v9, %v2600_v59  ;;  %v2601_v43 = vadd.f32 %v2575_v21, %v2357_v22  ;;  %v2659_v57 = vmax.f32 %v2635_v8, 0.0  ;;  %v2674_v9 = vld [vmem:[%s6529_s7] sm:$0xf] }
 0x47e   :  { %v2660_v51 = vmax.f32 %v2636_v56, 0.0  ;;  %v2637_v11 = vadd.f32 %v5919_v14, %v2601_v43  ;;  %v2726_v14 = vld [vmem:[%s6530_s8] sm:$0xf] }
 0x480   :  { %v2672_v49 = vpack.c.bf16 %v2660_v51, %v2658_v35  ;;  %v2661_v53 = vmax.f32 %v2637_v11, 0.0 }
 0x482   :  { %v6001_v63 = vpack.c.bf16 %v2661_v53, %v2659_v57  ;;  %v6004_v55 = vsel %vm329_vm1, %v2672_v49, 0 }
 0x484   :  { %4268 = vmatprep.subr.msk.bf16.mxu1 %vm329_vm1, %v6001_v63  ;;  %4270 = vmatprep.subr.msk.bf16.mxu0 %vm329_vm1, %v6001_v63 }
 0x485   :  { %2690 = vmatpush1.bf16.msra.mxu1 %v6004_v55  ;;  %2735 = vmatpush1.bf16.msra.mxu0 %v6004_v55 }
 0x486   :  { %2691 = vmatprep.subr.bf16.mxu1 %v5995_v30  ;;  %2736 = vmatprep.subr.bf16.mxu0 %v5995_v30 }
 0x489   :  { %2692 = vmatpush1.bf16.msra.mxu1 %v5993_v33  ;;  %2737 = vmatpush1.bf16.msra.mxu0 %v5993_v33 }
 0x48a   :  { %2693 = vmatprep.subr.bf16.mxu1 %v5983_v4  ;;  %2738 = vmatprep.subr.bf16.mxu0 %v5983_v4 }
 0x48d   :  { %2694 = vmatpush1.bf16.msra.mxu1 %v5978_v1  ;;  %2739 = vmatpush1.bf16.msra.mxu0 %v5978_v1 }
 0x48e   :  { %2695 = vmatprep.subr.bf16.mxu1 %v5962_v16  ;;  %2740 = vmatprep.subr.bf16.mxu0 %v5962_v16 }
 0x491   :  { %2696 = vmatpush1.bf16.msra.mxu1 %v5957_v44  ;;  %2741 = vmatpush1.bf16.msra.mxu0 %v5957_v44 }
 0x492   :  { %2697 = vmatprep.subr.bf16.mxu1 %v5940_v18  ;;  %2742 = vmatprep.subr.bf16.mxu0 %v5940_v18 }
 0x495   :  { %2698 = vmatpush1.bf16.msra.mxu1 %v5938_v6  ;;  %2743 = vmatpush1.bf16.msra.mxu0 %v5938_v6 }
 0x496   :  { %2699 = vmatprep.subr.bf16.mxu1 %v5928_v40  ;;  %2744 = vmatprep.subr.bf16.mxu0 %v5928_v40 }
 0x499   :  { %2700 = vmatpush1.bf16.msra.mxu1 %v5926_v17  ;;  %2745 = vmatpush1.bf16.msra.mxu0 %v5926_v17 }
 0x49a   :  { %2859 = vmatprep.subr.bf16.mxu1 %v6548_v13  ;;  %2980 = vmatprep.subr.bf16.mxu0 %v6548_v13 }
 0x49c   :  { %4269 = vmatmul.mubr.msk.bf16.vlgmr.msra.gmra.mxu1 %vm2675_vm9, %v2674_v9  ;;  %4271 = vmatmul.mubr.msk.bf16.vlgmr.msra.gmra.mxu0 %vm2675_vm9, %v2726_v14 }
 0x49d   :  { %2860 = vmatpush1.bf16.msra.mxu1 %v6041_v32  ;;  %2981 = vmatpush1.bf16.msra.mxu0 %v6046_v24 }
 0x49e   :  { %2861 = vmatprep.subr.bf16.mxu1 %v6548_v13  ;;  %2982 = vmatprep.subr.bf16.mxu0 %v6548_v13 }
 0x4a1   :  { %2862 = vmatpush1.bf16.msra.mxu1 %v6057_v54  ;;  %2983 = vmatpush1.bf16.msra.mxu0 %v6062_v0 }
 0x4a2   :  { %2863 = vmatprep.subr.bf16.mxu1 %v6548_v13  ;;  %2984 = vmatprep.subr.bf16.mxu0 %v6548_v13 }
 0x4a5   :  { %2864 = vmatpush1.bf16.msra.mxu1 %v6071_v37  ;;  %2985 = vmatpush1.bf16.msra.mxu0 %v6076_v60 }
 0x4a6   :  { %2865 = vmatprep.subr.bf16.mxu1 %v6548_v13  ;;  %2986 = vmatprep.subr.bf16.mxu0 %v6548_v13 }
 0x4a9   :  { %2866 = vmatpush1.bf16.msra.mxu1 %v6085_v47  ;;  %2987 = vmatpush1.bf16.msra.mxu0 %v6090_v39 }
 0x4aa   :  { %2867 = vmatprep.subr.bf16.mxu1 %v6548_v13  ;;  %2988 = vmatprep.subr.bf16.mxu0 %v6548_v13 }
 0x4ad   :  { %2868 = vmatpush1.bf16.msra.mxu1 %v6099_v2  ;;  %2989 = vmatpush1.bf16.msra.mxu0 %v6104_v10 }
 0x4ae   :  { %2869 = vmatprep.subr.bf16.mxu1 %v6548_v13  ;;  %2990 = vmatprep.subr.bf16.mxu0 %v6548_v13 }
 0x4b1   :  { %2870 = vmatpush1.bf16.msra.mxu1 %v6113_v61  ;;  %2991 = vmatpush1.bf16.msra.mxu0 %v6118_v62 }
 0x4b2   :  { %2871 = vmatprep.subr.bf16.mxu1 %v6548_v13  ;;  %2992 = vmatprep.subr.bf16.mxu0 %v6548_v13 }
 0x4b5   :  { %2872 = vmatpush1.bf16.msra.mxu1 %v6127_v52  ;;  %2993 = vmatpush1.bf16.msra.mxu0 %v6132_v19 }
 0x4b6   :  { %2873 = vmatprep.subr.bf16.mxu1 %v6548_v13  ;;  %2994 = vmatprep.subr.bf16.mxu0 %v6548_v13 }
 0x4b9   :  { %2874 = vmatpush1.bf16.msra.mxu1 %v6141_v26  ;;  %2995 = vmatpush1.bf16.msra.mxu0 %v6146_v42 }
 0x4ba   :  { %2887 = vmatprep.subr.bf16.mxu1 %v6548_v13  ;;  %3008 = vmatprep.subr.bf16.mxu0 %v6548_v13 }
 0x4bd   :  { %2888 = vmatpush2.bf16.msra.mxu1 %v6155_v29  ;;  %3009 = vmatpush2.bf16.msra.mxu0 %v6160_v12 }
 0x4be   :  { %2889 = vmatprep.subr.bf16.mxu1 %v6548_v13  ;;  %3010 = vmatprep.subr.bf16.mxu0 %v6548_v13 }
 0x4c1   :  { %2890 = vmatpush2.bf16.msra.mxu1 %v6169_v3  ;;  %3011 = vmatpush2.bf16.msra.mxu0 %v6174_v28 }
 0x4c2   :  { %4315 = vmatprep.subr.msk.bf16.mxu1 %vm329_vm1, %v6001_v63  ;;  %4318 = vmatprep.subr.msk.bf16.mxu0 %vm329_vm1, %v6001_v63 }
 0x55c   :  { %v2719_v46 = vpop.f32.mrf.mxu1  ;;  %v2764_v25 = vpop.f32.mrf.mxu0 }
 0x55d   :  { %v2771_v41 = vmax.f32 %v2719_v46, %v2764_v25 }
 0x55e   :  { %v2721_v15 = vpop.f32.mrf.mxu1  ;;  %v2766_v7 = vpop.f32.mrf.mxu0 }
 0x55f   :  { %v2772_v38 = vmax.f32 %v2721_v15, %v2766_v7  ;;  %v2773_v50 = vpack.c.bf16 %v2771_v41, %v2771_v41  ;;  %v4740_v41 = vld [vmem:[%s6531_s10 + $0x48] sm:$0xff]  }
 0x560   :  { %v2723_v5 = vpop.f32.mrf.mxu1  ;;  %v2768_v31 = vpop.f32.mrf.mxu0 }
 0x561   :  { %v2774_v27 = vpack.c.bf16 %v2772_v38, %v2772_v38  ;;  %v4741_v5 = vld [vmem:[%s6531_s10 + $0x40] sm:$0xff]   ;;  %v4742_v31 = vld [vmem:[%s6531_s10 + $0x38] sm:$0xff]  }
 0x562   :  { %v2724_v36 = vpop.f32.mrf.mxu1  ;;  %v2769_v20 = vpop.f32.mrf.mxu0 }
 0x563   :  { %4282 = vmatprep.mubr.msk.bf16.mxu1 %vm2855_vm10, %v2774_v27  ;;  %4313 = vmatprep.mubr.msk.bf16.mxu0 %vm2855_vm10, %v2774_v27  ;;  %v4743_v27 = vld [vmem:[%s6531_s10 + $0x30] sm:$0xff]   ;;  %v4344_v36 = vld [vmem:[%s6529_s7 + $0x8] sm:$0xf] }
 0x564   :  { %2892 = vmatmul.mubr.bf16.vlgmr.msra.gmra.mxu1 %v2773_v50  ;;  %3013 = vmatmul.mubr.bf16.vlgmr.msra.gmra.mxu0 %v2773_v50  ;;  %v4744_v50 = vld [vmem:[%s6531_s10 + $0x28] sm:$0xff]  }
 0x565   :  { %3042 = vmatpush1.bf16.msra.mxu1 %v6004_v55  ;;  %3088 = vmatpush1.bf16.msra.mxu0 %v6004_v55 }
 0x566   :  { %3043 = vmatprep.subr.bf16.mxu1 %v5995_v30  ;;  %3089 = vmatprep.subr.bf16.mxu0 %v5995_v30 }
 0x567   :  { %3069 = vmatprep.mubr.bf16.mxu1 %v6548_v13  ;;  %3115 = vmatprep.mubr.bf16.mxu0 %v6548_v13 }
 0x569   :  { %3044 = vmatpush1.bf16.msra.mxu1 %v5993_v33  ;;  %3090 = vmatpush1.bf16.msra.mxu0 %v5993_v33 }
 0x56a   :  { %3045 = vmatprep.subr.bf16.mxu1 %v5983_v4  ;;  %3091 = vmatprep.subr.bf16.mxu0 %v5983_v4 }
 0x56d   :  { %3046 = vmatpush1.bf16.msra.mxu1 %v5978_v1  ;;  %3092 = vmatpush1.bf16.msra.mxu0 %v5978_v1 }
 0x56e   :  { %3047 = vmatprep.subr.bf16.mxu1 %v5962_v16  ;;  %3093 = vmatprep.subr.bf16.mxu0 %v5962_v16 }
 0x571   :  { %3048 = vmatpush1.bf16.msra.mxu1 %v5957_v44  ;;  %3094 = vmatpush1.bf16.msra.mxu0 %v5957_v44 }
 0x572   :  { %3049 = vmatprep.subr.bf16.mxu1 %v5940_v18  ;;  %3095 = vmatprep.subr.bf16.mxu0 %v5940_v18 }
 0x575   :  { %3050 = vmatpush1.bf16.msra.mxu1 %v5938_v6  ;;  %3096 = vmatpush1.bf16.msra.mxu0 %v5938_v6 }
 0x576   :  { %3051 = vmatprep.subr.bf16.mxu1 %v5928_v40  ;;  %3097 = vmatprep.subr.bf16.mxu0 %v5928_v40 }
 0x579   :  { %3052 = vmatpush1.bf16.msra.mxu1 %v5926_v17  ;;  %3098 = vmatpush1.bf16.msra.mxu0 %v5926_v17 }
 0x57a   :  { %3171 = vmatprep.subr.bf16.mxu0 %v6548_v13  ;;  %3131 = vmatprep.subr.bf16.mxu1 %v6548_v13 }
 0x57c   :  { %4316 = vmatmul.mubr.msk.bf16.vlgmr.msra.gmra.mxu1 %vm2675_vm9, %v4314_v34  ;;  %4319 = vmatmul.mubr.msk.bf16.vlgmr.msra.gmra.mxu0 %vm2675_vm9, %v4317_v45 }
 0x57d   :  { %3172 = vmatpush1.bf16.msra.mxu0 %v6046_v24  ;;  %3132 = vmatpush1.bf16.msra.mxu1 %v6041_v32 }
 0x57e   :  { %3173 = vmatprep.subr.bf16.mxu0 %v6548_v13  ;;  %3133 = vmatprep.subr.bf16.mxu1 %v6548_v13 }
 0x581   :  { %3174 = vmatpush1.bf16.msra.mxu0 %v6062_v0  ;;  %3134 = vmatpush1.bf16.msra.mxu1 %v6057_v54 }
 0x582   :  { %3175 = vmatprep.subr.bf16.mxu0 %v6548_v13  ;;  %3135 = vmatprep.subr.bf16.mxu1 %v6548_v13 }
 0x585   :  { %3176 = vmatpush1.bf16.msra.mxu0 %v6076_v60  ;;  %3136 = vmatpush1.bf16.msra.mxu1 %v6071_v37 }
 0x586   :  { %3177 = vmatprep.subr.bf16.mxu0 %v6548_v13  ;;  %3137 = vmatprep.subr.bf16.mxu1 %v6548_v13 }
 0x589   :  { %3178 = vmatpush1.bf16.msra.mxu0 %v6090_v39  ;;  %3138 = vmatpush1.bf16.msra.mxu1 %v6085_v47 }
 0x58a   :  { %3179 = vmatprep.subr.bf16.mxu0 %v6548_v13  ;;  %3139 = vmatprep.subr.bf16.mxu1 %v6548_v13 }
 0x58d   :  { %3180 = vmatpush1.bf16.msra.mxu0 %v6104_v10  ;;  %3140 = vmatpush1.bf16.msra.mxu1 %v6099_v2 }
 0x58e   :  { %3181 = vmatprep.subr.bf16.mxu0 %v6548_v13  ;;  %3141 = vmatprep.subr.bf16.mxu1 %v6548_v13 }
 0x591   :  { %3182 = vmatpush1.bf16.msra.mxu0 %v6118_v62  ;;  %3142 = vmatpush1.bf16.msra.mxu1 %v6113_v61 }
 0x592   :  { %3183 = vmatprep.subr.bf16.mxu0 %v6548_v13  ;;  %3143 = vmatprep.subr.bf16.mxu1 %v6548_v13 }
 0x595   :  { %3184 = vmatpush1.bf16.msra.mxu0 %v6132_v19  ;;  %3144 = vmatpush1.bf16.msra.mxu1 %v6127_v52 }
 0x596   :  { %3185 = vmatprep.subr.bf16.mxu0 %v6548_v13  ;;  %3145 = vmatprep.subr.bf16.mxu1 %v6548_v13 }
 0x599   :  { %3186 = vmatpush1.bf16.msra.mxu0 %v6146_v42  ;;  %3146 = vmatpush1.bf16.msra.mxu1 %v6141_v26 }
 0x59a   :  { %3199 = vmatprep.subr.bf16.mxu0 %v6548_v13  ;;  %3159 = vmatprep.subr.bf16.mxu1 %v6548_v13 }
 0x59d   :  { %3200 = vmatpush2.bf16.msra.mxu0 %v6160_v12  ;;  %3160 = vmatpush2.bf16.msra.mxu1 %v6155_v29 }
 0x59e   :  { %3201 = vmatprep.subr.bf16.mxu0 %v6548_v13  ;;  %3161 = vmatprep.subr.bf16.mxu1 %v6548_v13 }
 0x5a1   :  { %3202 = vmatpush2.bf16.msra.mxu0 %v6174_v28  ;;  %3162 = vmatpush2.bf16.msra.mxu1 %v6169_v3 }
 0x5a2   :  { %4345 = vmatprep.subr.msk.bf16.mxu0 %vm329_vm1, %v6001_v63  ;;  %4417 = vmatprep.subr.bf16.mxu1 %v4761_v23 }
 0x624   :  { %v2893_v48 = vpop.f32.mrf.mxu1  ;;  %v3014_v58 = vpop.f32.mrf.mxu0 }
 0x625   :  { %v6261_v59 = vmax.f32 %v2893_v48, %v3014_v58  ;;  %v4745_v48 = vld [vmem:[%s6531_s10 + $0x20] sm:$0xff]  }
 0x626   :  { %v2895_v22 = vpop.f32.mrf.mxu1  ;;  %v3016_v21 = vpop.f32.mrf.mxu0 }
 0x628   :  { %v2896_v8 = vpop.f32.mrf.mxu1  ;;  %v3017_v56 = vpop.f32.mrf.mxu0 }
 0x62a   :  { %v2897_v43 = vpop.f32.mrf.mxu1  ;;  %v3018_v35 = vpop.f32.mrf.mxu0 }
 0x62b   :  { %v4746_v43 = vld [vmem:[%s6531_s10 + $0x18] sm:$0xff]  }
 0x63c   :  { %v3071_v51 = vpop.f32.mrf.mxu1  ;;  %v3117_v11 = vpop.f32.mrf.mxu0 }
 0x63d   :  { %v3124_v57 = vmax.f32 %v3071_v51, %v3117_v11  ;;  %v4747_v11 = vld [vmem:[%s6531_s10 + $0x10] sm:$0xff]  }
 0x63e   :  { %v3073_v49 = vpop.f32.mrf.mxu1  ;;  %v3119_v53 = vpop.f32.mrf.mxu0 }
 0x63f   :  { %v3125_v9 = vmax.f32 %v3073_v49, %v3119_v53  ;;  %v3126_v15 = vpack.c.bf16 %v3124_v57, %v3124_v57  ;;  %v4748_v57 = vld [vmem:[%s6531_s10 + $0x8] sm:$0xff]   ;;  %v4749_v49 = vld [vmem:[%s6531_s10] sm:$0xff]   ;;  %v3021_v53 = vpack.c.bf16 %v6261_v59, %v6261_v59 }
 0x640   :  { %v3075_v14 = vpop.f32.mrf.mxu1  ;;  %v3121_v46 = vpop.f32.mrf.mxu0  ;;  %v4347_v59 = vld [vmem:[%s6530_s8 + $0x8] sm:$0xf] }
 0x641   :  { %v3127_v25 = vpack.c.bf16 %v3125_v9, %v3125_v9 }
 0x642   :  { %v3076_v7 = vpop.f32.mrf.mxu1  ;;  %v3122_v38 = vpop.f32.mrf.mxu0 }
 0x643   :  { %4320 = vmatprep.mubr.msk.bf16.mxu1 %vm2855_vm10, %v3127_v25  ;;  %4321 = vmatprep.mubr.msk.bf16.mxu0 %vm2855_vm10, %v3127_v25 }
 0x644   :  { %3164 = vmatmul.mubr.bf16.vlgmr.msra.gmra.mxu1 %v3126_v15  ;;  %3204 = vmatmul.mubr.bf16.vlgmr.msra.gmra.mxu0 %v3126_v15 }
 0x645   :  { %3381 = vmatpush1.bf16.msra.mxu0 %v6004_v55  ;;  %4418 = vmatpush3.bf16.msra.mxu1 %v4740_v41 }
 0x646   :  { %3382 = vmatprep.subr.bf16.mxu0 %v5995_v30  ;;  %4419 = vmatprep.subr.bf16.mxu1 %v4761_v23 }
 0x647   :  { %3408 = vmatprep.mubr.bf16.mxu0 %v6548_v13  ;;  %4427 = vmatprep.mubr.msk.bf16.mxu1 %vm4762_vm11, %v4761_v23 }
 0x649   :  { %3383 = vmatpush1.bf16.msra.mxu0 %v5993_v33  ;;  %4420 = vmatpush3.bf16.msra.mxu1 %v4741_v5 }
 0x64a   :  { %3384 = vmatprep.subr.bf16.mxu0 %v5983_v4  ;;  %4421 = vmatprep.subr.bf16.mxu1 %v4761_v23 }
 0x64d   :  { %3385 = vmatpush1.bf16.msra.mxu0 %v5978_v1  ;;  %4422 = vmatpush3.bf16.msra.mxu1 %v4742_v31 }
 0x64e   :  { %3386 = vmatprep.subr.bf16.mxu0 %v5962_v16  ;;  %4423 = vmatprep.subr.bf16.mxu1 %v4761_v23 }
 0x651   :  { %3387 = vmatpush1.bf16.msra.mxu0 %v5957_v44  ;;  %4424 = vmatpush3.bf16.msra.mxu1 %v4743_v27 }
 0x652   :  { %3388 = vmatprep.subr.bf16.mxu0 %v5940_v18  ;;  %4425 = vmatprep.subr.bf16.mxu1 %v4761_v23 }
 0x655   :  { %3389 = vmatpush1.bf16.msra.mxu0 %v5938_v6  ;;  %4426 = vmatpush3.bf16.msra.mxu1 %v4744_v50 }
 0x656   :  { %3390 = vmatprep.subr.bf16.mxu0 %v5928_v40  ;;  %4431 = vmatprep.subr.bf16.mxu1 %v4761_v23 }
 0x659   :  { %3391 = vmatpush1.bf16.msra.mxu0 %v5926_v17 }
 0x65a   :  { %3470 = vmatprep.subr.bf16.mxu0 %v6548_v13 }
 0x65c   :  { %4346 = vmatmul.mubr.msk.bf16.vlgmr.msra.gmra.mxu0 %vm2675_vm9, %v4344_v36 }
 0x65d   :  { %3471 = vmatpush1.bf16.msra.mxu0 %v6041_v32 }
 0x65e   :  { %3472 = vmatprep.subr.bf16.mxu0 %v6548_v13 }
 0x661   :  { %3473 = vmatpush1.bf16.msra.mxu0 %v6057_v54 }
 0x662   :  { %3474 = vmatprep.subr.bf16.mxu0 %v6548_v13 }
 0x665   :  { %3475 = vmatpush1.bf16.msra.mxu0 %v6071_v37 }
 0x666   :  { %3476 = vmatprep.subr.bf16.mxu0 %v6548_v13 }
 0x669   :  { %3477 = vmatpush1.bf16.msra.mxu0 %v6085_v47 }
 0x66a   :  { %3478 = vmatprep.subr.bf16.mxu0 %v6548_v13 }
 0x66d   :  { %3479 = vmatpush1.bf16.msra.mxu0 %v6099_v2 }
 0x66e   :  { %3480 = vmatprep.subr.bf16.mxu0 %v6548_v13 }
 0x671   :  { %3481 = vmatpush1.bf16.msra.mxu0 %v6113_v61 }
 0x672   :  { %3482 = vmatprep.subr.bf16.mxu0 %v6548_v13 }
 0x675   :  { %3483 = vmatpush1.bf16.msra.mxu0 %v6127_v52 }
 0x676   :  { %3484 = vmatprep.subr.bf16.mxu0 %v6548_v13 }
 0x679   :  { %3485 = vmatpush1.bf16.msra.mxu0 %v6141_v26 }
 0x67a   :  { %3498 = vmatprep.subr.bf16.mxu0 %v6548_v13 }
 0x67d   :  { %3499 = vmatpush2.bf16.msra.mxu0 %v6155_v29 }
 0x67e   :  { %3500 = vmatprep.subr.bf16.mxu0 %v6548_v13 }
 0x681   :  { %3501 = vmatpush2.bf16.msra.mxu0 %v6169_v3 }
 0x682   :  { %4445 = vmatprep.subr.bf16.mxu0 %v4761_v23 }
 0x704   :  { %v3165_v20 = vpop.f32.mrf.mxu1  ;;  %v3205_v34 = vpop.f32.mrf.mxu0 }
 0x705   :  { %v3211_v45 = vmax.f32 %v3165_v20, %v3205_v34 }
 0x706   :  { %v3167_v58 = vpop.f32.mrf.mxu1  ;;  %v3207_v22 = vpop.f32.mrf.mxu0 }
 0x707   :  { %v3212_v21 = vpack.c.bf16 %v3211_v45, %v3211_v45 }
 0x708   :  { %v3168_v8 = vpop.f32.mrf.mxu1  ;;  %v3208_v56 = vpop.f32.mrf.mxu0 }
 0x709   :  { %4428 = vmatmul.mubr.msk.bf16.vlgmr.msra.gmra.mxu1 %vm3254_vm12, %v3212_v21  ;;  %v4750_v21 = vld [vmem:[%s6531_s10 + $0x70] sm:$0xff]  }
 0x70a   :  { %4432 = vmatpush3.bf16.msra.mxu1 %v4745_v48  ;;  %v3169_v35 = vpop.f32.mrf.mxu1  ;;  %v3209_v51 = vpop.f32.mrf.mxu0  ;;  %4441 = vmatprep.mubr.msk.bf16.mxu1 %vm4762_vm11, %v4761_v23 }
 0x70b   :  { %4433 = vmatprep.subr.bf16.mxu1 %v4761_v23  ;;  %v4752_v35 = vld [vmem:[%s6531_s10 + $0x60] sm:$0xff]   ;;  %v4753_v51 = vld [vmem:[%s6531_s10 + $0x58] sm:$0xff]  }
 0x70e   :  { %4434 = vmatpush3.bf16.msra.mxu1 %v4746_v43  ;;  %v4751_v43 = vld [vmem:[%s6531_s10 + $0x68] sm:$0xff]  }
 0x70f   :  { %4435 = vmatprep.subr.bf16.mxu1 %v4761_v23 }
 0x712   :  { %4436 = vmatpush3.bf16.msra.mxu1 %v4747_v11  ;;  %v4754_v11 = vld [vmem:[%s6531_s10 + $0x50] sm:$0xff]  }
 0x713   :  { %4437 = vmatprep.subr.bf16.mxu1 %v4761_v23 }
 0x716   :  { %4438 = vmatpush3.bf16.msra.mxu1 %v4748_v57  ;;  %v4368_v57 = vld [vmem:[%s6529_s7 + $0xc] sm:$0xf] }
 0x717   :  { %4439 = vmatprep.subr.bf16.mxu1 %v4761_v23 }
 0x71a   :  { %4440 = vmatpush3.bf16.msra.mxu1 %v4749_v49 }
 0x71b   :  { %4348 = vmatprep.subr.msk.bf16.mxu1 %vm329_vm1, %v6001_v63 }
 0x71c   :  { %v3410_v9 = vpop.f32.mrf.mxu0 }
 0x71d   :  { %4442 = vmatmul.mubr.msk.bf16.vlgmr.msra.gmra.mxu1 %vm3254_vm12, %v3021_v53 }
 0x71e   :  { %3427 = vmatpush1.bf16.msra.mxu1 %v6004_v55  ;;  %3454 = vmatprep.mubr.bf16.mxu1 %v6548_v13  ;;  %v3412_v14 = vpop.f32.mrf.mxu0 }
 0x71f   :  { %3428 = vmatprep.subr.bf16.mxu1 %v5995_v30 }
 0x720   :  { %v3414_v46 = vpop.f32.mrf.mxu0 }
 0x722   :  { %3429 = vmatpush1.bf16.msra.mxu1 %v5993_v33  ;;  %v3415_v25 = vpop.f32.mrf.mxu0 }
 0x723   :  { %3430 = vmatprep.subr.bf16.mxu1 %v5983_v4 }
 0x726   :  { %3431 = vmatpush1.bf16.msra.mxu1 %v5978_v1 }
 0x727   :  { %3432 = vmatprep.subr.bf16.mxu1 %v5962_v16 }
 0x72a   :  { %3433 = vmatpush1.bf16.msra.mxu1 %v5957_v44 }
 0x72b   :  { %3434 = vmatprep.subr.bf16.mxu1 %v5940_v18 }
 0x72e   :  { %3435 = vmatpush1.bf16.msra.mxu1 %v5938_v6 }
 0x72f   :  { %3436 = vmatprep.subr.bf16.mxu1 %v5928_v40 }
 0x732   :  { %3437 = vmatpush1.bf16.msra.mxu1 %v5926_v17 }
 0x733   :  { %3510 = vmatprep.subr.bf16.mxu1 %v6548_v13 }
 0x735   :  { %4349 = vmatmul.mubr.msk.bf16.vlgmr.msra.gmra.mxu1 %vm2675_vm9, %v4347_v59 }
 0x736   :  { %3511 = vmatpush1.bf16.msra.mxu1 %v6046_v24 }
 0x737   :  { %3512 = vmatprep.subr.bf16.mxu1 %v6548_v13 }
 0x73a   :  { %3513 = vmatpush1.bf16.msra.mxu1 %v6062_v0 }
 0x73b   :  { %3514 = vmatprep.subr.bf16.mxu1 %v6548_v13 }
 0x73e   :  { %3515 = vmatpush1.bf16.msra.mxu1 %v6076_v60 }
 0x73f   :  { %3516 = vmatprep.subr.bf16.mxu1 %v6548_v13 }
 0x742   :  { %3517 = vmatpush1.bf16.msra.mxu1 %v6090_v39 }
 0x743   :  { %3518 = vmatprep.subr.bf16.mxu1 %v6548_v13 }
 0x746   :  { %3519 = vmatpush1.bf16.msra.mxu1 %v6104_v10 }
 0x747   :  { %3520 = vmatprep.subr.bf16.mxu1 %v6548_v13 }
 0x74a   :  { %3521 = vmatpush1.bf16.msra.mxu1 %v6118_v62 }
 0x74b   :  { %3522 = vmatprep.subr.bf16.mxu1 %v6548_v13 }
 0x74e   :  { %3523 = vmatpush1.bf16.msra.mxu1 %v6132_v19 }
 0x74f   :  { %3524 = vmatprep.subr.bf16.mxu1 %v6548_v13 }
 0x752   :  { %3525 = vmatpush1.bf16.msra.mxu1 %v6146_v42 }
 0x753   :  { %3538 = vmatprep.subr.bf16.mxu1 %v6548_v13 }
 0x756   :  { %3539 = vmatpush2.bf16.msra.mxu1 %v6160_v12 }
 0x757   :  { %3540 = vmatprep.subr.bf16.mxu1 %v6548_v13 }
 0x75a   :  { %3541 = vmatpush2.bf16.msra.mxu1 %v6174_v28 }
 0x75b   :  { %4369 = vmatprep.subr.msk.bf16.mxu1 %vm329_vm1, %v6001_v63 }
 0x7c9   :  { %v3292_v41 = vpop.f32.mrf.mxu1 }
 0x7cb   :  { %v4429_v15 = vpop.f32.mrf.mxu1 }
 0x7cd   :  { %v3295_v7 = vpop.f32.mrf.mxu1 }
 0x7cf   :  { %v4430_v38 = vpop.f32.mrf.mxu1 }
 0x7dd   :  { %v3365_v5 = vpop.f32.mrf.mxu1 }
 0x7de   :  { %v6389_v31 = vadd.f32 %v3365_v5, %v3292_v41 }
 0x7df   :  { %v4443_v27 = vpop.f32.mrf.mxu1 }
 0x7e1   :  { %v3368_v50 = vpop.f32.mrf.mxu1 }
 0x7e3   :  { %v4444_v36 = vpop.f32.mrf.mxu1 }
 0x7f5   :  { %v3456_v20 = vpop.f32.mrf.mxu1 }
 0x7f6   :  { %v3463_v34 = vmax.f32 %v3410_v9, %v3456_v20 }
 0x7f7   :  { %v3458_v45 = vpop.f32.mrf.mxu1 }
 0x7f8   :  { %v3464_v48 = vmax.f32 %v3412_v14, %v3458_v45  ;;  %v3465_v8 = vpack.c.bf16 %v3463_v34, %v3463_v34 }
 0x7f9   :  { %v3460_v58 = vpop.f32.mrf.mxu1 }
 0x7fa   :  { %v3466_v22 = vpack.c.bf16 %v3464_v48, %v3464_v48 }
 0x7fb   :  { %v3461_v56 = vpop.f32.mrf.mxu1 }
 0x7fc   :  { %4350 = vmatprep.mubr.msk.bf16.mxu0 %vm2855_vm10, %v3466_v22  ;;  %4351 = vmatprep.mubr.msk.bf16.mxu1 %vm2855_vm10, %v3466_v22 }
 0x7fd   :  { %3503 = vmatmul.mubr.bf16.vlgmr.msra.gmra.mxu0 %v3465_v8  ;;  %3543 = vmatmul.mubr.bf16.vlgmr.msra.gmra.mxu1 %v3465_v8 }
 0x7fe   :  { %4446 = vmatpush3.bf16.msra.mxu0 %v4750_v21  ;;  %3647 = vmatpush1.bf16.msra.mxu1 %v6004_v55 }
 0x7ff   :  { %3648 = vmatprep.subr.bf16.mxu1 %v5995_v30  ;;  %4447 = vmatprep.subr.bf16.mxu0 %v4761_v23 }
 0x800   :  { %4455 = vmatprep.mubr.msk.bf16.mxu0 %vm4762_vm11, %v4761_v23  ;;  %3674 = vmatprep.mubr.bf16.mxu1 %v6548_v13 }
 0x802   :  { %4448 = vmatpush3.bf16.msra.mxu0 %v4751_v43  ;;  %3649 = vmatpush1.bf16.msra.mxu1 %v5993_v33 }
 0x803   :  { %3650 = vmatprep.subr.bf16.mxu1 %v5983_v4  ;;  %4449 = vmatprep.subr.bf16.mxu0 %v4761_v23 }
 0x806   :  { %4450 = vmatpush3.bf16.msra.mxu0 %v4752_v35  ;;  %3651 = vmatpush1.bf16.msra.mxu1 %v5978_v1 }
 0x807   :  { %3652 = vmatprep.subr.bf16.mxu1 %v5962_v16  ;;  %4451 = vmatprep.subr.bf16.mxu0 %v4761_v23 }
 0x80a   :  { %4452 = vmatpush3.bf16.msra.mxu0 %v4753_v51  ;;  %3653 = vmatpush1.bf16.msra.mxu1 %v5957_v44 }
 0x80b   :  { %3654 = vmatprep.subr.bf16.mxu1 %v5940_v18  ;;  %4453 = vmatprep.subr.bf16.mxu0 %v4761_v23 }
 0x80e   :  { %4454 = vmatpush3.bf16.msra.mxu0 %v4754_v11  ;;  %3655 = vmatpush1.bf16.msra.mxu1 %v5938_v6 }
 0x80f   :  { %3656 = vmatprep.subr.bf16.mxu1 %v5928_v40  ;;  %4372 = vmatprep.subr.msk.bf16.mxu0 %vm329_vm1, %v6001_v63 }
 0x812   :  { %3657 = vmatpush1.bf16.msra.mxu1 %v5926_v17 }
 0x813   :  { %3736 = vmatprep.subr.bf16.mxu1 %v6548_v13 }
 0x815   :  { %4370 = vmatmul.mubr.msk.bf16.vlgmr.msra.gmra.mxu1 %vm2675_vm9, %v4368_v57 }
 0x816   :  { %3737 = vmatpush1.bf16.msra.mxu1 %v6041_v32 }
 0x817   :  { %3738 = vmatprep.subr.bf16.mxu1 %v6548_v13 }
 0x81a   :  { %3739 = vmatpush1.bf16.msra.mxu1 %v6057_v54 }
 0x81b   :  { %3740 = vmatprep.subr.bf16.mxu1 %v6548_v13 }
 0x81e   :  { %3741 = vmatpush1.bf16.msra.mxu1 %v6071_v37 }
 0x81f   :  { %3742 = vmatprep.subr.bf16.mxu1 %v6548_v13 }
 0x822   :  { %3743 = vmatpush1.bf16.msra.mxu1 %v6085_v47 }
 0x823   :  { %3744 = vmatprep.subr.bf16.mxu1 %v6548_v13 }
 0x826   :  { %3745 = vmatpush1.bf16.msra.mxu1 %v6099_v2 }
 0x827   :  { %3746 = vmatprep.subr.bf16.mxu1 %v6548_v13 }
 0x82a   :  { %3747 = vmatpush1.bf16.msra.mxu1 %v6113_v61 }
 0x82b   :  { %3748 = vmatprep.subr.bf16.mxu1 %v6548_v13 }
 0x82e   :  { %3749 = vmatpush1.bf16.msra.mxu1 %v6127_v52 }
 0x82f   :  { %3750 = vmatprep.subr.bf16.mxu1 %v6548_v13 }
 0x832   :  { %3751 = vmatpush1.bf16.msra.mxu1 %v6141_v26 }
 0x833   :  { %3764 = vmatprep.subr.bf16.mxu1 %v6548_v13 }
 0x836   :  { %3765 = vmatpush2.bf16.msra.mxu1 %v6155_v29 }
 0x837   :  { %3766 = vmatprep.subr.bf16.mxu1 %v6548_v13 }
 0x83a   :  { %3767 = vmatpush2.bf16.msra.mxu1 %v6169_v3  ;;  %v4758_v3 = vld [vmem:[%s6531_s10 + $0x80] sm:$0xff]  }
 0x83b   :  { %4459 = vmatprep.subr.bf16.mxu1 %v4761_v23 }
 0x8bd   :  { %v3504_v63 = vpop.f32.mrf.mxu0  ;;  %v3544_v32 = vpop.f32.mrf.mxu1 }
 0x8be   :  { %v3550_v54 = vmax.f32 %v3504_v63, %v3544_v32 }
 0x8bf   :  { %v3506_v37 = vpop.f32.mrf.mxu0  ;;  %v3546_v47 = vpop.f32.mrf.mxu1 }
 0x8c0   :  { %v3551_v2 = vpack.c.bf16 %v3550_v54, %v3550_v54 }
 0x8c1   :  { %v3507_v61 = vpop.f32.mrf.mxu0  ;;  %v3547_v52 = vpop.f32.mrf.mxu1 }
 0x8c2   :  { %4456 = vmatmul.mubr.msk.bf16.vlgmr.msra.gmra.mxu0 %vm3254_vm12, %v3551_v2 }
 0x8c3   :  { %3693 = vmatpush1.bf16.msra.mxu0 %v6004_v55  ;;  %v3508_v26 = vpop.f32.mrf.mxu0  ;;  %v3548_v29 = vpop.f32.mrf.mxu1  ;;  %3720 = vmatprep.mubr.bf16.mxu0 %v6548_v13 }
 0x8c4   :  { %3694 = vmatprep.subr.bf16.mxu0 %v5995_v30 }
 0x8c7   :  { %3695 = vmatpush1.bf16.msra.mxu0 %v5993_v33  ;;  %v4371_v33 = vld [vmem:[%s6530_s8 + $0xc] sm:$0xf] }
 0x8c8   :  { %3696 = vmatprep.subr.bf16.mxu0 %v5983_v4 }
 0x8cb   :  { %3697 = vmatpush1.bf16.msra.mxu0 %v5978_v1 }
 0x8cc   :  { %3698 = vmatprep.subr.bf16.mxu0 %v5962_v16 }
 0x8cf   :  { %3699 = vmatpush1.bf16.msra.mxu0 %v5957_v44 }
 0x8d0   :  { %3700 = vmatprep.subr.bf16.mxu0 %v5940_v18 }
 0x8d3   :  { %3701 = vmatpush1.bf16.msra.mxu0 %v5938_v6 }
 0x8d4   :  { %3702 = vmatprep.subr.bf16.mxu0 %v5928_v40 }
 0x8d7   :  { %3703 = vmatpush1.bf16.msra.mxu0 %v5926_v17  ;;  %v3676_v17 = vpop.f32.mrf.mxu1 }
 0x8d8   :  { %3776 = vmatprep.subr.bf16.mxu0 %v6548_v13 }
 0x8d9   :  { %v3678_v40 = vpop.f32.mrf.mxu1 }
 0x8da   :  { %4373 = vmatmul.mubr.msk.bf16.vlgmr.msra.gmra.mxu0 %vm2675_vm9, %v4371_v33 }
 0x8db   :  { %3777 = vmatpush1.bf16.msra.mxu0 %v6046_v24  ;;  %v3680_v6 = vpop.f32.mrf.mxu1 }
 0x8dc   :  { %3778 = vmatprep.subr.bf16.mxu0 %v6548_v13 }
 0x8dd   :  { %v3681_v18 = vpop.f32.mrf.mxu1 }
 0x8df   :  { %3779 = vmatpush1.bf16.msra.mxu0 %v6062_v0 }
 0x8e0   :  { %3780 = vmatprep.subr.bf16.mxu0 %v6548_v13 }
 0x8e3   :  { %3781 = vmatpush1.bf16.msra.mxu0 %v6076_v60 }
 0x8e4   :  { %3782 = vmatprep.subr.bf16.mxu0 %v6548_v13 }
 0x8e7   :  { %3783 = vmatpush1.bf16.msra.mxu0 %v6090_v39 }
 0x8e8   :  { %3784 = vmatprep.subr.bf16.mxu0 %v6548_v13 }
 0x8eb   :  { %3785 = vmatpush1.bf16.msra.mxu0 %v6104_v10 }
 0x8ec   :  { %3786 = vmatprep.subr.bf16.mxu0 %v6548_v13 }
 0x8ef   :  { %3787 = vmatpush1.bf16.msra.mxu0 %v6118_v62 }
 0x8f0   :  { %3788 = vmatprep.subr.bf16.mxu0 %v6548_v13 }
 0x8f3   :  { %3789 = vmatpush1.bf16.msra.mxu0 %v6132_v19 }
 0x8f4   :  { %3790 = vmatprep.subr.bf16.mxu0 %v6548_v13 }
 0x8f7   :  { %3791 = vmatpush1.bf16.msra.mxu0 %v6146_v42  ;;  %v4756_v42 = vld [vmem:[%s6531_s10 + $0x90] sm:$0xff]  }
 0x8f8   :  { %3804 = vmatprep.subr.bf16.mxu0 %v6548_v13 }
 0x8fb   :  { %3805 = vmatpush2.bf16.msra.mxu0 %v6160_v12  ;;  %v4757_v12 = vld [vmem:[%s6531_s10 + $0x88] sm:$0xff]  }
 0x8fc   :  { %3806 = vmatprep.subr.bf16.mxu0 %v6548_v13  ;;  %v4755_v13 = vld [vmem:[%s6531_s10 + $0x98] sm:$0xff]  }
 0x8ff   :  { %3807 = vmatpush2.bf16.msra.mxu0 %v6174_v28  ;;  %v4759_v28 = vld [vmem:[%s6531_s10 + $0x78] sm:$0xff]  }
 0x982   :  { %v3630_v44 = vpop.f32.mrf.mxu0 }
 0x983   :  { %v3636_v16 = vadd.f32 %v3630_v44, %v6389_v31 }
 0x984   :  { %v4457_v1 = vpop.f32.mrf.mxu0 }
 0x986   :  { %v3633_v4 = vpop.f32.mrf.mxu0 }
 0x988   :  { %v4458_v30 = vpop.f32.mrf.mxu0 }
 0x99a   :  { %v3722_v55 = vpop.f32.mrf.mxu0 }
 0x99b   :  { %v3729_v24 = vmax.f32 %v3676_v17, %v3722_v55 }
 0x99c   :  { %v3724_v0 = vpop.f32.mrf.mxu0 }
 0x99d   :  { %v3730_v60 = vmax.f32 %v3678_v40, %v3724_v0  ;;  %v3731_v62 = vpack.c.bf16 %v3729_v24, %v3729_v24 }
 0x99e   :  { %v3726_v39 = vpop.f32.mrf.mxu0 }
 0x99f   :  { %v3732_v10 = vpack.c.bf16 %v3730_v60, %v3730_v60 }
 0x9a0   :  { %v3727_v19 = vpop.f32.mrf.mxu0 }
 0x9a1   :  { %4374 = vmatprep.mubr.msk.bf16.mxu1 %vm2855_vm10, %v3732_v10  ;;  %4375 = vmatprep.mubr.msk.bf16.mxu0 %vm2855_vm10, %v3732_v10 }
 0x9a2   :  { %3769 = vmatmul.mubr.bf16.vlgmr.msra.gmra.mxu1 %v3731_v62  ;;  %3809 = vmatmul.mubr.bf16.vlgmr.msra.gmra.mxu0 %v3731_v62 }
 0x9a3   :  { %4460 = vmatpush3.bf16.msra.mxu1 %v4755_v13  ;;  %4469 = vmatprep.mubr.msk.bf16.mxu1 %vm4762_vm11, %v4761_v23 }
 0x9a4   :  { %4461 = vmatprep.subr.bf16.mxu1 %v4761_v23 }
 0x9a7   :  { %4462 = vmatpush3.bf16.msra.mxu1 %v4756_v42 }
 0x9a8   :  { %4463 = vmatprep.subr.bf16.mxu1 %v4761_v23 }
 0x9ab   :  { %4464 = vmatpush3.bf16.msra.mxu1 %v4757_v12 }
 0x9ac   :  { %4465 = vmatprep.subr.bf16.mxu1 %v4761_v23 }
 0x9af   :  { %4466 = vmatpush3.bf16.msra.mxu1 %v4758_v3 }
 0x9b0   :  { %4467 = vmatprep.subr.bf16.mxu1 %v4761_v23  ;;  %v4392_v23 = vld [vmem:[%s6532_s11] ss:$0 sm:$0xff] }
 0x9b3   :  { %4468 = vmatpush3.bf16.msra.mxu1 %v4759_v28 }
 0xa62   :  { %v3770_v49 = vpop.f32.mrf.mxu1  ;;  %v3810_v53 = vpop.f32.mrf.mxu0 }
 0xa63   :  { %v3816_v59 = vmax.f32 %v3770_v49, %v3810_v53 }
 0xa64   :  { %v3772_v9 = vpop.f32.mrf.mxu1  ;;  %v3812_v14 = vpop.f32.mrf.mxu0 }
 0xa65   :  { %v3817_v46 = vpack.c.bf16 %v3816_v59, %v3816_v59 }
 0xa66   :  { %v3773_v25 = vpop.f32.mrf.mxu1  ;;  %v3813_v41 = vpop.f32.mrf.mxu0 }
 0xa67   :  { %4470 = vmatmul.mubr.msk.bf16.vlgmr.msra.gmra.mxu1 %vm3254_vm12, %v3817_v46 }
 0xa68   :  { %v3774_v15 = vpop.f32.mrf.mxu1  ;;  %v3814_v7 = vpop.f32.mrf.mxu0 }
 0xb27   :  { %v3896_v38 = vpop.f32.mrf.mxu1 }
 0xb28   :  { %v3902_v5 = vadd.f32 %v3896_v38, %v3636_v16 }
 0xb29   :  { %v4471_v31 = vpop.f32.mrf.mxu1 }
 0xb2a   :  { %v3910_v27 = vadd.f32 %v4392_v23, %v3902_v5 }
 0xb2b   :  { %v3899_v50 = vpop.f32.mrf.mxu1 }
 0xb2c   :  { %v3911_v36 = vmax.f32 %v3910_v27, 0.0 }
 0xb2d   :  { %v4472_v20 = vpop.f32.mrf.mxu1 }
 0xb2e   :  { %3913 = vst.msk [vmem:[%s6533_s12] sm:$0xff] %vm3912_vm13, %v3911_v36 }

</bundles_post_ra>
